<compile_context>
chip_gen: v6e
topology: v6e:2x2x1
jax: 0.10.0
libtpu: 0.0.40
codegen_flags: <defaults>
</compile_context>

<pallas_src>
import numpy as np
import jax
import jax.numpy as jnp
from jax.experimental import pallas as pl
from jax.experimental.pallas import tpu as pltpu


# ----------------------- static bilinear interpolation weights -----------------------

def _interp_matrix(n_in, n_out):
    """1-D F.interpolate(mode='bilinear', align_corners=True) weights, (n_out, n_in)."""
    m = np.zeros((n_out, n_in), np.float32)
    if n_in == 1 or n_out == 1:
        m[:, 0] = 1.0
        return m
    pos = np.arange(n_out, dtype=np.float64) * (n_in - 1) / (n_out - 1)
    i0 = np.clip(np.floor(pos).astype(np.int64), 0, n_in - 2)
    frac = (pos - i0).astype(np.float32)
    m[np.arange(n_out), i0] += 1.0 - frac
    m[np.arange(n_out), i0 + 1] += frac
    return m


# ----------------------------- fused per-level FPN kernel ----------------------------

def _make_level_kernel(H, W, Cin, mid, Cout, Hout, Wout):
    WCin, Wmid, WCout = W * Cin, W * mid, W * Cout
    inv_hw = 1.0 / float(H * W)

    def kernel(x_ref, a1_ref, alpha_ref, a2_ref, b2_ref, g_ref, gt_ref,
               kw_ref, rh_ref, o_ref, xpad, ypad):
        # ---------- conv1 (3x3, pad=1): 3 lane-dense banded MXU dots ----------
        xpad[...] = jnp.zeros_like(xpad)                 # zero H-halo built in VMEM
        xpad[1:H + 1, :] = x_ref[0]
        y = jnp.zeros((H, Wmid), jnp.float32)
        for dy in range(3):
            y = y + jnp.dot(xpad[dy:dy + H, :].astype(jnp.bfloat16), a1_ref[dy],
                            preferred_element_type=jnp.float32)
        # conv1 bias omitted on purpose: InstanceNorm(affine=False) cancels it exactly.

        # ---------- InstanceNorm2d(affine=False, eps=1e-5) + PReLU ----------
        # Per-channel stats via group-sum matrices G/Gt (channel c lives on lanes
        # {w*mid + c}); avoids any in-kernel relayout/reshape.
        sum_h = jnp.sum(y, axis=0, keepdims=True)                          # (1, W*mid)
        mean_l = jnp.dot(jnp.dot(sum_h, g_ref[...]), gt_ref[...]) * inv_hw
        yc = y - mean_l
        ssq_h = jnp.sum(yc * yc, axis=0, keepdims=True)
        var_l = jnp.dot(jnp.dot(ssq_h, g_ref[...]), gt_ref[...]) * inv_hw
        y = yc * jax.lax.rsqrt(var_l + 1e-5)
        y = jnp.where(y >= 0.0, y, alpha_ref[...] * y)                     # PReLU

        # ---------- conv2 (3x3, pad=1, bias): intermediate never leaves VMEM ----------
        ypad[...] = jnp.zeros_like(ypad)
        ypad[1:H + 1, :] = y
        y2 = jnp.zeros((H, WCout), jnp.float32)
        for dy in range(3):
            y2 = y2 + jnp.dot(ypad[dy:dy + H, :].astype(jnp.bfloat16), a2_ref[dy],
                              preferred_element_type=jnp.float32)
        y2 = y2 + b2_ref[...]

        # ---------- bilinear upsample (align_corners=True), separable, lane-dense ----------
        u = jnp.dot(y2.astype(jnp.bfloat16), kw_ref[...],
                    preferred_element_type=jnp.float32)                    # (H, Wout*Cout)
        o_ref[0] = jnp.dot(rh_ref[...], u.astype(jnp.bfloat16),
                           preferred_element_type=jnp.float32)             # (Hout, Wout*Cout)

    return kernel


def fpn_level(x_nchw, p, scale):
    """One FPN level (conv+IN+PReLU -> conv -> bilinear x scale), one pallas_call.

    Returns a lane-dense (N, Hout, Wout*Cout) f32 slab.
    """
    N, Cin, H, W = x_nchw.shape
    mid = p["w1"].shape[-1]
    Cout = p["w2"].shape[-1]
    Hout, Wout = H * scale, W * scale

    # NCHW -> lane-dense (N, H, W*Cin). Only the small low-res input is relaid out in XLA.
    x2d = jnp.transpose(x_nchw, (0, 2, 3, 1)).reshape(N, H, W * Cin).astype(jnp.float32)

    # Banded conv matrices: A_dy[w_in*Ci + ci, w*Co + co] = w[dy, w_in - w + 1, ci, co].
    # Zero-padding along W is encoded by the band (out-of-range taps simply absent).
    def banded(w):                                        # w: (3, 3, Ci, Co) f32
        mats = []
        for dy in range(3):
            ci, co = w.shape[2], w.shape[3]
            a = jnp.zeros((W * ci, W * co), jnp.float32)
            for dx in range(3):
                eye = np.eye(W, W, k=1 - dx, dtype=np.float32)
                a = a + jnp.kron(jnp.asarray(eye), w[dy, dx])
            mats.append(a)
        return jnp.stack(mats).astype(jnp.bfloat16)       # (3, W*Ci, W*Co)

    a1 = banded(p["w1"])                                   # (3, W*Cin, W*mid)
    a2 = banded(p["w2"])                                   # (3, W*mid, W*Cout)
    b2row = jnp.tile(p["b2"].reshape(1, Cout), (1, W))     # (1, W*Cout)

    # Static helper matrices (constants under jit).
    g = jnp.asarray(np.kron(np.ones((W, 1), np.float32), np.eye(mid, dtype=np.float32)))
    gt = jnp.asarray(np.kron(np.ones((1, W), np.float32), np.eye(mid, dtype=np.float32)))
    rw = _interp_matrix(W, Wout)                                           # (Wout, W)
    kw = jnp.asarray(np.kron(rw.T, np.eye(Cout, dtype=np.float32))).astype(jnp.bfloat16)
    rh = jnp.asarray(_interp_matrix(H, Hout)).astype(jnp.bfloat16)         # (Hout, H)

    # TODO(synk): for production-size feature maps add a row-band grid axis with a
    # two-pass (accumulate-then-normalize) InstanceNorm so a single image block never
    # has to fit v7x's 64 MiB VMEM, and to give the megacore >N parallel steps.
    return pl.pallas_call(
        _make_level_kernel(H, W, Cin, mid, Cout, Hout, Wout),
        out_shape=jax.ShapeDtypeStruct((N, Hout, Wout * Cout), jnp.float32),
        grid_spec=pltpu.PrefetchScalarGridSpec(
            num_scalar_prefetch=0,
            grid=(N,),
            in_specs=[
                pl.BlockSpec((1, H, W * Cin), lambda n: (n, 0, 0)),
                pl.BlockSpec((3, W * Cin, W * mid), lambda n: (0, 0, 0)),
                pl.BlockSpec((1, 1), lambda n: (0, 0)),
                pl.BlockSpec((3, W * mid, W * Cout), lambda n: (0, 0, 0)),
                pl.BlockSpec((1, W * Cout), lambda n: (0, 0)),
                pl.BlockSpec((W * mid, mid), lambda n: (0, 0)),
                pl.BlockSpec((mid, W * mid), lambda n: (0, 0)),
                pl.BlockSpec((W * Cout, Wout * Cout), lambda n: (0, 0)),
                pl.BlockSpec((Hout, H), lambda n: (0, 0)),
            ],
            out_specs=pl.BlockSpec((1, Hout, Wout * Cout), lambda n: (n, 0, 0)),
            scratch_shapes=[
                pltpu.VMEM((H + 2, W * Cin), jnp.float32),   # conv1 H-halo
                pltpu.VMEM((H + 2, W * mid), jnp.float32),   # conv2 H-halo (in-VMEM intermediate)
            ],
        ),
        compiler_params=pltpu.CompilerParams(
            dimension_semantics=("parallel",),
            vmem_limit_bytes=32 * 1024 * 1024,
        ),
    )(x2d, a1, p["alpha"], a2, b2row, g, gt, kw, rh)


# ----------------------------------- FPN forward -------------------------------------

def fpn_forward(xs_nchw, last_layer_nchw, params):
    L = len(xs_nchw)
    outs = []
    for i, (x, p) in enumerate(zip(xs_nchw, params["levels"])):
        scale = 2 ** (L - i)
        y = fpn_level(x, p, scale)                        # (N, Hout, Wout*Cout) slab
        N, Hout, WC = y.shape
        Cout = p["w2"].shape[-1]
        y = y.reshape(N, Hout, WC // Cout, Cout)          # contiguous (free) reshape
        outs.append(jnp.transpose(y, (0, 3, 1, 2)))       # NHWC -> NCHW
    outs.append(last_layer_nchw.astype(jnp.float32))
    # TODO(synk): write each level's slab directly into its channel slice of the concat
    # buffer (input_output_aliases) to remove this final HBM concat at production sizes.
    return jnp.concatenate(outs, axis=1)                  # torch.cat(dim=1)


# --------------------------------- parameter init ------------------------------------

def init_fpn_params(key, input_channels, output_channels):
    levels = []
    for cin, cout in zip(input_channels, output_channels):
        mid = cout * 2
        key, k1, k2, k3, k4 = jax.random.split(key, 5)
        s1 = 1.0 / float(np.sqrt(9 * cin))
        s2 = 1.0 / float(np.sqrt(9 * mid))
        levels.append({
            # MONAI Convolution: Conv2d(cin->mid, 3, pad=1, bias) -> InstanceNorm2d -> PReLU
            "w1": jax.random.normal(k1, (3, 3, cin, mid), jnp.float32) * s1,
            # b1 exists in the torch module, but InstanceNorm(affine=False) cancels it
            # exactly, so it is never used (and never DMA'd).
            "b1": jax.random.normal(k2, (mid,), jnp.float32) * s1,
            "alpha": jnp.full((1, 1), 0.25, jnp.float32),        # nn.PReLU() default init
            # trailing nn.Conv2d(mid -> cout, 3, padding=1, bias=True)
            "w2": jax.random.normal(k3, (3, 3, mid, cout), jnp.float32) * s2,
            "b2": jax.random.normal(k4, (cout,), jnp.float32) * s2,
        })
    return {"levels": levels}


# --------------------------------------- main -----------------------------------------

if __name__ == "__main__":
    key = jax.random.PRNGKey(0)
    pkey, k0, k1, k2 = jax.random.split(key, 4)

    input_channels = [32, 16]
    output_channels = [16, 8]
    params = init_fpn_params(pkey, input_channels, output_channels)

    # xs[i] upsampled by 2**(L-i) must match last_layer's 32x32 spatial size.
    xs = [jax.random.normal(k0, (2, 32, 8, 8), jnp.float32),     # level 0: x4 upsample
          jax.random.normal(k1, (2, 16, 16, 16), jnp.float32)]   # level 1: x2 upsample
    last_layer = jax.random.normal(k2, (2, 8, 32, 32), jnp.float32)

    fwd = jax.jit(fpn_forward)
    y = fwd(xs, last_layer, params)
    jax.block_until_ready(y)
    assert y.shape == (2, 16 + 8 + 8, 32, 32), y.shape
    assert bool(jnp.all(jnp.isfinite(y)))
    print("KERNEL_OK")
</pallas_src>

<mosaic_0001>
module attributes {stable_mosaic.version = 11 : i64} {
  func.func @kernel(%arg0: i32, %arg1: memref<1x16x256xf32, #tpu.memory_space<vmem>>, %arg2: memref<3x256x256xbf16, #tpu.memory_space<vmem>>, %arg3: memref<1x1xf32, #tpu.memory_space<vmem>>, %arg4: memref<3x256x128xbf16, #tpu.memory_space<vmem>>, %arg5: memref<1x128xf32, #tpu.memory_space<vmem>>, %arg6: memref<256x16xf32, #tpu.memory_space<vmem>>, %arg7: memref<16x256xf32, #tpu.memory_space<vmem>>, %arg8: memref<128x256xbf16, #tpu.memory_space<vmem>>, %arg9: memref<32x16xbf16, #tpu.memory_space<vmem>>, %arg10: memref<1x32x256xf32, #tpu.memory_space<vmem>>, %arg11: memref<18x256xf32, #tpu.memory_space<vmem>>, %arg12: memref<18x256xf32, #tpu.memory_space<vmem>>) attributes {dimension_semantics = [#tpu.dimension_semantics<parallel>], iteration_bounds = array<i64: 2>, scalar_prefetch = 0 : i64, scratch_operands = 2 : i64, tpu.core_type = #tpu.core_type<tc>, window_params = [{transform_indices = @transform_0, window_bounds = array<i64: 1, 16, 256>}, {pipeline_mode = #tpu.pipeline_mode<synchronous>, transform_indices = @transform_1, window_bounds = array<i64: 3, 256, 256>}, {pipeline_mode = #tpu.pipeline_mode<synchronous>, transform_indices = @transform_2, window_bounds = array<i64: 1, 1>}, {pipeline_mode = #tpu.pipeline_mode<synchronous>, transform_indices = @transform_3, window_bounds = array<i64: 3, 256, 128>}, {pipeline_mode = #tpu.pipeline_mode<synchronous>, transform_indices = @transform_4, window_bounds = array<i64: 1, 128>}, {pipeline_mode = #tpu.pipeline_mode<synchronous>, transform_indices = @transform_5, window_bounds = array<i64: 256, 16>}, {pipeline_mode = #tpu.pipeline_mode<synchronous>, transform_indices = @transform_6, window_bounds = array<i64: 16, 256>}, {pipeline_mode = #tpu.pipeline_mode<synchronous>, transform_indices = @transform_7, window_bounds = array<i64: 128, 256>}, {pipeline_mode = #tpu.pipeline_mode<synchronous>, transform_indices = @transform_8, window_bounds = array<i64: 32, 16>}, {transform_indices = @transform_9, window_bounds = array<i64: 1, 32, 256>}]} {
    %cst = arith.constant 0.000000e+00 : f32
    %0 = vector.broadcast %cst : f32 to vector<18x256xf32>
    %c0 = arith.constant 0 : index
    %c0_0 = arith.constant 0 : index
    %1 = vector.load %arg11[%c0, %c0_0] : memref<18x256xf32, #tpu.memory_space<vmem>>, vector<18x256xf32>
    tpu.vector_store %arg11[%c0, %c0_0], %0 {strides = array<i32>} : memref<18x256xf32, #tpu.memory_space<vmem>>, vector<18x256xf32>,
    %c0_1 = arith.constant 0 : index
    %c0_2 = arith.constant 0 : index
    %c0_3 = arith.constant 0 : index
    %2 = vector.load %arg1[%c0_1, %c0_2, %c0_3] : memref<1x16x256xf32, #tpu.memory_space<vmem>>, vector<1x16x256xf32>
    %3 = vector.shape_cast %2 : vector<1x16x256xf32> to vector<16x256xf32>
    %c1 = arith.constant 1 : index
    %c0_4 = arith.constant 0 : index
    %4 = vector.load %arg11[%c1, %c0_4] : memref<18x256xf32, #tpu.memory_space<vmem>>, vector<16x256xf32>
    tpu.vector_store %arg11[%c1, %c0_4], %3 {strides = array<i32>} : memref<18x256xf32, #tpu.memory_space<vmem>>, vector<16x256xf32>,
    %cst_5 = arith.constant 0.000000e+00 : f32
    %5 = vector.broadcast %cst_5 : f32 to vector<16x256xf32>
    %c0_6 = arith.constant 0 : index
    %c0_7 = arith.constant 0 : index
    %6 = vector.load %arg11[%c0_6, %c0_7] : memref<18x256xf32, #tpu.memory_space<vmem>>, vector<16x256xf32>
    %7 = arith.truncf %6 : vector<16x256xf32> to vector<16x256xbf16>
    %c0_8 = arith.constant 0 : index
    %c0_9 = arith.constant 0 : index
    %c0_10 = arith.constant 0 : index
    %8 = vector.load %arg2[%c0_8, %c0_9, %c0_10] : memref<3x256x256xbf16, #tpu.memory_space<vmem>>, vector<1x256x256xbf16>
    %9 = vector.shape_cast %8 : vector<1x256x256xbf16> to vector<256x256xbf16>
    %cst_11 = arith.constant dense<0.000000e+00> : vector<16x256xf32>
    %10 = tpu.matmul %7, %9, %cst_11 {dimension_numbers = #tpu.dot_dimension_numbers<[1], [0], [0], [1], [0, 0, 1, 1], [], []>} : vector<16x256xbf16>, vector<256x256xbf16>, vector<16x256xf32> -> vector<16x256xf32>
    %11 = arith.addf %5, %10 : vector<16x256xf32>
    %c1_12 = arith.constant 1 : index
    %c0_13 = arith.constant 0 : index
    %12 = vector.load %arg11[%c1_12, %c0_13] : memref<18x256xf32, #tpu.memory_space<vmem>>, vector<16x256xf32>
    %13 = arith.truncf %12 : vector<16x256xf32> to vector<16x256xbf16>
    %c1_14 = arith.constant 1 : index
    %c0_15 = arith.constant 0 : index
    %c0_16 = arith.constant 0 : index
    %14 = vector.load %arg2[%c1_14, %c0_15, %c0_16] : memref<3x256x256xbf16, #tpu.memory_space<vmem>>, vector<1x256x256xbf16>
    %15 = vector.shape_cast %14 : vector<1x256x256xbf16> to vector<256x256xbf16>
    %cst_17 = arith.constant dense<0.000000e+00> : vector<16x256xf32>
    %16 = tpu.matmul %13, %15, %cst_17 {dimension_numbers = #tpu.dot_dimension_numbers<[1], [0], [0], [1], [0, 0, 1, 1], [], []>} : vector<16x256xbf16>, vector<256x256xbf16>, vector<16x256xf32> -> vector<16x256xf32>
    %17 = arith.addf %11, %16 : vector<16x256xf32>
    %c2 = arith.constant 2 : index
    %c0_18 = arith.constant 0 : index
    %18 = vector.load %arg11[%c2, %c0_18] : memref<18x256xf32, #tpu.memory_space<vmem>>, vector<16x256xf32>
    %19 = arith.truncf %18 : vector<16x256xf32> to vector<16x256xbf16>
    %c2_19 = arith.constant 2 : index
    %c0_20 = arith.constant 0 : index
    %c0_21 = arith.constant 0 : index
    %20 = vector.load %arg2[%c2_19, %c0_20, %c0_21] : memref<3x256x256xbf16, #tpu.memory_space<vmem>>, vector<1x256x256xbf16>
    %21 = vector.shape_cast %20 : vector<1x256x256xbf16> to vector<256x256xbf16>
    %cst_22 = arith.constant dense<0.000000e+00> : vector<16x256xf32>
    %22 = tpu.matmul %19, %21, %cst_22 {dimension_numbers = #tpu.dot_dimension_numbers<[1], [0], [0], [1], [0, 0, 1, 1], [], []>} : vector<16x256xbf16>, vector<256x256xbf16>, vector<16x256xf32> -> vector<16x256xf32>
    %23 = arith.addf %17, %22 : vector<16x256xf32>
    %cst_23 = arith.constant dense<0.000000e+00> : vector<256xf32>
    %24 = vector.multi_reduction <add>, %23, %cst_23 [0] : vector<16x256xf32> to vector<256xf32>
    %25 = vector.shape_cast %24 : vector<256xf32> to vector<1x256xf32>
    %c0_24 = arith.constant 0 : index
    %c0_25 = arith.constant 0 : index
    %26 = vector.load %arg6[%c0_24, %c0_25] : memref<256x16xf32, #tpu.memory_space<vmem>>, vector<256x16xf32>
    %cst_26 = arith.constant dense<0.000000e+00> : vector<1x16xf32>
    %27 = tpu.matmul %25, %26, %cst_26 {dimension_numbers = #tpu.dot_dimension_numbers<[1], [0], [0], [1], [0, 0, 1, 1], [], []>} : vector<1x256xf32>, vector<256x16xf32>, vector<1x16xf32> -> vector<1x16xf32>
    %c0_27 = arith.constant 0 : index
    %c0_28 = arith.constant 0 : index
    %28 = vector.load %arg7[%c0_27, %c0_28] : memref<16x256xf32, #tpu.memory_space<vmem>>, vector<16x256xf32>
    %cst_29 = arith.constant dense<0.000000e+00> : vector<1x256xf32>
    %29 = tpu.matmul %27, %28, %cst_29 {dimension_numbers = #tpu.dot_dimension_numbers<[1], [0], [0], [1], [0, 0, 1, 1], [], []>} : vector<1x16xf32>, vector<16x256xf32>, vector<1x256xf32> -> vector<1x256xf32>
    %cst_30 = arith.constant 3.906250e-03 : f32
    %30 = vector.broadcast %cst_30 : f32 to vector<1x256xf32>
    %31 = arith.mulf %29, %30 : vector<1x256xf32>
    %32 = vector.broadcast %31 : vector<1x256xf32> to vector<16x256xf32>
    %33 = arith.subf %23, %32 : vector<16x256xf32>
    %34 = arith.mulf %33, %33 : vector<16x256xf32>
    %cst_31 = arith.constant dense<0.000000e+00> : vector<256xf32>
    %35 = vector.multi_reduction <add>, %34, %cst_31 [0] : vector<16x256xf32> to vector<256xf32>
    %36 = vector.shape_cast %35 : vector<256xf32> to vector<1x256xf32>
    %c0_32 = arith.constant 0 : index
    %c0_33 = arith.constant 0 : index
    %37 = vector.load %arg6[%c0_32, %c0_33] : memref<256x16xf32, #tpu.memory_space<vmem>>, vector<256x16xf32>
    %cst_34 = arith.constant dense<0.000000e+00> : vector<1x16xf32>
    %38 = tpu.matmul %36, %37, %cst_34 {dimension_numbers = #tpu.dot_dimension_numbers<[1], [0], [0], [1], [0, 0, 1, 1], [], []>} : vector<1x256xf32>, vector<256x16xf32>, vector<1x16xf32> -> vector<1x16xf32>
    %c0_35 = arith.constant 0 : index
    %c0_36 = arith.constant 0 : index
    %39 = vector.load %arg7[%c0_35, %c0_36] : memref<16x256xf32, #tpu.memory_space<vmem>>, vector<16x256xf32>
    %cst_37 = arith.constant dense<0.000000e+00> : vector<1x256xf32>
    %40 = tpu.matmul %38, %39, %cst_37 {dimension_numbers = #tpu.dot_dimension_numbers<[1], [0], [0], [1], [0, 0, 1, 1], [], []>} : vector<1x16xf32>, vector<16x256xf32>, vector<1x256xf32> -> vector<1x256xf32>
    %cst_38 = arith.constant 3.906250e-03 : f32
    %41 = vector.broadcast %cst_38 : f32 to vector<1x256xf32>
    %42 = arith.mulf %40, %41 : vector<1x256xf32>
    %cst_39 = arith.constant 9.99999974E-6 : f32
    %43 = vector.broadcast %cst_39 : f32 to vector<1x256xf32>
    %44 = arith.addf %42, %43 : vector<1x256xf32>
    %45 = math.rsqrt %44 : vector<1x256xf32>
    %46 = vector.broadcast %45 : vector<1x256xf32> to vector<16x256xf32>
    %47 = arith.mulf %33, %46 : vector<16x256xf32>
    %cst_40 = arith.constant 0.000000e+00 : f32
    %48 = vector.broadcast %cst_40 : f32 to vector<16x256xf32>
    %49 = arith.cmpf oge, %47, %48 : vector<16x256xf32>
    %c0_41 = arith.constant 0 : index
    %c0_42 = arith.constant 0 : index
    %50 = vector.load %arg3[%c0_41, %c0_42] : memref<1x1xf32, #tpu.memory_space<vmem>>, vector<1x1xf32>
    %51 = vector.broadcast %50 : vector<1x1xf32> to vector<16x256xf32>
    %52 = arith.mulf %51, %47 : vector<16x256xf32>
    %53 = arith.select %49, %47, %52 : vector<16x256xi1>, vector<16x256xf32>
    %cst_43 = arith.constant 0.000000e+00 : f32
    %54 = vector.broadcast %cst_43 : f32 to vector<18x256xf32>
    %c0_44 = arith.constant 0 : index
    %c0_45 = arith.constant 0 : index
    %55 = vector.load %arg12[%c0_44, %c0_45] : memref<18x256xf32, #tpu.memory_space<vmem>>, vector<18x256xf32>
    tpu.vector_store %arg12[%c0_44, %c0_45], %54 {strides = array<i32>} : memref<18x256xf32, #tpu.memory_space<vmem>>, vector<18x256xf32>,
    %c1_46 = arith.constant 1 : index
    %c0_47 = arith.constant 0 : index
    %56 = vector.load %arg12[%c1_46, %c0_47] : memref<18x256xf32, #tpu.memory_space<vmem>>, vector<16x256xf32>
    tpu.vector_store %arg12[%c1_46, %c0_47], %53 {strides = array<i32>} : memref<18x256xf32, #tpu.memory_space<vmem>>, vector<16x256xf32>,
    %cst_48 = arith.constant 0.000000e+00 : f32
    %57 = vector.broadcast %cst_48 : f32 to vector<16x128xf32>
    %c0_49 = arith.constant 0 : index
    %c0_50 = arith.constant 0 : index
    %58 = vector.load %arg12[%c0_49, %c0_50] : memref<18x256xf32, #tpu.memory_space<vmem>>, vector<16x256xf32>
    %59 = arith.truncf %58 : vector<16x256xf32> to vector<16x256xbf16>
    %c0_51 = arith.constant 0 : index
    %c0_52 = arith.constant 0 : index
    %c0_53 = arith.constant 0 : index
    %60 = vector.load %arg4[%c0_51, %c0_52, %c0_53] : memref<3x256x128xbf16, #tpu.memory_space<vmem>>, vector<1x256x128xbf16>
    %61 = vector.shape_cast %60 : vector<1x256x128xbf16> to vector<256x128xbf16>
    %cst_54 = arith.constant dense<0.000000e+00> : vector<16x128xf32>
    %62 = tpu.matmul %59, %61, %cst_54 {dimension_numbers = #tpu.dot_dimension_numbers<[1], [0], [0], [1], [0, 0, 1, 1], [], []>} : vector<16x256xbf16>, vector<256x128xbf16>, vector<16x128xf32> -> vector<16x128xf32>
    %63 = arith.addf %57, %62 : vector<16x128xf32>
    %c1_55 = arith.constant 1 : index
    %c0_56 = arith.constant 0 : index
    %64 = vector.load %arg12[%c1_55, %c0_56] : memref<18x256xf32, #tpu.memory_space<vmem>>, vector<16x256xf32>
    %65 = arith.truncf %64 : vector<16x256xf32> to vector<16x256xbf16>
    %c1_57 = arith.constant 1 : index
    %c0_58 = arith.constant 0 : index
    %c0_59 = arith.constant 0 : index
    %66 = vector.load %arg4[%c1_57, %c0_58, %c0_59] : memref<3x256x128xbf16, #tpu.memory_space<vmem>>, vector<1x256x128xbf16>
    %67 = vector.shape_cast %66 : vector<1x256x128xbf16> to vector<256x128xbf16>
    %cst_60 = arith.constant dense<0.000000e+00> : vector<16x128xf32>
    %68 = tpu.matmul %65, %67, %cst_60 {dimension_numbers = #tpu.dot_dimension_numbers<[1], [0], [0], [1], [0, 0, 1, 1], [], []>} : vector<16x256xbf16>, vector<256x128xbf16>, vector<16x128xf32> -> vector<16x128xf32>
    %69 = arith.addf %63, %68 : vector<16x128xf32>
    %c2_61 = arith.constant 2 : index
    %c0_62 = arith.constant 0 : index
    %70 = vector.load %arg12[%c2_61, %c0_62] : memref<18x256xf32, #tpu.memory_space<vmem>>, vector<16x256xf32>
    %71 = arith.truncf %70 : vector<16x256xf32> to vector<16x256xbf16>
    %c2_63 = arith.constant 2 : index
    %c0_64 = arith.constant 0 : index
    %c0_65 = arith.constant 0 : index
    %72 = vector.load %arg4[%c2_63, %c0_64, %c0_65] : memref<3x256x128xbf16, #tpu.memory_space<vmem>>, vector<1x256x128xbf16>
    %73 = vector.shape_cast %72 : vector<1x256x128xbf16> to vector<256x128xbf16>
    %cst_66 = arith.constant dense<0.000000e+00> : vector<16x128xf32>
    %74 = tpu.matmul %71, %73, %cst_66 {dimension_numbers = #tpu.dot_dimension_numbers<[1], [0], [0], [1], [0, 0, 1, 1], [], []>} : vector<16x256xbf16>, vector<256x128xbf16>, vector<16x128xf32> -> vector<16x128xf32>
    %75 = arith.addf %69, %74 : vector<16x128xf32>
    %c0_67 = arith.constant 0 : index
    %c0_68 = arith.constant 0 : index
    %76 = vector.load %arg5[%c0_67, %c0_68] : memref<1x128xf32, #tpu.memory_space<vmem>>, vector<1x128xf32>
    %77 = vector.broadcast %76 : vector<1x128xf32> to vector<16x128xf32>
    %78 = arith.addf %75, %77 : vector<16x128xf32>
    %79 = arith.truncf %78 : vector<16x128xf32> to vector<16x128xbf16>
    %c0_69 = arith.constant 0 : index
    %c0_70 = arith.constant 0 : index
    %80 = vector.load %arg8[%c0_69, %c0_70] : memref<128x256xbf16, #tpu.memory_space<vmem>>, vector<128x256xbf16>
    %cst_71 = arith.constant dense<0.000000e+00> : vector<16x256xf32>
    %81 = tpu.matmul %79, %80, %cst_71 {dimension_numbers = #tpu.dot_dimension_numbers<[1], [0], [0], [1], [0, 0, 1, 1], [], []>} : vector<16x128xbf16>, vector<128x256xbf16>, vector<16x256xf32> -> vector<16x256xf32>
    %c0_72 = arith.constant 0 : index
    %c0_73 = arith.constant 0 : index
    %82 = vector.load %arg9[%c0_72, %c0_73] : memref<32x16xbf16, #tpu.memory_space<vmem>>, vector<32x16xbf16>
    %83 = arith.truncf %81 : vector<16x256xf32> to vector<16x256xbf16>
    %cst_74 = arith.constant dense<0.000000e+00> : vector<32x256xf32>
    %84 = tpu.matmul %82, %83, %cst_74 {dimension_numbers = #tpu.dot_dimension_numbers<[1], [0], [0], [1], [0, 0, 1, 1], [], []>} : vector<32x16xbf16>, vector<16x256xbf16>, vector<32x256xf32> -> vector<32x256xf32>
    %c0_75 = arith.constant 0 : index
    %c0_76 = arith.constant 0 : index
    %c0_77 = arith.constant 0 : index
    %85 = vector.load %arg10[%c0_75, %c0_76, %c0_77] : memref<1x32x256xf32, #tpu.memory_space<vmem>>, vector<1x32x256xf32>
    %86 = vector.shape_cast %85 : vector<1x32x256xf32> to vector<32x256xf32>
    %87 = vector.shape_cast %84 : vector<32x256xf32> to vector<1x32x256xf32>
    tpu.vector_store %arg10[%c0_75, %c0_76, %c0_77], %87 {strides = array<i32>} : memref<1x32x256xf32, #tpu.memory_space<vmem>>, vector<1x32x256xf32>,
    return
  }
  func.func @transform_0(%arg0: i32) -> (i32, i32, i32) {
    %c0_i32 = arith.constant 0 : i32
    %c0_i32_0 = arith.constant 0 : i32
    %c0_i32_1 = arith.constant 0 : i32
    return %arg0, %c0_i32, %c0_i32_0 : i32, i32, i32
  }
  func.func @transform_1(%arg0: i32) -> (i32, i32, i32) {
    %c0_i32 = arith.constant 0 : i32
    %c0_i32_0 = arith.constant 0 : i32
    %c0_i32_1 = arith.constant 0 : i32
    %c0_i32_2 = arith.constant 0 : i32
    return %c0_i32, %c0_i32_0, %c0_i32_1 : i32, i32, i32
  }
  func.func @transform_2(%arg0: i32) -> (i32, i32) {
    %c0_i32 = arith.constant 0 : i32
    %c0_i32_0 = arith.constant 0 : i32
    %c0_i32_1 = arith.constant 0 : i32
    return %c0_i32, %c0_i32_0 : i32, i32
  }
  func.func @transform_3(%arg0: i32) -> (i32, i32, i32) {
    %c0_i32 = arith.constant 0 : i32
    %c0_i32_0 = arith.constant 0 : i32
    %c0_i32_1 = arith.constant 0 : i32
    %c0_i32_2 = arith.constant 0 : i32
    return %c0_i32, %c0_i32_0, %c0_i32_1 : i32, i32, i32
  }
  func.func @transform_4(%arg0: i32) -> (i32, i32) {
    %c0_i32 = arith.constant 0 : i32
    %c0_i32_0 = arith.constant 0 : i32
    %c0_i32_1 = arith.constant 0 : i32
    return %c0_i32, %c0_i32_0 : i32, i32
  }
  func.func @transform_5(%arg0: i32) -> (i32, i32) {
    %c0_i32 = arith.constant 0 : i32
    %c0_i32_0 = arith.constant 0 : i32
    %c0_i32_1 = arith.constant 0 : i32
    return %c0_i32, %c0_i32_0 : i32, i32
  }
  func.func @transform_6(%arg0: i32) -> (i32, i32) {
    %c0_i32 = arith.constant 0 : i32
    %c0_i32_0 = arith.constant 0 : i32
    %c0_i32_1 = arith.constant 0 : i32
    return %c0_i32, %c0_i32_0 : i32, i32
  }
  func.func @transform_7(%arg0: i32) -> (i32, i32) {
    %c0_i32 = arith.constant 0 : i32
    %c0_i32_0 = arith.constant 0 : i32
    %c0_i32_1 = arith.constant 0 : i32
    return %c0_i32, %c0_i32_0 : i32, i32
  }
  func.func @transform_8(%arg0: i32) -> (i32, i32) {
    %c0_i32 = arith.constant 0 : i32
    %c0_i32_0 = arith.constant 0 : i32
    %c0_i32_1 = arith.constant 0 : i32
    return %c0_i32, %c0_i32_0 : i32, i32
  }
  func.func @transform_9(%arg0: i32) -> (i32, i32, i32) {
    %c0_i32 = arith.constant 0 : i32
    %c0_i32_0 = arith.constant 0 : i32
    %c0_i32_1 = arith.constant 0 : i32
    return %arg0, %c0_i32, %c0_i32_0 : i32, i32, i32
  }
}

module attributes {stable_mosaic.version = 11 : i64} {
  func.func @kernel(%arg0: i32, %arg1: memref<1x8x256xf32, #tpu.memory_space<vmem>>, %arg2: memref<3x256x256xbf16, #tpu.memory_space<vmem>>, %arg3: memref<1x1xf32, #tpu.memory_space<vmem>>, %arg4: memref<3x256x128xbf16, #tpu.memory_space<vmem>>, %arg5: memref<1x128xf32, #tpu.memory_space<vmem>>, %arg6: memref<256x32xf32, #tpu.memory_space<vmem>>, %arg7: memref<32x256xf32, #tpu.memory_space<vmem>>, %arg8: memref<128x512xbf16, #tpu.memory_space<vmem>>, %arg9: memref<32x8xbf16, #tpu.memory_space<vmem>>, %arg10: memref<1x32x512xf32, #tpu.memory_space<vmem>>, %arg11: memref<10x256xf32, #tpu.memory_space<vmem>>, %arg12: memref<10x256xf32, #tpu.memory_space<vmem>>) attributes {dimension_semantics = [#tpu.dimension_semantics<parallel>], iteration_bounds = array<i64: 2>, scalar_prefetch = 0 : i64, scratch_operands = 2 : i64, tpu.core_type = #tpu.core_type<tc>, window_params = [{transform_indices = @transform_0, window_bounds = array<i64: 1, 8, 256>}, {pipeline_mode = #tpu.pipeline_mode<synchronous>, transform_indices = @transform_1, window_bounds = array<i64: 3, 256, 256>}, {pipeline_mode = #tpu.pipeline_mode<synchronous>, transform_indices = @transform_2, window_bounds = array<i64: 1, 1>}, {pipeline_mode = #tpu.pipeline_mode<synchronous>, transform_indices = @transform_3, window_bounds = array<i64: 3, 256, 128>}, {pipeline_mode = #tpu.pipeline_mode<synchronous>, transform_indices = @transform_4, window_bounds = array<i64: 1, 128>}, {pipeline_mode = #tpu.pipeline_mode<synchronous>, transform_indices = @transform_5, window_bounds = array<i64: 256, 32>}, {pipeline_mode = #tpu.pipeline_mode<synchronous>, transform_indices = @transform_6, window_bounds = array<i64: 32, 256>}, {pipeline_mode = #tpu.pipeline_mode<synchronous>, transform_indices = @transform_7, window_bounds = array<i64: 128, 512>}, {pipeline_mode = #tpu.pipeline_mode<synchronous>, transform_indices = @transform_8, window_bounds = array<i64: 32, 8>}, {transform_indices = @transform_9, window_bounds = array<i64: 1, 32, 512>}]} {
    %cst = arith.constant 0.000000e+00 : f32
    %0 = vector.broadcast %cst : f32 to vector<10x256xf32>
    %c0 = arith.constant 0 : index
    %c0_0 = arith.constant 0 : index
    %1 = vector.load %arg11[%c0, %c0_0] : memref<10x256xf32, #tpu.memory_space<vmem>>, vector<10x256xf32>
    tpu.vector_store %arg11[%c0, %c0_0], %0 {strides = array<i32>} : memref<10x256xf32, #tpu.memory_space<vmem>>, vector<10x256xf32>,
    %c0_1 = arith.constant 0 : index
    %c0_2 = arith.constant 0 : index
    %c0_3 = arith.constant 0 : index
    %2 = vector.load %arg1[%c0_1, %c0_2, %c0_3] : memref<1x8x256xf32, #tpu.memory_space<vmem>>, vector<1x8x256xf32>
    %3 = vector.shape_cast %2 : vector<1x8x256xf32> to vector<8x256xf32>
    %c1 = arith.constant 1 : index
    %c0_4 = arith.constant 0 : index
    %4 = vector.load %arg11[%c1, %c0_4] : memref<10x256xf32, #tpu.memory_space<vmem>>, vector<8x256xf32>
    tpu.vector_store %arg11[%c1, %c0_4], %3 {strides = array<i32>} : memref<10x256xf32, #tpu.memory_space<vmem>>, vector<8x256xf32>,
    %cst_5 = arith.constant 0.000000e+00 : f32
    %5 = vector.broadcast %cst_5 : f32 to vector<8x256xf32>
    %c0_6 = arith.constant 0 : index
    %c0_7 = arith.constant 0 : index
    %6 = vector.load %arg11[%c0_6, %c0_7] : memref<10x256xf32, #tpu.memory_space<vmem>>, vector<8x256xf32>
    %7 = arith.truncf %6 : vector<8x256xf32> to vector<8x256xbf16>
    %c0_8 = arith.constant 0 : index
    %c0_9 = arith.constant 0 : index
    %c0_10 = arith.constant 0 : index
    %8 = vector.load %arg2[%c0_8, %c0_9, %c0_10] : memref<3x256x256xbf16, #tpu.memory_space<vmem>>, vector<1x256x256xbf16>
    %9 = vector.shape_cast %8 : vector<1x256x256xbf16> to vector<256x256xbf16>
    %cst_11 = arith.constant dense<0.000000e+00> : vector<8x256xf32>
    %10 = tpu.matmul %7, %9, %cst_11 {dimension_numbers = #tpu.dot_dimension_numbers<[1], [0], [0], [1], [0, 0, 1, 1], [], []>} : vector<8x256xbf16>, vector<256x256xbf16>, vector<8x256xf32> -> vector<8x256xf32>
    %11 = arith.addf %5, %10 : vector<8x256xf32>
    %c1_12 = arith.constant 1 : index
    %c0_13 = arith.constant 0 : index
    %12 = vector.load %arg11[%c1_12, %c0_13] : memref<10x256xf32, #tpu.memory_space<vmem>>, vector<8x256xf32>
    %13 = arith.truncf %12 : vector<8x256xf32> to vector<8x256xbf16>
    %c1_14 = arith.constant 1 : index
    %c0_15 = arith.constant 0 : index
    %c0_16 = arith.constant 0 : index
    %14 = vector.load %arg2[%c1_14, %c0_15, %c0_16] : memref<3x256x256xbf16, #tpu.memory_space<vmem>>, vector<1x256x256xbf16>
    %15 = vector.shape_cast %14 : vector<1x256x256xbf16> to vector<256x256xbf16>
    %cst_17 = arith.constant dense<0.000000e+00> : vector<8x256xf32>
    %16 = tpu.matmul %13, %15, %cst_17 {dimension_numbers = #tpu.dot_dimension_numbers<[1], [0], [0], [1], [0, 0, 1, 1], [], []>} : vector<8x256xbf16>, vector<256x256xbf16>, vector<8x256xf32> -> vector<8x256xf32>
    %17 = arith.addf %11, %16 : vector<8x256xf32>
    %c2 = arith.constant 2 : index
    %c0_18 = arith.constant 0 : index
    %18 = vector.load %arg11[%c2, %c0_18] : memref<10x256xf32, #tpu.memory_space<vmem>>, vector<8x256xf32>
    %19 = arith.truncf %18 : vector<8x256xf32> to vector<8x256xbf16>
    %c2_19 = arith.constant 2 : index
    %c0_20 = arith.constant 0 : index
    %c0_21 = arith.constant 0 : index
    %20 = vector.load %arg2[%c2_19, %c0_20, %c0_21] : memref<3x256x256xbf16, #tpu.memory_space<vmem>>, vector<1x256x256xbf16>
    %21 = vector.shape_cast %20 : vector<1x256x256xbf16> to vector<256x256xbf16>
    %cst_22 = arith.constant dense<0.000000e+00> : vector<8x256xf32>
    %22 = tpu.matmul %19, %21, %cst_22 {dimension_numbers = #tpu.dot_dimension_numbers<[1], [0], [0], [1], [0, 0, 1, 1], [], []>} : vector<8x256xbf16>, vector<256x256xbf16>, vector<8x256xf32> -> vector<8x256xf32>
    %23 = arith.addf %17, %22 : vector<8x256xf32>
    %cst_23 = arith.constant dense<0.000000e+00> : vector<256xf32>
    %24 = vector.multi_reduction <add>, %23, %cst_23 [0] : vector<8x256xf32> to vector<256xf32>
    %25 = vector.shape_cast %24 : vector<256xf32> to vector<1x256xf32>
    %c0_24 = arith.constant 0 : index
    %c0_25 = arith.constant 0 : index
    %26 = vector.load %arg6[%c0_24, %c0_25] : memref<256x32xf32, #tpu.memory_space<vmem>>, vector<256x32xf32>
    %cst_26 = arith.constant dense<0.000000e+00> : vector<1x32xf32>
    %27 = tpu.matmul %25, %26, %cst_26 {dimension_numbers = #tpu.dot_dimension_numbers<[1], [0], [0], [1], [0, 0, 1, 1], [], []>} : vector<1x256xf32>, vector<256x32xf32>, vector<1x32xf32> -> vector<1x32xf32>
    %c0_27 = arith.constant 0 : index
    %c0_28 = arith.constant 0 : index
    %28 = vector.load %arg7[%c0_27, %c0_28] : memref<32x256xf32, #tpu.memory_space<vmem>>, vector<32x256xf32>
    %cst_29 = arith.constant dense<0.000000e+00> : vector<1x256xf32>
    %29 = tpu.matmul %27, %28, %cst_29 {dimension_numbers = #tpu.dot_dimension_numbers<[1], [0], [0], [1], [0, 0, 1, 1], [], []>} : vector<1x32xf32>, vector<32x256xf32>, vector<1x256xf32> -> vector<1x256xf32>
    %cst_30 = arith.constant 1.562500e-02 : f32
    %30 = vector.broadcast %cst_30 : f32 to vector<1x256xf32>
    %31 = arith.mulf %29, %30 : vector<1x256xf32>
    %32 = vector.broadcast %31 : vector<1x256xf32> to vector<8x256xf32>
    %33 = arith.subf %23, %32 : vector<8x256xf32>
    %34 = arith.mulf %33, %33 : vector<8x256xf32>
    %cst_31 = arith.constant dense<0.000000e+00> : vector<256xf32>
    %35 = vector.multi_reduction <add>, %34, %cst_31 [0] : vector<8x256xf32> to vector<256xf32>
    %36 = vector.shape_cast %35 : vector<256xf32> to vector<1x256xf32>
    %c0_32 = arith.constant 0 : index
    %c0_33 = arith.constant 0 : index
    %37 = vector.load %arg6[%c0_32, %c0_33] : memref<256x32xf32, #tpu.memory_space<vmem>>, vector<256x32xf32>
    %cst_34 = arith.constant dense<0.000000e+00> : vector<1x32xf32>
    %38 = tpu.matmul %36, %37, %cst_34 {dimension_numbers = #tpu.dot_dimension_numbers<[1], [0], [0], [1], [0, 0, 1, 1], [], []>} : vector<1x256xf32>, vector<256x32xf32>, vector<1x32xf32> -> vector<1x32xf32>
    %c0_35 = arith.constant 0 : index
    %c0_36 = arith.constant 0 : index
    %39 = vector.load %arg7[%c0_35, %c0_36] : memref<32x256xf32, #tpu.memory_space<vmem>>, vector<32x256xf32>
    %cst_37 = arith.constant dense<0.000000e+00> : vector<1x256xf32>
    %40 = tpu.matmul %38, %39, %cst_37 {dimension_numbers = #tpu.dot_dimension_numbers<[1], [0], [0], [1], [0, 0, 1, 1], [], []>} : vector<1x32xf32>, vector<32x256xf32>, vector<1x256xf32> -> vector<1x256xf32>
    %cst_38 = arith.constant 1.562500e-02 : f32
    %41 = vector.broadcast %cst_38 : f32 to vector<1x256xf32>
    %42 = arith.mulf %40, %41 : vector<1x256xf32>
    %cst_39 = arith.constant 9.99999974E-6 : f32
    %43 = vector.broadcast %cst_39 : f32 to vector<1x256xf32>
    %44 = arith.addf %42, %43 : vector<1x256xf32>
    %45 = math.rsqrt %44 : vector<1x256xf32>
    %46 = vector.broadcast %45 : vector<1x256xf32> to vector<8x256xf32>
    %47 = arith.mulf %33, %46 : vector<8x256xf32>
    %cst_40 = arith.constant 0.000000e+00 : f32
    %48 = vector.broadcast %cst_40 : f32 to vector<8x256xf32>
    %49 = arith.cmpf oge, %47, %48 : vector<8x256xf32>
    %c0_41 = arith.constant 0 : index
    %c0_42 = arith.constant 0 : index
    %50 = vector.load %arg3[%c0_41, %c0_42] : memref<1x1xf32, #tpu.memory_space<vmem>>, vector<1x1xf32>
    %51 = vector.broadcast %50 : vector<1x1xf32> to vector<8x256xf32>
    %52 = arith.mulf %51, %47 : vector<8x256xf32>
    %53 = arith.select %49, %47, %52 : vector<8x256xi1>, vector<8x256xf32>
    %cst_43 = arith.constant 0.000000e+00 : f32
    %54 = vector.broadcast %cst_43 : f32 to vector<10x256xf32>
    %c0_44 = arith.constant 0 : index
    %c0_45 = arith.constant 0 : index
    %55 = vector.load %arg12[%c0_44, %c0_45] : memref<10x256xf32, #tpu.memory_space<vmem>>, vector<10x256xf32>
    tpu.vector_store %arg12[%c0_44, %c0_45], %54 {strides = array<i32>} : memref<10x256xf32, #tpu.memory_space<vmem>>, vector<10x256xf32>,
    %c1_46 = arith.constant 1 : index
    %c0_47 = arith.constant 0 : index
    %56 = vector.load %arg12[%c1_46, %c0_47] : memref<10x256xf32, #tpu.memory_space<vmem>>, vector<8x256xf32>
    tpu.vector_store %arg12[%c1_46, %c0_47], %53 {strides = array<i32>} : memref<10x256xf32, #tpu.memory_space<vmem>>, vector<8x256xf32>,
    %cst_48 = arith.constant 0.000000e+00 : f32
    %57 = vector.broadcast %cst_48 : f32 to vector<8x128xf32>
    %c0_49 = arith.constant 0 : index
    %c0_50 = arith.constant 0 : index
    %58 = vector.load %arg12[%c0_49, %c0_50] : memref<10x256xf32, #tpu.memory_space<vmem>>, vector<8x256xf32>
    %59 = arith.truncf %58 : vector<8x256xf32> to vector<8x256xbf16>
    %c0_51 = arith.constant 0 : index
    %c0_52 = arith.constant 0 : index
    %c0_53 = arith.constant 0 : index
    %60 = vector.load %arg4[%c0_51, %c0_52, %c0_53] : memref<3x256x128xbf16, #tpu.memory_space<vmem>>, vector<1x256x128xbf16>
    %61 = vector.shape_cast %60 : vector<1x256x128xbf16> to vector<256x128xbf16>
    %cst_54 = arith.constant dense<0.000000e+00> : vector<8x128xf32>
    %62 = tpu.matmul %59, %61, %cst_54 {dimension_numbers = #tpu.dot_dimension_numbers<[1], [0], [0], [1], [0, 0, 1, 1], [], []>} : vector<8x256xbf16>, vector<256x128xbf16>, vector<8x128xf32> -> vector<8x128xf32>
    %63 = arith.addf %57, %62 : vector<8x128xf32>
    %c1_55 = arith.constant 1 : index
    %c0_56 = arith.constant 0 : index
    %64 = vector.load %arg12[%c1_55, %c0_56] : memref<10x256xf32, #tpu.memory_space<vmem>>, vector<8x256xf32>
    %65 = arith.truncf %64 : vector<8x256xf32> to vector<8x256xbf16>
    %c1_57 = arith.constant 1 : index
    %c0_58 = arith.constant 0 : index
    %c0_59 = arith.constant 0 : index
    %66 = vector.load %arg4[%c1_57, %c0_58, %c0_59] : memref<3x256x128xbf16, #tpu.memory_space<vmem>>, vector<1x256x128xbf16>
    %67 = vector.shape_cast %66 : vector<1x256x128xbf16> to vector<256x128xbf16>
    %cst_60 = arith.constant dense<0.000000e+00> : vector<8x128xf32>
    %68 = tpu.matmul %65, %67, %cst_60 {dimension_numbers = #tpu.dot_dimension_numbers<[1], [0], [0], [1], [0, 0, 1, 1], [], []>} : vector<8x256xbf16>, vector<256x128xbf16>, vector<8x128xf32> -> vector<8x128xf32>
    %69 = arith.addf %63, %68 : vector<8x128xf32>
    %c2_61 = arith.constant 2 : index
    %c0_62 = arith.constant 0 : index
    %70 = vector.load %arg12[%c2_61, %c0_62] : memref<10x256xf32, #tpu.memory_space<vmem>>, vector<8x256xf32>
    %71 = arith.truncf %70 : vector<8x256xf32> to vector<8x256xbf16>
    %c2_63 = arith.constant 2 : index
    %c0_64 = arith.constant 0 : index
    %c0_65 = arith.constant 0 : index
    %72 = vector.load %arg4[%c2_63, %c0_64, %c0_65] : memref<3x256x128xbf16, #tpu.memory_space<vmem>>, vector<1x256x128xbf16>
    %73 = vector.shape_cast %72 : vector<1x256x128xbf16> to vector<256x128xbf16>
    %cst_66 = arith.constant dense<0.000000e+00> : vector<8x128xf32>
    %74 = tpu.matmul %71, %73, %cst_66 {dimension_numbers = #tpu.dot_dimension_numbers<[1], [0], [0], [1], [0, 0, 1, 1], [], []>} : vector<8x256xbf16>, vector<256x128xbf16>, vector<8x128xf32> -> vector<8x128xf32>
    %75 = arith.addf %69, %74 : vector<8x128xf32>
    %c0_67 = arith.constant 0 : index
    %c0_68 = arith.constant 0 : index
    %76 = vector.load %arg5[%c0_67, %c0_68] : memref<1x128xf32, #tpu.memory_space<vmem>>, vector<1x128xf32>
    %77 = vector.broadcast %76 : vector<1x128xf32> to vector<8x128xf32>
    %78 = arith.addf %75, %77 : vector<8x128xf32>
    %79 = arith.truncf %78 : vector<8x128xf32> to vector<8x128xbf16>
    %c0_69 = arith.constant 0 : index
    %c0_70 = arith.constant 0 : index
    %80 = vector.load %arg8[%c0_69, %c0_70] : memref<128x512xbf16, #tpu.memory_space<vmem>>, vector<128x512xbf16>
    %cst_71 = arith.constant dense<0.000000e+00> : vector<8x512xf32>
    %81 = tpu.matmul %79, %80, %cst_71 {dimension_numbers = #tpu.dot_dimension_numbers<[1], [0], [0], [1], [0, 0, 1, 1], [], []>} : vector<8x128xbf16>, vector<128x512xbf16>, vector<8x512xf32> -> vector<8x512xf32>
    %c0_72 = arith.constant 0 : index
    %c0_73 = arith.constant 0 : index
    %82 = vector.load %arg9[%c0_72, %c0_73] : memref<32x8xbf16, #tpu.memory_space<vmem>>, vector<32x8xbf16>
    %83 = arith.truncf %81 : vector<8x512xf32> to vector<8x512xbf16>
    %cst_74 = arith.constant dense<0.000000e+00> : vector<32x512xf32>
    %84 = tpu.matmul %82, %83, %cst_74 {dimension_numbers = #tpu.dot_dimension_numbers<[1], [0], [0], [1], [0, 0, 1, 1], [], []>} : vector<32x8xbf16>, vector<8x512xbf16>, vector<32x512xf32> -> vector<32x512xf32>
    %c0_75 = arith.constant 0 : index
    %c0_76 = arith.constant 0 : index
    %c0_77 = arith.constant 0 : index
    %85 = vector.load %arg10[%c0_75, %c0_76, %c0_77] : memref<1x32x512xf32, #tpu.memory_space<vmem>>, vector<1x32x512xf32>
    %86 = vector.shape_cast %85 : vector<1x32x512xf32> to vector<32x512xf32>
    %87 = vector.shape_cast %84 : vector<32x512xf32> to vector<1x32x512xf32>
    tpu.vector_store %arg10[%c0_75, %c0_76, %c0_77], %87 {strides = array<i32>} : memref<1x32x512xf32, #tpu.memory_space<vmem>>, vector<1x32x512xf32>,
    return
  }
  func.func @transform_0(%arg0: i32) -> (i32, i32, i32) {
    %c0_i32 = arith.constant 0 : i32
    %c0_i32_0 = arith.constant 0 : i32
    %c0_i32_1 = arith.constant 0 : i32
    return %arg0, %c0_i32, %c0_i32_0 : i32, i32, i32
  }
  func.func @transform_1(%arg0: i32) -> (i32, i32, i32) {
    %c0_i32 = arith.constant 0 : i32
    %c0_i32_0 = arith.constant 0 : i32
    %c0_i32_1 = arith.constant 0 : i32
    %c0_i32_2 = arith.constant 0 : i32
    return %c0_i32, %c0_i32_0, %c0_i32_1 : i32, i32, i32
  }
  func.func @transform_2(%arg0: i32) -> (i32, i32) {
    %c0_i32 = arith.constant 0 : i32
    %c0_i32_0 = arith.constant 0 : i32
    %c0_i32_1 = arith.constant 0 : i32
    return %c0_i32, %c0_i32_0 : i32, i32
  }
  func.func @transform_3(%arg0: i32) -> (i32, i32, i32) {
    %c0_i32 = arith.constant 0 : i32
    %c0_i32_0 = arith.constant 0 : i32
    %c0_i32_1 = arith.constant 0 : i32
    %c0_i32_2 = arith.constant 0 : i32
    return %c0_i32, %c0_i32_0, %c0_i32_1 : i32, i32, i32
  }
  func.func @transform_4(%arg0: i32) -> (i32, i32) {
    %c0_i32 = arith.constant 0 : i32
    %c0_i32_0 = arith.constant 0 : i32
    %c0_i32_1 = arith.constant 0 : i32
    return %c0_i32, %c0_i32_0 : i32, i32
  }
  func.func @transform_5(%arg0: i32) -> (i32, i32) {
    %c0_i32 = arith.constant 0 : i32
    %c0_i32_0 = arith.constant 0 : i32
    %c0_i32_1 = arith.constant 0 : i32
    return %c0_i32, %c0_i32_0 : i32, i32
  }
  func.func @transform_6(%arg0: i32) -> (i32, i32) {
    %c0_i32 = arith.constant 0 : i32
    %c0_i32_0 = arith.constant 0 : i32
    %c0_i32_1 = arith.constant 0 : i32
    return %c0_i32, %c0_i32_0 : i32, i32
  }
  func.func @transform_7(%arg0: i32) -> (i32, i32) {
    %c0_i32 = arith.constant 0 : i32
    %c0_i32_0 = arith.constant 0 : i32
    %c0_i32_1 = arith.constant 0 : i32
    return %c0_i32, %c0_i32_0 : i32, i32
  }
  func.func @transform_8(%arg0: i32) -> (i32, i32) {
    %c0_i32 = arith.constant 0 : i32
    %c0_i32_0 = arith.constant 0 : i32
    %c0_i32_1 = arith.constant 0 : i32
    return %c0_i32, %c0_i32_0 : i32, i32
  }
  func.func @transform_9(%arg0: i32) -> (i32, i32, i32) {
    %c0_i32 = arith.constant 0 : i32
    %c0_i32_0 = arith.constant 0 : i32
    %c0_i32_1 = arith.constant 0 : i32
    return %arg0, %c0_i32, %c0_i32_0 : i32, i32, i32
  }
}

</mosaic_0001>

<bundles_post_ra>
// kernel: fpn_forward.3
= control target key start
LH: loop header
LB: loop body
LE: loop exit
PB: predicated region body
PF: predicated region fallthrough
CT: control target
= control target key end

     0   :  { %s3181_s11 = smov 0   ;;  %s4017_s0 = inlined_call_operand.vmem [shape: f32[2,16,256], index: 0, kind: input, shape index: {}]   ;;  %s4018_s1 = inlined_call_operand.vmem [shape: bf16[3,256,256], index: 1, kind: input, shape index: {}]   ;;  %s4019_s2 = inlined_call_operand.<no memory space> [shape: f32[1,1], index: 2, kind: input, shape index: {}]   ;;  %s4020_s3 = inlined_call_operand.vmem [shape: bf16[3,256,128], index: 3, kind: input, shape index: {}]   ;;  %s4021_s4 = inlined_call_operand.vmem [shape: f32[1,128], index: 4, kind: input, shape index: {}]   ;;  %s4022_s5 = inlined_call_operand.vmem [shape: f32[256,16], index: 5, kind: input, shape index: {}]   ;;  %s4023_s6 = inlined_call_operand.vmem [shape: f32[16,256], index: 6, kind: input, shape index: {}]   ;;  %s4024_s7 = inlined_call_operand.vmem [shape: bf16[128,256], index: 7, kind: input, shape index: {}]   ;;  %s4025_s8 = inlined_call_operand.vmem [shape: bf16[32,16], index: 8, kind: input, shape index: {}]   ;;  %s4026_s9 = inlined_call_operand.vmem [shape: f32[2,32,256], index: 9, kind: output, shape index: {}]  }
   0x1   :  { %v14_v0 = vstv %s4019_s2 }
   0x2   :  { %15 = vst [vmem:[#allocation4] sm:$0x1] %v14_v0 }
   0x3 LB: > { %s2439_s12 = sadd.s32 4294967295, %s3124_s11   ;;  %p2443_p0 = scmp.ge.s32.totalorder %s3124_s11, 1  ;;  %s3124_s11 = sphi %s3181_s11, %s21_s11  }
   0x4   : > { %p289_p1 = scmp.lt.s32.totalorder %s3124_s11, 3 }
   0x6   : > { %p290_p2 = pnand %p2443_p0, %p289_p1 }
   0x7   : > { %p325_p3 = scmp.lt.s32.totalorder (!%p290_p2), %s2439_s12, 1 }
   0x8   : > { %293 = sbr.rel (%p290_p2) target bundleno = 1863 (0x747), region = 56 }
   0xd   : > { %v2895_v1 = vld [vmem:[%s4018_s1 + $0x174] ss:$8 sps:$4 sm:$0xff]   ;;  %v3126_v3 = vmov 0.0   ;;  %v2899_v4 = vld [vmem:[%s4018_s1 + $0x170] ss:$8 sps:$4 sm:$0xff]   ;;  %s4028_s12 = smov (!%p325_p3, %s2439_s12), 1 }
   0xe   : > { %v2897_v2 = vld [vmem:[%s4018_s1 + $0x74] ss:$8 sps:$4 sm:$0xff]   ;;  %337 = vst [vmem:[#allocation2 + $0x10] sm:$0xff] %v3126_v3  ;;  %341 = vst [vmem:[#allocation2 + $0x20] sm:$0x3] %v3126_v3  ;;  %635 = vmatprep.subr.bf16.mxu0 %v2895_v1  ;;  %s2746_s2 = sshll.u32 %s4028_s12, 5 }
   0xf   : > { %336 = vst [vmem:[#allocation2 + $0x28] sm:$0xff] %v3126_v3  ;;  %340 = vst [vmem:[#allocation2 + $0x18] sm:$0x3] %v3126_v3  ;;  %v2900_v5 = vld [vmem:[%s4018_s1 + $0x70] ss:$8 sps:$4 sm:$0xff]   ;;  %838 = vmatprep.subr.bf16.mxu1 %v2897_v2  ;;  %636 = vmatpush1.bf16.msra.mxu0 %v2899_v4  ;;  %s329_s23 = scalar_lea.vmem %s4017_s0, %s2746_s2  ;;  %vm350_vm0 = vcmask 1040384  }
  0x10   : > { %1553 = vst [vmem:[#allocation3] sm:$0xff] %v3126_v3  ;;  %1554 = vst [vmem:[#allocation3 + $0x8] sm:$0xff] %v3126_v3  ;;  %v2901_v6 = vld [vmem:[%s4018_s1 + $0x164] ss:$8 sps:$4 sm:$0xff]   ;;  %839 = vmatpush1.bf16.msra.mxu1 %v2900_v5  ;;  %v2905_v8 = vld [vmem:[%s4018_s1 + $0x160] ss:$8 sps:$4 sm:$0xff]  }
  0x11   : > { %1557 = vst [vmem:[#allocation3 + $0x28] sm:$0x3] %v3126_v3  ;;  %1558 = vst [vmem:[#allocation3 + $0x10] sm:$0x3] %v3126_v3  ;;  %v2903_v7 = vld [vmem:[%s4018_s1 + $0x64] ss:$8 sps:$4 sm:$0xff]   ;;  %637 = vmatprep.subr.bf16.mxu0 %v2901_v6 }
  0x12   : > { %v2906_v9 = vld [vmem:[%s4018_s1 + $0x60] ss:$8 sps:$4 sm:$0xff]   ;;  %840 = vmatprep.subr.bf16.mxu1 %v2903_v7  ;;  %v2907_v10 = vld [vmem:[%s4018_s1 + $0x154] ss:$8 sps:$4 sm:$0xff]   ;;  %v2911_v12 = vld [vmem:[%s4018_s1 + $0x150] ss:$8 sps:$4 sm:$0xff]  }
  0x13   : > { %v2909_v11 = vld [vmem:[%s4018_s1 + $0x54] ss:$8 sps:$4 sm:$0xff]   ;;  %v2912_v13 = vld [vmem:[%s4018_s1 + $0x50] ss:$8 sps:$4 sm:$0xff]   ;;  %638 = vmatpush1.bf16.msra.mxu0 %v2905_v8  ;;  %v2913_v14 = vld [vmem:[%s4018_s1 + $0x144] ss:$8 sps:$4 sm:$0xff]  }
  0x14   : > { %841 = vmatpush1.bf16.msra.mxu1 %v2906_v9  ;;  %639 = vmatprep.subr.bf16.mxu0 %v2907_v10  ;;  %v2915_v15 = vld [vmem:[%s4018_s1 + $0x44] ss:$8 sps:$4 sm:$0xff]   ;;  %v2917_v16 = vld [vmem:[%s4018_s1 + $0x140] ss:$8 sps:$4 sm:$0xff]   ;;  %v2919_v18 = vld [vmem:[%s4018_s1 + $0x134] ss:$8 sps:$4 sm:$0xff]  }
  0x15   : > { %842 = vmatprep.subr.bf16.mxu1 %v2909_v11  ;;  %v2918_v17 = vld [vmem:[%s4018_s1 + $0x40] ss:$8 sps:$4 sm:$0xff]   ;;  %v2921_v19 = vld [vmem:[%s4018_s1 + $0x34] ss:$8 sps:$4 sm:$0xff]   ;;  %v2923_v20 = vld [vmem:[%s4018_s1 + $0x130] ss:$8 sps:$4 sm:$0xff]  }
  0x16   : > { %v2924_v21 = vld [vmem:[%s4018_s1 + $0x30] ss:$8 sps:$4 sm:$0xff]   ;;  %v2925_v22 = vld [vmem:[%s4018_s1 + $0x124] ss:$8 sps:$4 sm:$0xff]   ;;  %v2929_v24 = vld [vmem:[%s4018_s1 + $0x120] ss:$8 sps:$4 sm:$0xff]  }
  0x17   : > { %640 = vmatpush1.bf16.msra.mxu0 %v2911_v12  ;;  %v2927_v23 = vld [vmem:[%s4018_s1 + $0x24] ss:$8 sps:$4 sm:$0xff]   ;;  %v2930_v25 = vld [vmem:[%s4018_s1 + $0x20] ss:$8 sps:$4 sm:$0xff]   ;;  %v2931_v26 = vld [vmem:[%s4018_s1 + $0x114] ss:$8 sps:$4 sm:$0xff]  }
  0x18   : > { %843 = vmatpush1.bf16.msra.mxu1 %v2912_v13  ;;  %641 = vmatprep.subr.bf16.mxu0 %v2913_v14  ;;  %v2933_v27 = vld [vmem:[%s4018_s1 + $0x14] ss:$8 sps:$4 sm:$0xff]   ;;  %v2935_v28 = vld [vmem:[%s4018_s1 + $0x110] ss:$8 sps:$4 sm:$0xff]   ;;  %v2937_v30 = vld [vmem:[%s4018_s1 + $0x104] ss:$8 sps:$4 sm:$0xff]  }
  0x19   : > { %844 = vmatprep.subr.bf16.mxu1 %v2915_v15  ;;  %v2936_v29 = vld [vmem:[%s4018_s1 + $0x10] ss:$8 sps:$4 sm:$0xff]   ;;  %v2939_v31 = vld [vmem:[%s4018_s1 + $0x4] ss:$8 sps:$4 sm:$0xff]   ;;  %v2941_v32 = vld [vmem:[%s4018_s1 + $0x100] ss:$8 sps:$4 sm:$0xff]  }
  0x1a   : > { %v2942_v33 = vld [vmem:[%s4018_s1] ss:$8 sps:$4 sm:$0xff]   ;;  %v2943_v34 = vld [vmem:[%s4018_s1 + $0x1f4] ss:$8 sps:$4 sm:$0xff]   ;;  %v2947_v36 = vld [vmem:[%s4018_s1 + $0x1f0] ss:$8 sps:$4 sm:$0xff]  }
  0x1b   : > { %642 = vmatpush1.bf16.msra.mxu0 %v2917_v16  ;;  %v2945_v35 = vld [vmem:[%s4018_s1 + $0xf4] ss:$8 sps:$4 sm:$0xff]   ;;  %v2948_v37 = vld [vmem:[%s4018_s1 + $0xf0] ss:$8 sps:$4 sm:$0xff]   ;;  %v2949_v38 = vld [vmem:[%s4018_s1 + $0x1e4] ss:$8 sps:$4 sm:$0xff]  }
  0x1c   : > { %845 = vmatpush1.bf16.msra.mxu1 %v2918_v17  ;;  %643 = vmatprep.subr.bf16.mxu0 %v2919_v18  ;;  %v2951_v39 = vld [vmem:[%s4018_s1 + $0xe4] ss:$8 sps:$4 sm:$0xff]   ;;  %v2953_v40 = vld [vmem:[%s4018_s1 + $0x1e0] ss:$8 sps:$4 sm:$0xff]   ;;  %v2955_v42 = vld [vmem:[%s4018_s1 + $0x1d4] ss:$8 sps:$4 sm:$0xff]  }
  0x1d   : > { %846 = vmatprep.subr.bf16.mxu1 %v2921_v19  ;;  %v2954_v41 = vld [vmem:[%s4018_s1 + $0xe0] ss:$8 sps:$4 sm:$0xff]   ;;  %v2957_v43 = vld [vmem:[%s4018_s1 + $0xd4] ss:$8 sps:$4 sm:$0xff]   ;;  %v2959_v44 = vld [vmem:[%s4018_s1 + $0x1d0] ss:$8 sps:$4 sm:$0xff]  }
  0x1e   : > { %v2960_v45 = vld [vmem:[%s4018_s1 + $0xd0] ss:$8 sps:$4 sm:$0xff]   ;;  %v2961_v46 = vld [vmem:[%s4018_s1 + $0x1c4] ss:$8 sps:$4 sm:$0xff]   ;;  %v2965_v48 = vld [vmem:[%s4018_s1 + $0x1c0] ss:$8 sps:$4 sm:$0xff]  }
  0x1f   : > { %644 = vmatpush1.bf16.msra.mxu0 %v2923_v20  ;;  %v2963_v47 = vld [vmem:[%s4018_s1 + $0xc4] ss:$8 sps:$4 sm:$0xff]   ;;  %v2966_v49 = vld [vmem:[%s4018_s1 + $0xc0] ss:$8 sps:$4 sm:$0xff]   ;;  %v345_v51 = vld [vmem:[%s329_s23 + $0x18] sm:$0xff]  ;;  %vm926_vm2 = vcmask 1046528  }
  0x20   : > { %847 = vmatpush1.bf16.msra.mxu1 %v2924_v21  ;;  %645 = vmatprep.subr.bf16.mxu0 %v2925_v22  ;;  %v343_v50 = vld [vmem:[%s329_s23 + $0x8] sm:$0xff]  ;;  %v342_v53 = vld [vmem:[%s329_s23] sm:$0xff]  ;;  %v344_v54 = vld [vmem:[%s329_s23 + $0x10] sm:$0xff]  ;;  %v355_v55 = vrot.slane %v345_v51, 7  ;;  %vm448_vm1 = vsmask.f32 7424 }
  0x21   : > { %848 = vmatprep.subr.bf16.mxu1 %v2927_v23  ;;  %v352_v52 = vrot.slane %v343_v50, 7  ;;  %v351_v56 = vrot.slane %v342_v53, 7  ;;  %v353_v57 = vrot.slane %v344_v54, 7  ;;  %v2967_v58 = vld [vmem:[%s4018_s1 + $0x1b4] ss:$8 sps:$4 sm:$0xff]   ;;  %vm1262_vm3 = vcmask 130048  }
  0x22   : > { %v2969_v59 = vld [vmem:[%s4018_s1 + $0xb4] ss:$8 sps:$4 sm:$0xff]   ;;  %368 = vst [vmem:[#allocation2 + $0x20] sm:$0x1] %v355_v55  ;;  %v2971_v62 = vld [vmem:[%s4018_s1 + $0x1b0] ss:$8 sps:$4 sm:$0xff]  }
  0x23   : > { %646 = vmatpush1.bf16.msra.mxu0 %v2929_v24  ;;  %364 = vst [vmem:[#allocation2 + $0x10] sm:$0xfe] %v352_v52  ;;  %v3358_v60 = vsel %vm350_vm0, %v352_v52, %v355_v55  ;;  %v3361_v61 = vsel %vm350_vm0, %v351_v56, %v353_v57  ;;  %363 = vst [vmem:[#allocation2 + $0x28] sm:$0xfe] %v351_v56  ;;  %v2972_v63 = vld [vmem:[%s4018_s1 + $0xb0] ss:$8 sps:$4 sm:$0xff]  }
  0x24   : > { %849 = vmatpush1.bf16.msra.mxu1 %v2930_v25  ;;  %647 = vmatprep.subr.bf16.mxu0 %v2931_v26  ;;  %367 = vst [vmem:[#allocation2 + $0x18] sm:$0x1] %v353_v57  ;;  %v2973_v0 = vld [vmem:[%s4018_s1 + $0x1a4] ss:$8 sps:$4 sm:$0xff]   ;;  %v2977_v2 = vld [vmem:[%s4018_s1 + $0x1a0] ss:$8 sps:$4 sm:$0xff]  }
  0x25   : > { %850 = vmatprep.subr.bf16.mxu1 %v2933_v27  ;;  %v2975_v1 = vld [vmem:[%s4018_s1 + $0xa4] ss:$8 sps:$4 sm:$0xff]   ;;  %v2978_v4 = vld [vmem:[%s4018_s1 + $0xa0] ss:$8 sps:$4 sm:$0xff]   ;;  %v2979_v5 = vld [vmem:[%s4018_s1 + $0x194] ss:$8 sps:$4 sm:$0xff]  }
  0x26   : > { %v2981_v6 = vld [vmem:[%s4018_s1 + $0x94] ss:$8 sps:$4 sm:$0xff]   ;;  %v2983_v14 = vld [vmem:[%s4018_s1 + $0x190] ss:$8 sps:$4 sm:$0xff]   ;;  %v2985_v21 = vld [vmem:[%s4018_s1 + $0x184] ss:$8 sps:$4 sm:$0xff]  }
  0x27   : > { %648 = vmatpush1.bf16.msra.mxu0 %v2935_v28  ;;  %v2984_v18 = vld [vmem:[%s4018_s1 + $0x90] ss:$8 sps:$4 sm:$0xff]   ;;  %v2987_v26 = vld [vmem:[%s4018_s1 + $0x84] ss:$8 sps:$4 sm:$0xff]   ;;  %v3000_v53 = vld [vmem:[%s4018_s1 + $0x240] ss:$8 sps:$4 sm:$0xff]  }
  0x28   : > { %851 = vmatpush1.bf16.msra.mxu1 %v2936_v29  ;;  %649 = vmatprep.subr.bf16.mxu0 %v2937_v30  ;;  %v2989_v30 = vld [vmem:[%s4018_s1 + $0x180] ss:$8 sps:$4 sm:$0xff]   ;;  %v3002_v51 = vld [vmem:[%s4018_s1 + $0x244] ss:$8 sps:$4 sm:$0xff]   ;;  %v3005_v54 = vld [vmem:[%s4018_s1 + $0x234] ss:$8 sps:$4 sm:$0xff]  }
  0x29   : > { %852 = vmatprep.subr.bf16.mxu1 %v2939_v31  ;;  %v410_v9 = vld [vmem:[#allocation2 + $0x20] sm:$0x1]  ;;  %v3003_v55 = vld [vmem:[%s4018_s1 + $0x230] ss:$8 sps:$4 sm:$0xff]   ;;  %v3008_v56 = vld [vmem:[%s4018_s1 + $0x224] ss:$8 sps:$4 sm:$0xff]  }
  0x2a   : > { %v408_v7 = vld [vmem:[#allocation2 + $0x10] sm:$0xfe]  ;;  %v407_v12 = vld [vmem:[#allocation2 + $0x28] sm:$0xfe]  ;;  %v414_v15 = vpack.c.bf16 %v410_v9, %v410_v9  ;;  %s2747_s2 = sshll.u32 %s4028_s12, 6 }
  0x2b   : > { %650 = vmatpush1.bf16.msra.mxu0 %v2941_v32  ;;  %v370_v8 = vld [vmem:[#allocation2 + $0x10] sm:$0xff]  ;;  %v412_v10 = vpack.c.bf16 %v3358_v60, %v408_v7  ;;  %v409_v13 = vld [vmem:[#allocation2 + $0x18] sm:$0x1]  ;;  %v411_v16 = vpack.c.bf16 %v3361_v61, %v407_v12  ;;  %v2990_v31 = vld [vmem:[%s4018_s1 + $0x80] ss:$8 sps:$4 sm:$0xff]   ;;  %s334_s17 = scalar_lea.vmem %s4026_s9, %s2747_s2 }
  0x2c   : > { %853 = vmatpush1.bf16.msra.mxu1 %v2942_v33  ;;  %651 = vmatprep.subr.bf16.mxu0 %v2943_v34  ;;  %v374_v11 = vpack.c.bf16 %v3358_v60, %v370_v8  ;;  %v413_v17 = vpack.c.bf16 %v409_v13, %v409_v13  ;;  %v469_v22 = vshll.u32 %v414_v15, 16  ;;  %v3006_v57 = vld [vmem:[%s4018_s1 + $0x220] ss:$8 sps:$4 sm:$0xff]   ;;  %v3029_v8 = vld [vmem:[%s4018_s1 + $0x2b4] ss:$8 sps:$4 sm:$0xff]  }
  0x2d   : > { %854 = vmatprep.subr.bf16.mxu1 %v2945_v35  ;;  %v462_v19 = vshrl.u32 %v412_v10, 16  ;;  %v464_v20 = vshll.u32 %v412_v10, 16  ;;  %v450_v23 = vshrl.u32 %v411_v16, 16  ;;  %v452_v24 = vshll.u32 %v411_v16, 16  ;;  %v369_v35 = vld [vmem:[#allocation2 + $0x28] sm:$0xff] }
  0x2e   : > { %870 = vmatprep.mubr.bf16.mxu1 %v374_v11  ;;  %v457_v25 = vshll.u32 %v413_v17, 16  ;;  %v471_v28 = vrot.slane %v469_v22, 1  ;;  %v3024_v7 = vld [vmem:[%s4018_s1 + $0x2c0] ss:$8 sps:$4 sm:$0xff]   ;;  %v3027_v9 = vld [vmem:[%s4018_s1 + $0x2b0] ss:$8 sps:$4 sm:$0xff]  }
  0x2f   : > { %652 = vmatpush2.bf16.msra.mxu0 %v2947_v36  ;;  %v466_v27 = vrot.slane %v464_v20, 1  ;;  %v454_v29 = vrot.slane %v452_v24, 1  ;;  %v3032_v10 = vld [vmem:[%s4018_s1 + $0x2a4] ss:$8 sps:$4 sm:$0xff]   ;;  %v3030_v11 = vld [vmem:[%s4018_s1 + $0x2a0] ss:$8 sps:$4 sm:$0xff]  }
  0x30   : > { %855 = vmatpush2.bf16.msra.mxu1 %v2948_v37  ;;  %653 = vmatprep.subr.bf16.mxu0 %v2949_v38  ;;  %v459_v34 = vrot.slane %v457_v25, 1  ;;  %v2993_v37 = vld [vmem:[%s4018_s1 + $0x274] ss:$8 sps:$4 sm:$0xff]   ;;  %v373_v38 = vpack.c.bf16 %v3361_v61, %v369_v35  ;;  %v881_v13 = vld [vmem:[#allocation2 + $0x28] sm:$0xfc]  ;;  %v3599_v35 = vld [vmem:[%s4022_s5 + $0xc0] sm:$0xff] }
  0x31   : > { %856 = vmatprep.subr.bf16.mxu1 %v2951_v39  ;;  %v467_v32 = vor.u32 %v466_v27, %v462_v19  ;;  %v455_v33 = vor.u32 %v454_v29, %v450_v23  ;;  %v3035_v12 = vld [vmem:[%s4018_s1 + $0x294] ss:$8 sps:$4 sm:$0xff]   ;;  %v3033_v15 = vld [vmem:[%s4018_s1 + $0x290] ss:$8 sps:$4 sm:$0xff]   ;;  %v885_v16 = vpack.c.bf16 %v3361_v61, %v881_v13  ;;  %v3036_v19 = vld [vmem:[%s4018_s1 + $0x280] ss:$8 sps:$4 sm:$0xff]  }
  0x32   : > { %v3515_v61 = vld [vmem:[%s4022_s5 + $0xf8] sm:$0xff]  ;;  %v3525_v24 = vld [vmem:[%s4022_s5 + $0xf0] sm:$0xff]  ;;  %v3537_v25 = vld [vmem:[%s4022_s5 + $0xe8] sm:$0xff] }
  0x33   : > { %654 = vmatpush2.bf16.msra.mxu0 %v2953_v40  ;;  %v472_v36 = vsel %vm448_vm1, %v467_v32, %v471_v28  ;;  %v460_v39 = vsel %vm448_vm1, %v455_v33, %v459_v34  ;;  %v2991_v40 = vld [vmem:[%s4018_s1 + $0x270] ss:$8 sps:$4 sm:$0xff]   ;;  %v927_v20 = vrot.slane %v885_v16, 1  ;;  %v3549_v27 = vld [vmem:[%s4022_s5 + $0xe0] sm:$0xff]  ;;  %v3587_v33 = vld [vmem:[%s4022_s5 + $0xc8] sm:$0xff] }
  0x34   : > { %857 = vmatpush2.bf16.msra.mxu1 %v2954_v41  ;;  %655 = vmatprep.subr.bf16.mxu0 %v2955_v42  ;;  %v2996_v41 = vld [vmem:[%s4018_s1 + $0x264] ss:$8 sps:$4 sm:$0xff]   ;;  %v2994_v42 = vld [vmem:[%s4018_s1 + $0x260] ss:$8 sps:$4 sm:$0xff]   ;;  %v3520_v23 = vld [vmem:[%s4022_s5 + $0x78] sm:$0xff] }
  0x35   : > { %858 = vmatprep.subr.bf16.mxu1 %v2957_v43  ;;  %667 = vmatprep.mubr.bf16.mxu0 %v472_v36  ;;  %v882_v43 = vld [vmem:[#allocation2 + $0x10] sm:$0xfc]  ;;  %v3555_v28 = vld [vmem:[%s4022_s5 + $0x60] sm:$0xff]  ;;  %v3563_v29 = vld [vmem:[%s4022_s5 + $0xd8] sm:$0xff] }
  0x36   : > { %v3581_v32 = vld [vmem:[%s4022_s5 + $0x50] sm:$0xff]  ;;  %v3593_v34 = vld [vmem:[%s4022_s5 + $0x48] sm:$0xff]  ;;  %v3605_v36 = vld [vmem:[%s4022_s5 + $0x40] sm:$0xff] }
  0x37   : > { %656 = vmatpush2.bf16.msra.mxu0 %v2959_v44  ;;  %v884_v44 = vld [vmem:[#allocation2 + $0x20] sm:$0x3] }
  0x38   : > { %859 = vmatpush2.bf16.msra.mxu1 %v2960_v45  ;;  %657 = vmatprep.subr.bf16.mxu0 %v2961_v46  ;;  %v2999_v45 = vld [vmem:[%s4018_s1 + $0x254] ss:$8 sps:$4 sm:$0xff]   ;;  %v886_v46 = vpack.c.bf16 %v3358_v60, %v882_v43  ;;  %v3014_v60 = vld [vmem:[%s4018_s1 + $0x204] ss:$8 sps:$4 sm:$0xff]  }
  0x39   : > { %860 = vmatprep.subr.bf16.mxu1 %v2963_v47  ;;  %v888_v47 = vpack.c.bf16 %v884_v44, %v884_v44  ;;  %v3647_v43 = vld [vmem:[%s4022_s5 + $0xa0] sm:$0xff] }
  0x3a   : > { %v3653_v44 = vld [vmem:[%s4022_s5 + $0x20] sm:$0xff] }
  0x3b   : > { %658 = vmatpush2.bf16.msra.mxu0 %v2965_v48  ;;  %v2997_v48 = vld [vmem:[%s4018_s1 + $0x250] ss:$8 sps:$4 sm:$0xff]   ;;  %v931_v50 = vrot.slane %v888_v47, 1 }
  0x3c   : > { %861 = vmatpush2.bf16.msra.mxu1 %v2966_v49  ;;  %659 = vmatprep.subr.bf16.mxu0 %v2967_v58  ;;  %v930_v49 = vrot.slane %v886_v46, 1  ;;  %v3011_v58 = vld [vmem:[%s4018_s1 + $0x214] ss:$8 sps:$4 sm:$0xff]  }
  0x3d   : > { %862 = vmatprep.subr.bf16.mxu1 %v2969_v59  ;;  %v3009_v59 = vld [vmem:[%s4018_s1 + $0x210] ss:$8 sps:$4 sm:$0xff]  }
  0x3e   : > { %v932_v52 = vsel %vm926_vm2, %v930_v49, %v931_v50  ;;  %v3665_v46 = vld [vmem:[%s4022_s5 + $0x18] sm:$0xff]  ;;  %v3671_v47 = vld [vmem:[%s4022_s5 + $0x90] sm:$0xff]  ;;  %v3681_v49 = vld [vmem:[%s4022_s5 + $0x88] sm:$0xff] }
  0x3f   : > { %660 = vmatpush2.bf16.msra.mxu0 %v2971_v62  ;;  %v3012_v62 = vld [vmem:[%s4018_s1 + $0x200] ss:$8 sps:$4 sm:$0xff]  }
  0x40   : > { %863 = vmatpush2.bf16.msra.mxu1 %v2972_v63  ;;  %661 = vmatprep.subr.bf16.mxu0 %v2973_v0  ;;  %v3017_v63 = vld [vmem:[%s4018_s1 + $0x2f4] ss:$8 sps:$4 sm:$0xff]   ;;  %v3015_v0 = vld [vmem:[%s4018_s1 + $0x2f0] ss:$8 sps:$4 sm:$0xff]   ;;  %v3687_v50 = vld [vmem:[%s4022_s5 + $0x8] sm:$0xff] }
  0x41   : > { %864 = vmatprep.subr.bf16.mxu1 %v2975_v1  ;;  %v3020_v1 = vld [vmem:[%s4018_s1 + $0x2e4] ss:$8 sps:$4 sm:$0xff]  }
  0x43   : > { %662 = vmatpush2.bf16.msra.mxu0 %v2977_v2  ;;  %v3018_v2 = vld [vmem:[%s4018_s1 + $0x2e0] ss:$8 sps:$4 sm:$0xff]  }
  0x44   : > { %865 = vmatpush2.bf16.msra.mxu1 %v2978_v4  ;;  %663 = vmatprep.subr.bf16.mxu0 %v2979_v5  ;;  %v3023_v4 = vld [vmem:[%s4018_s1 + $0x2d4] ss:$8 sps:$4 sm:$0xff]   ;;  %v3021_v5 = vld [vmem:[%s4018_s1 + $0x2d0] ss:$8 sps:$4 sm:$0xff]  }
  0x45   : > { %866 = vmatprep.subr.bf16.mxu1 %v2981_v6  ;;  %v3026_v6 = vld [vmem:[%s4018_s1 + $0x2c4] ss:$8 sps:$4 sm:$0xff]  }
  0x47   : > { %664 = vmatpush2.bf16.msra.mxu0 %v2983_v14  ;;  %v883_v14 = vld [vmem:[#allocation2 + $0x18] sm:$0x3] }
  0x48   : > { %867 = vmatpush2.bf16.msra.mxu1 %v2984_v18  ;;  %665 = vmatprep.subr.bf16.mxu0 %v2985_v21  ;;  %v887_v17 = vpack.c.bf16 %v883_v14, %v883_v14  ;;  %v3038_v18 = vld [vmem:[%s4018_s1 + $0x284] ss:$8 sps:$4 sm:$0xff]  }
  0x49   : > { %868 = vmatprep.subr.bf16.mxu1 %v2987_v26  ;;  %v3543_v26 = vld [vmem:[%s4022_s5 + $0x68] sm:$0xff] }
  0x4a   : > { %v928_v21 = vrot.slane %v887_v17, 1 }
  0x4b   : > { %666 = vmatpush2.bf16.msra.mxu0 %v2989_v30  ;;  %v3569_v30 = vld [vmem:[%s4022_s5 + $0x58] sm:$0xff] }
  0x4c   : > { %869 = vmatpush2.bf16.msra.mxu1 %v2990_v31  ;;  %1095 = vmatprep.subr.bf16.mxu0 %v2993_v37  ;;  %v929_v22 = vsel %vm926_vm2, %v927_v20, %v928_v21  ;;  %v3575_v31 = vld [vmem:[%s4022_s5 + $0xd0] sm:$0xff]  ;;  %v3611_v37 = vld [vmem:[%s4022_s5 + $0xb8] sm:$0xff] }
  0x4d   : > { %2748 = vmatprep.subr.mxu1 %v3515_v61 }
  0x4e   : > { %668 = vmatmul.mubr.bf16.vlgmr.msra.gmra.mxu0 %v460_v39  ;;  %v3623_v39 = vld [vmem:[%s4022_s5 + $0xb0] sm:$0xff] }
  0x4f   : > { %871 = vmatmul.mubr.bf16.vlgmr.msra.gmra.mxu1 %v373_v38  ;;  %1096 = vmatpush1.bf16.msra.mxu0 %v2991_v40  ;;  %v3617_v38 = vld [vmem:[%s4022_s5 + $0x38] sm:$0xff]  ;;  %v3629_v40 = vld [vmem:[%s4022_s5 + $0x30] sm:$0xff] }
  0x50   : > { %1097 = vmatprep.subr.bf16.mxu0 %v2996_v41  ;;  %1127 = vmatprep.mubr.bf16.mxu0 %v932_v52  ;;  %v3635_v41 = vld [vmem:[%s4022_s5 + $0xa8] sm:$0xff]  ;;  %v3699_v52 = vld [vmem:[%s4022_s5] sm:$0xff] }
  0x51   : > { %2749 = vmatpush3.msra.mxu1 %v3520_v23 }
  0x52   : > { %2750 = vmatprep.subr.mxu1 %v3525_v24 }
  0x53   : > { %1098 = vmatpush1.bf16.msra.mxu0 %v2994_v42  ;;  %v3641_v42 = vld [vmem:[%s4022_s5 + $0x28] sm:$0xff] }
  0x54   : > { %1099 = vmatprep.subr.bf16.mxu0 %v2999_v45  ;;  %v3659_v45 = vld [vmem:[%s4022_s5 + $0x98] sm:$0xff] }
  0x57   : > { %1100 = vmatpush1.bf16.msra.mxu0 %v2997_v48  ;;  %v3676_v48 = vld [vmem:[%s4022_s5 + $0x10] sm:$0xff] }
  0x58   : > { %1101 = vmatprep.subr.bf16.mxu0 %v3002_v51  ;;  %v3693_v51 = vld [vmem:[%s4022_s5 + $0x80] sm:$0xff] }
  0x5b   : > { %1102 = vmatpush1.bf16.msra.mxu0 %v3000_v53 }
  0x5c   : > { %1103 = vmatprep.subr.bf16.mxu0 %v3005_v54 }
  0x5f   : > { %1104 = vmatpush1.bf16.msra.mxu0 %v3003_v55 }
  0x60   : > { %1105 = vmatprep.subr.bf16.mxu0 %v3008_v56 }
  0x63   : > { %1106 = vmatpush1.bf16.msra.mxu0 %v3006_v57 }
  0x64   : > { %1107 = vmatprep.subr.bf16.mxu0 %v3011_v58 }
  0x67   : > { %1108 = vmatpush1.bf16.msra.mxu0 %v3009_v59 }
  0x68   : > { %1109 = vmatprep.subr.bf16.mxu0 %v3014_v60 }
  0x6b   : > { %1110 = vmatpush1.bf16.msra.mxu0 %v3012_v62 }
  0x6c   : > { %1111 = vmatprep.subr.bf16.mxu0 %v3017_v63 }
  0x6f   : > { %1112 = vmatpush2.bf16.msra.mxu0 %v3015_v0 }
  0x70   : > { %1113 = vmatprep.subr.bf16.mxu0 %v3020_v1 }
  0x73   : > { %1114 = vmatpush2.bf16.msra.mxu0 %v3018_v2 }
  0x74   : > { %1115 = vmatprep.subr.bf16.mxu0 %v3023_v4 }
  0x77   : > { %1116 = vmatpush2.bf16.msra.mxu0 %v3021_v5 }
  0x78   : > { %1117 = vmatprep.subr.bf16.mxu0 %v3026_v6 }
  0x7b   : > { %1118 = vmatpush2.bf16.msra.mxu0 %v3024_v7 }
  0x7c   : > { %1119 = vmatprep.subr.bf16.mxu0 %v3029_v8 }
  0x7f   : > { %1120 = vmatpush2.bf16.msra.mxu0 %v3027_v9 }
  0x80   : > { %1121 = vmatprep.subr.bf16.mxu0 %v3032_v10 }
  0x83   : > { %1122 = vmatpush2.bf16.msra.mxu0 %v3030_v11 }
  0x84   : > { %1123 = vmatprep.subr.bf16.mxu0 %v3035_v12 }
  0x87   : > { %1124 = vmatpush2.bf16.msra.mxu0 %v3033_v15 }
  0x88   : > { %1125 = vmatprep.subr.bf16.mxu0 %v3038_v18 }
  0x8b   : > { %1126 = vmatpush2.bf16.msra.mxu0 %v3036_v19 }
  0x8e   : > { %1128 = vmatmul.mubr.bf16.vlgmr.msra.gmra.mxu0 %v929_v22 }
  0x8f   : > { %1330 = vmatprep.mubr.f32.mxu0 %v3126_v3  ;;  %v3531_v3 = vld [vmem:[%s4022_s5 + $0x70] sm:$0xff] }
  0x90   : > { %2751 = vmatpush3.msra.mxu1 %v3531_v3 }
  0x91   : > { %2752 = vmatprep.subr.mxu1 %v3537_v25 }
  0x92   : > { %2753 = vmatpush3.msra.mxu1 %v3543_v26 }
  0x93   : > { %2754 = vmatprep.subr.mxu1 %v3549_v27 }
  0x94   : > { %2755 = vmatpush3.msra.mxu1 %v3555_v28 }
  0x95   : > { %2756 = vmatprep.subr.mxu1 %v3563_v29 }
  0x96   : > { %2757 = vmatpush3.msra.mxu1 %v3569_v30 }
  0x97   : > { %2758 = vmatprep.subr.mxu1 %v3575_v31 }
  0x98   : > { %2759 = vmatpush3.msra.mxu1 %v3581_v32 }
  0x99   : > { %2760 = vmatprep.subr.mxu1 %v3587_v33 }
  0x9a   : > { %2761 = vmatpush3.msra.mxu1 %v3593_v34 }
  0x9b   : > { %2762 = vmatprep.subr.mxu1 %v3599_v35 }
  0x9c   : > { %2763 = vmatpush3.msra.mxu1 %v3605_v36 }
  0x9d   : > { %2764 = vmatprep.subr.mxu1 %v3611_v37 }
  0x9e   : > { %2765 = vmatpush3.msra.mxu1 %v3617_v38 }
  0x9f   : > { %2766 = vmatprep.subr.mxu1 %v3623_v39 }
  0xa0   : > { %2767 = vmatpush3.msra.mxu1 %v3629_v40 }
  0xa1   : > { %2768 = vmatprep.subr.mxu1 %v3635_v41 }
  0xa2   : > { %2769 = vmatpush3.msra.mxu1 %v3641_v42 }
  0xa3   : > { %2770 = vmatprep.subr.mxu1 %v3647_v43 }
  0xa4   : > { %2771 = vmatpush3.msra.mxu1 %v3653_v44 }
  0xa5   : > { %2772 = vmatprep.subr.mxu1 %v3659_v45 }
  0xa6   : > { %2773 = vmatpush3.msra.mxu1 %v3665_v46 }
  0xa7   : > { %2774 = vmatprep.subr.mxu1 %v3671_v47 }
  0xa8   : > { %2775 = vmatpush3.msra.mxu1 %v3676_v48 }
  0xa9   : > { %2776 = vmatprep.subr.mxu1 %v3681_v49 }
  0xaa   : > { %2777 = vmatpush3.msra.mxu1 %v3687_v50 }
  0xab   : > { %2778 = vmatprep.subr.mxu1 %v3693_v51 }
  0xac   : > { %2779 = vmatpush3.msra.mxu1 %v3699_v52 }
  0xad   : > { %2783 = vmatprep.subr.mxu1 %v3515_v61 }
 0x10e   : > { %v669_v53 = vpop.f32.mrf.mxu0 }
 0x10f   : > { %v872_v54 = vpop.f32.mrf.mxu1 }
 0x110   : > { %v671_v55 = vpop.f32.mrf.mxu0  ;;  %v873_v0 = vadd.f32 %v872_v54, %v669_v53 }
 0x111   : > { %v874_v56 = vpop.f32.mrf.mxu1 }
 0x112   : > { %v673_v57 = vpop.f32.mrf.mxu0  ;;  %v875_v4 = vadd.f32 %v874_v56, %v671_v55 }
 0x113   : > { %v876_v58 = vpop.f32.mrf.mxu1 }
 0x114   : > { %v675_v59 = vpop.f32.mrf.mxu0  ;;  %v877_v1 = vadd.f32 %v876_v58, %v673_v57 }
 0x115   : > { %v878_v62 = vpop.f32.mrf.mxu1 }
 0x116   : > { %v879_v5 = vadd.f32 %v878_v62, %v675_v59 }
 0x14e   : > { %v1129_v60 = vpop.f32.mrf.mxu0 }
 0x14f   : > { %v3705_v6 = vadd.f32 %v1129_v60, %v873_v0  ;;  %v3127_v0 = vmov 0  }
 0x150   : > { %v1131_v63 = vpop.f32.mrf.mxu0  ;;  %2894 = vset.pattern.permute.xlu0 %v3127_v0 }
 0x151   : > { %v3709_v9 = vadd.f32 %v1131_v63, %v875_v4  ;;  %v2610_v63 = vld [vmem:[#allocation4] ss:$0 sm:$0xff] }
 0x152   : > { %v1133_v2 = vpop.f32.mrf.mxu0  ;;  %1542 = vperm.xlu0 %2894, %v2610_v63  }
 0x153   : > { %v3707_v7 = vadd.f32 %v1133_v2, %v877_v1 }
 0x154   : > { %v1135_v8 = vpop.f32.mrf.mxu0 }
 0x155   : > { %v1142_v10 = vadd.f32 %v3707_v7, %v3705_v6  ;;  %v3713_v11 = vadd.f32 %v1135_v8, %v879_v5  ;;  %v3039_v5 = vld [vmem:[%s4020_s3 + $0x78] sm:$0xff]  }
 0x156   : > { %v3043_v8 = vld [vmem:[%s4020_s3 + $0xf8] sm:$0xff]  }
 0x157   : > { %v1143_v12 = vrot.slane %v1142_v10, 4  ;;  %v1149_v13 = vadd.f32 %v3713_v11, %v3709_v9 }
 0x159   : > { %v1144_v14 = vadd.f32 %v1143_v12, %v1142_v10  ;;  %v1150_v15 = vrot.slane %v1149_v13, 4  ;;  %v3047_v10 = vld [vmem:[%s4020_s3 + $0xf0] sm:$0xff]   ;;  %v3045_v12 = vld [vmem:[%s4020_s3 + $0x68] sm:$0xff]  }
 0x15b   : > { %v1145_v16 = vrot.slane %v1144_v14, 2  ;;  %v1151_v17 = vadd.f32 %v1150_v15, %v1149_v13  ;;  %v3048_v13 = vld [vmem:[%s4020_s3 + $0xb0] sm:$0xff]   ;;  %v3049_v15 = vld [vmem:[%s4020_s3 + $0x60] sm:$0xff]  }
 0x15d   : > { %v1146_v18 = vadd.f32 %v1145_v16, %v1144_v14  ;;  %v1152_v19 = vrot.slane %v1151_v17, 2  ;;  %v3046_v14 = vld [vmem:[%s4020_s3 + $0x28] sm:$0xff]   ;;  %v3050_v16 = vld [vmem:[%s4020_s3 + $0x20] sm:$0xff]  }
 0x15f   : > { %v1153_v20 = vadd.f32 %v1152_v19, %v1151_v17  ;;  %v1147_v21 = vrot.slane %v1146_v18, 1  ;;  %v3051_v17 = vld [vmem:[%s4020_s3 + $0xe8] sm:$0xff]   ;;  %v3053_v19 = vld [vmem:[%s4020_s3 + $0x58] sm:$0xff]  }
 0x161   : > { %v1154_v22 = vrot.slane %v1153_v20, 1  ;;  %v1148_v53 = vadd.f32 %v1147_v21, %v1146_v18  ;;  %v3052_v18 = vld [vmem:[%s4020_s3 + $0xa8] sm:$0xff]   ;;  %v3055_v21 = vld [vmem:[%s4020_s3 + $0xe0] sm:$0xff]  }
 0x163   : > { %v1155_v61 = vadd.f32 %v1154_v22, %v1153_v20  ;;  %v3054_v20 = vld [vmem:[%s4020_s3 + $0x18] sm:$0xff]   ;;  %v3056_v22 = vld [vmem:[%s4020_s3 + $0xa0] sm:$0xff]  }
 0x165   : > { %1252 = vmatprep.mubr.f32.mxu1 %v1155_v61  ;;  %v3057_v61 = vld [vmem:[%s4020_s3 + $0x50] sm:$0xff]  }
 0x166   : > { %1253 = vmatmul.mubr.f32.vlgmr.msra.gmra.mxu1 %v1148_v53  ;;  %v3058_v53 = vld [vmem:[%s4020_s3 + $0x10] sm:$0xff]  }
 0x167   : > { %2784 = vmatpush3.msra.mxu1 %v3520_v23  ;;  %v1261_v23 = vld [vmem:[%s4023_s6 + $0x18] sm:$0xff] }
 0x168   : > { %2785 = vmatprep.subr.mxu1 %v3525_v24  ;;  %1294 = vmatprep.subr.mxu0 %v1261_v23  ;;  %v1260_v24 = vld [vmem:[%s4023_s6 + $0x10] sm:$0xff] }
 0x169   : > { %2786 = vmatpush3.msra.mxu1 %v3531_v3  ;;  %1295 = vmatpush1.msra.mxu0 %v1260_v24  ;;  %v1259_v3 = vld [vmem:[%s4023_s6 + $0x8] sm:$0xff] }
 0x16a   : > { %2787 = vmatprep.subr.mxu1 %v3537_v25  ;;  %1296 = vmatprep.subr.mxu0 %v1259_v3  ;;  %v1258_v25 = vld [vmem:[%s4023_s6] sm:$0xff] }
 0x16b   : > { %2788 = vmatpush3.msra.mxu1 %v3543_v26  ;;  %1297 = vmatpush1.msra.mxu0 %v1258_v25 }
 0x16c   : > { %2789 = vmatprep.subr.mxu1 %v3549_v27  ;;  %1470 = vmatprep.subr.mxu0 %v1261_v23  ;;  %v3059_v23 = vld [vmem:[%s4020_s3 + $0xd8] sm:$0xff]  }
 0x16d   : > { %2790 = vmatpush3.msra.mxu1 %v3555_v28 }
 0x16e   : > { %2791 = vmatprep.subr.mxu1 %v3563_v29  ;;  %v3117_v29 = vld [vmem:[#allocation3] sm:$0xff] }
 0x16f   : > { %2792 = vmatpush3.msra.mxu1 %v3569_v30  ;;  %v1339_v30 = vlaneseq }
 0x170   : > { %2793 = vmatprep.subr.mxu1 %v3575_v31 }
 0x171   : > { %2794 = vmatpush3.msra.mxu1 %v3581_v32  ;;  %v1340_v31 = vshrl.u32 %v1339_v30, 7  ;;  %v3066_v30 = vld [vmem:[%s4020_s3] sm:$0xff]  }
 0x172   : > { %2795 = vmatprep.subr.mxu1 %v3587_v33 }
 0x173   : > { %2796 = vmatpush3.msra.mxu1 %v3593_v34  ;;  %v3761_v32 = vsub.s32 0, %v1340_v31  ;;  %v3068_v31 = vld [vmem:[%s4020_s3 + $0x88] sm:$0xff]  }
 0x174   : > { %2797 = vmatprep.subr.mxu1 %v3599_v35 }
 0x175   : > { %2798 = vmatpush3.msra.mxu1 %v3605_v36 }
 0x176   : > { %2799 = vmatprep.subr.mxu1 %v3611_v37 }
 0x177   : > { %2800 = vmatpush3.msra.mxu1 %v3617_v38 }
 0x178   : > { %2801 = vmatprep.subr.mxu1 %v3623_v39 }
 0x179   : > { %2802 = vmatpush3.msra.mxu1 %v3629_v40 }
 0x17a   : > { %2803 = vmatprep.subr.mxu1 %v3635_v41 }
 0x17b   : > { %2804 = vmatpush3.msra.mxu1 %v3641_v42 }
 0x17c   : > { %2805 = vmatprep.subr.mxu1 %v3647_v43 }
 0x17d   : > { %2806 = vmatpush3.msra.mxu1 %v3653_v44 }
 0x17e   : > { %2807 = vmatprep.subr.mxu1 %v3659_v45 }
 0x17f   : > { %2808 = vmatpush3.msra.mxu1 %v3665_v46 }
 0x180   : > { %2809 = vmatprep.subr.mxu1 %v3671_v47 }
 0x181   : > { %2810 = vmatpush3.msra.mxu1 %v3676_v48 }
 0x182   : > { %2811 = vmatprep.subr.mxu1 %v3681_v49 }
 0x183   : > { %2812 = vmatpush3.msra.mxu1 %v3687_v50 }
 0x184   : > { %2813 = vmatprep.subr.mxu1 %v3693_v51 }
 0x185   : > { %2814 = vmatpush3.msra.mxu1 %v3699_v52 }
 0x186   : > { %2818 = vmatprep.subr.bf16.mxu1 %v3043_v8 }
 0x226   : > { %v2780_v26 = vpop.f32.mrf.mxu1 }
 0x228   : > { %v2781_v27 = vpop.f32.mrf.mxu1 }
 0x229   : > { %v2782_v28 = vadd.f32 %v2781_v27, %v2780_v26  ;;  %v3063_v26 = vld [vmem:[%s4020_s3 + $0xd0] sm:$0xff]   ;;  %v3065_v27 = vld [vmem:[%s4020_s3 + $0x40] sm:$0xff]  }
 0x22b   : > { %2608 = vmatmul.mubr.msk.f32.vlgmr.msra.gmra.mxu0 %vm1262_vm3, %v2782_v28  ;;  %v3064_v28 = vld [vmem:[%s4020_s3 + $0x90] sm:$0xff]  }
 0x22c   : > { %1471 = vmatpush1.msra.mxu0 %v1260_v24  ;;  %1506 = vmatprep.mubr.f32.mxu0 %v3117_v29  ;;  %v3060_v24 = vld [vmem:[%s4020_s3 + $0x98] sm:$0xff]   ;;  %v3067_v29 = vld [vmem:[%s4020_s3 + $0xc8] sm:$0xff]  }
 0x22d   : > { %1472 = vmatprep.subr.mxu0 %v1259_v3  ;;  %v3061_v3 = vld [vmem:[%s4020_s3 + $0x48] sm:$0xff]  }
 0x22e   : > { %1473 = vmatpush1.msra.mxu0 %v1258_v25  ;;  %v3062_v25 = vld [vmem:[%s4020_s3 + $0x8] sm:$0xff]  }
 0x22f   : > { %2840 = vmatprep.subr.bf16.mxu0 %v3039_v5 }
 0x2eb   : > { %v1332_v33 = vpop.f32.mrf.mxu0 }
 0x2ec   : > { %v1337_v34 = vmul.f32 0.00390625, %v1332_v33  ;;  %v3069_v33 = vld [vmem:[%s4020_s3 + $0xc0] sm:$0xff]  }
 0x2ed   : > { %v1334_v35 = vpop.f32.mrf.mxu0 }
 0x2ee   : > { %v1342_v36 = vrot.slane %v1337_v34, %v3761_v32  ;;  %v1338_v37 = vmul.f32 0.00390625, %v1334_v35  ;;  %v3070_v34 = vld [vmem:[%s4020_s3 + $0x80] sm:$0xff]   ;;  %v3071_v35 = vld [vmem:[%s4020_s3 + $0x178] sm:$0xff]  }
 0x2f0   : > { %v3765_v38 = vsub.f32 %v3705_v6, %v1342_v36  ;;  %v3768_v39 = vsub.f32 %v3707_v7, %v1342_v36  ;;  %v1346_v40 = vrot.slane %v1338_v37, %v3761_v32  ;;  %v3040_v6 = vld [vmem:[%s4020_s3 + $0x38] sm:$0xff]   ;;  %v3041_v7 = vld [vmem:[%s4020_s3 + $0x70] sm:$0xff]  }
 0x2f2   : > { %v1351_v41 = vmul.f32 %v3765_v38, %v3765_v38  ;;  %v1353_v42 = vmul.f32 %v3768_v39, %v3768_v39  ;;  %v3776_v43 = vsub.f32 %v3709_v9, %v1346_v40  ;;  %v3779_v44 = vsub.f32 %v3713_v11, %v1346_v40  ;;  %v3044_v9 = vld [vmem:[%s4020_s3 + $0xb8] sm:$0xff]   ;;  %v3042_v11 = vld [vmem:[%s4020_s3 + $0x30] sm:$0xff]  }
 0x2f4   : > { %v1355_v45 = vadd.f32 %v1353_v42, %v1351_v41  ;;  %v1352_v46 = vmul.f32 %v3776_v43, %v3776_v43  ;;  %v1354_v47 = vmul.f32 %v3779_v44, %v3779_v44 }
 0x2f6   : > { %v1356_v48 = vrot.slane %v1355_v45, 4  ;;  %v1362_v49 = vadd.f32 %v1354_v47, %v1352_v46 }
 0x2f8   : > { %v1357_v50 = vadd.f32 %v1356_v48, %v1355_v45  ;;  %v1363_v51 = vrot.slane %v1362_v49, 4 }
 0x2fa   : > { %v1364_v52 = vadd.f32 %v1363_v51, %v1362_v49  ;;  %v1358_v54 = vrot.slane %v1357_v50, 2  ;;  %v1543_v49 = vpop.permute.xlu0 %1542 }
 0x2fc   : > { %v1365_v55 = vrot.slane %v1364_v52, 2  ;;  %v1359_v56 = vadd.f32 %v1358_v54, %v1357_v50 }
 0x2fe   : > { %v1366_v57 = vadd.f32 %v1365_v55, %v1364_v52  ;;  %v1360_v58 = vrot.slane %v1359_v56, 1 }
 0x300   : > { %v1367_v59 = vrot.slane %v1366_v57, 1  ;;  %v1361_v62 = vadd.f32 %v1360_v58, %v1359_v56 }
 0x302   : > { %v1368_v60 = vadd.f32 %v1367_v59, %v1366_v57 }
 0x304   : > { %1433 = vmatprep.mubr.f32.mxu1 %v1368_v60 }
 0x305   : > { %1434 = vmatmul.mubr.f32.vlgmr.msra.gmra.mxu1 %v1361_v62 }
 0x306   : > { %2819 = vmatpush3.bf16.msra.mxu1 %v3044_v9 }
 0x307   : > { %2820 = vmatprep.subr.bf16.mxu1 %v3047_v10 }
 0x30a   : > { %2821 = vmatpush3.bf16.msra.mxu1 %v3048_v13 }
 0x30b   : > { %2822 = vmatprep.subr.bf16.mxu1 %v3051_v17 }
 0x30e   : > { %2823 = vmatpush3.bf16.msra.mxu1 %v3052_v18 }
 0x30f   : > { %2824 = vmatprep.subr.bf16.mxu1 %v3055_v21 }
 0x312   : > { %2825 = vmatpush3.bf16.msra.mxu1 %v3056_v22 }
 0x313   : > { %2826 = vmatprep.subr.bf16.mxu1 %v3059_v23 }
 0x316   : > { %2827 = vmatpush3.bf16.msra.mxu1 %v3060_v24 }
 0x317   : > { %2828 = vmatprep.subr.bf16.mxu1 %v3063_v26 }
 0x31a   : > { %2829 = vmatpush3.bf16.msra.mxu1 %v3064_v28 }
 0x31b   : > { %2830 = vmatprep.subr.bf16.mxu1 %v3067_v29 }
 0x31e   : > { %2831 = vmatpush3.bf16.msra.mxu1 %v3068_v31  ;;  %v3072_v31 = vld [vmem:[%s4020_s3 + $0x138] sm:$0xff]  }
 0x31f   : > { %2832 = vmatprep.subr.bf16.mxu1 %v3069_v33 }
 0x322   : > { %2833 = vmatpush3.bf16.msra.mxu1 %v3070_v34  ;;  %v3073_v34 = vld [vmem:[%s4020_s3 + $0x170] sm:$0xff]  }
 0x323   : > { %2862 = vmatprep.subr.bf16.mxu1 %v3071_v35 }
 0x3c5   : > { %v2815_v1 = vpop.f32.mrf.mxu1 }
 0x3c7   : > { %v2816_v2 = vpop.f32.mrf.mxu1 }
 0x3c8   : > { %v2817_v4 = vadd.f32 %v2816_v2, %v2815_v1 }
 0x3ca   : > { %2609 = vmatmul.mubr.msk.f32.vlgmr.msra.gmra.mxu0 %vm1262_vm3, %v2817_v4 }
 0x3cb   : > { %2841 = vmatpush3.bf16.msra.mxu0 %v3040_v6 }
 0x3cc   : > { %2842 = vmatprep.subr.bf16.mxu0 %v3041_v7 }
 0x3cf   : > { %2843 = vmatpush3.bf16.msra.mxu0 %v3042_v11 }
 0x3d0   : > { %2844 = vmatprep.subr.bf16.mxu0 %v3045_v12 }
 0x3d3   : > { %2845 = vmatpush3.bf16.msra.mxu0 %v3046_v14 }
 0x3d4   : > { %2846 = vmatprep.subr.bf16.mxu0 %v3049_v15 }
 0x3d7   : > { %2847 = vmatpush3.bf16.msra.mxu0 %v3050_v16 }
 0x3d8   : > { %2848 = vmatprep.subr.bf16.mxu0 %v3053_v19 }
 0x3db   : > { %2849 = vmatpush3.bf16.msra.mxu0 %v3054_v20 }
 0x3dc   : > { %2850 = vmatprep.subr.bf16.mxu0 %v3057_v61 }
 0x3df   : > { %2851 = vmatpush3.bf16.msra.mxu0 %v3058_v53 }
 0x3e0   : > { %2852 = vmatprep.subr.bf16.mxu0 %v3061_v3 }
 0x3e3   : > { %2853 = vmatpush3.bf16.msra.mxu0 %v3062_v25 }
 0x3e4   : > { %2854 = vmatprep.subr.bf16.mxu0 %v3065_v27 }
 0x3e7   : > { %2855 = vmatpush3.bf16.msra.mxu0 %v3066_v30 }
 0x48a   : > { %v1508_v36 = vpop.f32.mrf.mxu0 }
 0x48b   : > { %v1513_v37 = vmul.f32 0.00390625, %v1508_v36 }
 0x48c   : > { %v1510_v40 = vpop.f32.mrf.mxu0 }
 0x48d   : > { %v1515_v41 = vadd.f32 1e-05, %v1513_v37  ;;  %v1514_v42 = vmul.f32 0.00390625, %v1510_v40  ;;  %v3074_v37 = vld [vmem:[%s4020_s3 + $0x130] sm:$0xff]   ;;  %v3075_v40 = vld [vmem:[%s4020_s3 + $0x168] sm:$0xff]  }
 0x48f   : > { %3113 = vrsqrt.f32 %v1515_v41  ;;  %v1516_v45 = vadd.f32 1e-05, %v1514_v42  ;;  %v3076_v41 = vld [vmem:[%s4020_s3 + $0x128] sm:$0xff]   ;;  %v3077_v42 = vld [vmem:[%s4020_s3 + $0x160] sm:$0xff]  }
 0x491   : > { %3115 = vrsqrt.f32 %v1516_v45  ;;  %v3078_v45 = vld [vmem:[%s4020_s3 + $0x120] sm:$0xff]  }
 0x49c   : > { %v3114_v46 = vpop.eup %3113 }
 0x49d   : > { %v1522_v47 = vrot.slane %v3114_v46, %v3761_v32  ;;  %v3079_v46 = vld [vmem:[%s4020_s3 + $0x158] sm:$0xff]  }
 0x49e   : > { %v3116_v48 = vpop.eup %3115 }
 0x49f   : > { %v1526_v50 = vrot.slane %v3116_v48, %v3761_v32  ;;  %v1527_v51 = vmul.f32 %v1522_v47, %v3765_v38  ;;  %v1529_v52 = vmul.f32 %v1522_v47, %v3768_v39  ;;  %v3080_v47 = vld [vmem:[%s4020_s3 + $0x118] sm:$0xff]   ;;  %v3081_v48 = vld [vmem:[%s4020_s3 + $0x150] sm:$0xff]  }
 0x4a1   : > { %v1528_v54 = vmul.f32 %v1526_v50, %v3776_v43  ;;  %v1530_v55 = vmul.f32 %v1526_v50, %v3779_v44  ;;  %vm1531_vm4 = vcmp.ge.f32.partialorder %v1527_v51, 0.0  ;;  %vm1533_vm5 = vcmp.ge.f32.partialorder %v1529_v52, 0.0  ;;  %v3083_v50 = vld [vmem:[%s4020_s3 + $0x148] sm:$0xff]  }
 0x4a2   : > { %v1545_v56 = vmul.f32 %v1543_v49, %v1527_v51  ;;  %v1547_v57 = vmul.f32 %v1543_v49, %v1529_v52 }
 0x4a3   : > { %vm1532_vm6 = vcmp.ge.f32.partialorder %v1528_v54, 0.0  ;;  %vm1534_vm7 = vcmp.ge.f32.partialorder %v1530_v55, 0.0  ;;  %v1546_v58 = vmul.f32 %v1543_v49, %v1528_v54  ;;  %v1548_v59 = vmul.f32 %v1543_v49, %v1530_v55  ;;  %v3082_v49 = vld [vmem:[%s4020_s3 + $0x110] sm:$0xff]  }
 0x4a4   : > { %v1549_v60 = vsel %vm1531_vm4, %v1527_v51, %v1545_v56  ;;  %v1551_v62 = vsel %vm1533_vm5, %v1529_v52, %v1547_v57 }
 0x4a5   : > { %v1550_v63 = vsel %vm1532_vm6, %v1528_v54, %v1546_v58  ;;  %v1552_v32 = vsel %vm1534_vm7, %v1530_v55, %v1548_v59  ;;  %v1563_v1 = vrot.slane %v1549_v60, 7  ;;  %v1565_v38 = vrot.slane %v1551_v62, 7  ;;  %v3084_v54 = vld [vmem:[%s4020_s3 + $0x108] sm:$0xff]   ;;  %v3085_v55 = vld [vmem:[%s4020_s3 + $0x140] sm:$0xff]  }
 0x4a6   : > { %v1564_v2 = vrot.slane %v1550_v63, 7  ;;  %v1567_v39 = vrot.slane %v1552_v32, 7  ;;  %v3086_v58 = vld [vmem:[%s4020_s3 + $0x100] sm:$0xff]   ;;  %v3087_v63 = vld [vmem:[%s4024_s7 + $0x70] ss:$8 sps:$4 sm:$0xff]  }
 0x4a7   : > { %v3893_v43 = vsel %vm350_vm0, %v1563_v1, %v1565_v38  ;;  %1575 = vst [vmem:[#allocation3] sm:$0xfe] %v1563_v1  ;;  %1579 = vst [vmem:[#allocation3 + $0x28] sm:$0x1] %v1565_v38  ;;  %v3089_v32 = vld [vmem:[%s4024_s7 + $0x74] ss:$8 sps:$4 sm:$0xff]  }
 0x4a8   : > { %v1568_v44 = vsel %vm350_vm0, %v1564_v2, %v1567_v39  ;;  %1576 = vst [vmem:[#allocation3 + $0x8] sm:$0xfe] %v1564_v2  ;;  %1580 = vst [vmem:[#allocation3 + $0x10] sm:$0x1] %v1567_v39  ;;  %v3092_v1 = vld [vmem:[%s4024_s7 + $0x64] ss:$8 sps:$4 sm:$0xff]   ;;  %2258 = vmatprep.subr.bf16.mxu0 %v3089_v32 }
 0x4a9   : > { %v3090_v38 = vld [vmem:[%s4024_s7 + $0x60] ss:$8 sps:$4 sm:$0xff]   ;;  %v3095_v2 = vld [vmem:[%s4024_s7 + $0x54] ss:$8 sps:$4 sm:$0xff]   ;;  %v3093_v39 = vld [vmem:[%s4024_s7 + $0x50] ss:$8 sps:$4 sm:$0xff]  }
 0x4ae   : > { %v1581_v4 = vld [vmem:[#allocation3] sm:$0xff]  ;;  %v1621_v6 = vld [vmem:[#allocation3 + $0x28] sm:$0x1] }
 0x4af   : > { %v1619_v5 = vld [vmem:[#allocation3] sm:$0xfe]  ;;  %v1582_v7 = vld [vmem:[#allocation3 + $0x8] sm:$0xff]  ;;  %v1622_v9 = vld [vmem:[#allocation3 + $0x10] sm:$0x1]  ;;  %v1625_v11 = vpack.c.bf16 %v1621_v6, %v1621_v6  ;;  %v1585_v17 = vpack.c.bf16 %v3893_v43, %v1581_v4 }
 0x4b0   : > { %v1620_v8 = vld [vmem:[#allocation3 + $0x8] sm:$0xfe]  ;;  %v1623_v10 = vpack.c.bf16 %v3893_v43, %v1619_v5  ;;  %v1586_v12 = vpack.c.bf16 %v1568_v44, %v1582_v7  ;;  %v1626_v14 = vpack.c.bf16 %v1622_v9, %v1622_v9  ;;  %v1963_v16 = vld [vmem:[#allocation3 + $0x10] sm:$0x3]  ;;  %v1960_v51 = vld [vmem:[#allocation3] sm:$0xfc] }
 0x4b1   : > { %v1624_v13 = vpack.c.bf16 %v1568_v44, %v1620_v8  ;;  %v1961_v15 = vld [vmem:[#allocation3 + $0x8] sm:$0xfc]  ;;  %v1967_v22 = vpack.c.bf16 %v1963_v16, %v1963_v16  ;;  %v1668_v23 = vshll.u32 %v1625_v11, 16  ;;  %v1962_v52 = vld [vmem:[#allocation3 + $0x28] sm:$0x3]  ;;  %v1964_v56 = vpack.c.bf16 %v3893_v43, %v1960_v51 }
 0x4b2   : > { %v1663_v18 = vshll.u32 %v1623_v10, 16  ;;  %1951 = vmatprep.mubr.bf16.mxu0 %v1586_v12  ;;  %v1680_v20 = vshll.u32 %v1626_v14, 16  ;;  %v1965_v21 = vpack.c.bf16 %v1568_v44, %v1961_v15  ;;  %v1661_v61 = vshrl.u32 %v1623_v10, 16  ;;  %v3098_v43 = vld [vmem:[%s4024_s7 + $0x44] ss:$8 sps:$4 sm:$0xff]  }
 0x4b3   : > { %v1675_v19 = vshll.u32 %v1624_v13, 16  ;;  %1952 = vmatmul.mubr.bf16.vlgmr.msra.gmra.mxu0 %v1585_v17  ;;  %v1673_v24 = vshrl.u32 %v1624_v13, 16  ;;  %v2009_v29 = vrot.slane %v1967_v22, 1  ;;  %v1670_v30 = vrot.slane %v1668_v23, 1  ;;  %v3096_v44 = vld [vmem:[%s4024_s7 + $0x40] ss:$8 sps:$4 sm:$0xff]  }
 0x4b4   : > { %v1665_v53 = vrot.slane %v1663_v18, 1  ;;  %2290 = vmatprep.mubr.bf16.mxu0 %v3127_v0  ;;  %v1682_v27 = vrot.slane %v1680_v20, 1  ;;  %v2008_v28 = vrot.slane %v1965_v21, 1  ;;  %v1966_v57 = vpack.c.bf16 %v1962_v52, %v1962_v52  ;;  %2259 = vmatpush1.bf16.msra.mxu0 %v3087_v63  ;;  %v3101_v4 = vld [vmem:[%s4024_s7 + $0x34] ss:$8 sps:$4 sm:$0xff]  }
 0x4b5   : > { %v1677_v3 = vrot.slane %v1675_v19, 1  ;;  %v2005_v59 = vrot.slane %v1964_v56, 1  ;;  %2260 = vmatprep.subr.bf16.mxu0 %v3092_v1  ;;  %v3099_v5 = vld [vmem:[%s4024_s7 + $0x30] ss:$8 sps:$4 sm:$0xff]   ;;  %v3104_v6 = vld [vmem:[%s4024_s7 + $0x24] ss:$8 sps:$4 sm:$0xff]  }
 0x4b6   : > { %v1666_v25 = vor.u32 %v1665_v53, %v1661_v61  ;;  %v2010_v36 = vsel %vm926_vm2, %v2008_v28, %v2009_v29  ;;  %v2006_v60 = vrot.slane %v1966_v57, 1  ;;  %v3102_v7 = vld [vmem:[%s4024_s7 + $0x20] ss:$8 sps:$4 sm:$0xff]   ;;  %v3107_v8 = vld [vmem:[%s4024_s7 + $0x14] ss:$8 sps:$4 sm:$0xff]  }
 0x4b7   : > { %v1678_v26 = vor.u32 %v1677_v3, %v1673_v24  ;;  %v3105_v9 = vld [vmem:[%s4024_s7 + $0x10] ss:$8 sps:$4 sm:$0xff]   ;;  %v3108_v10 = vld [vmem:[%s4024_s7] ss:$8 sps:$4 sm:$0xff]   ;;  %v3110_v11 = vld [vmem:[%s4024_s7 + $0x4] ss:$8 sps:$4 sm:$0xff]  }
 0x4b8   : > { %v1671_v35 = vsel %vm448_vm1, %v1666_v25, %v1670_v30  ;;  %v2007_v62 = vsel %vm926_vm2, %v2005_v59, %v2006_v60  ;;  %2261 = vmatpush1.bf16.msra.mxu0 %v3090_v38  ;;  %v2723_v30 = vld [vmem:[%s4021_s4] ss:$0 sm:$0xff] }
 0x4b9   : > { %v1683_v33 = vsel %vm448_vm1, %v1678_v26, %v1682_v27  ;;  %2262 = vmatprep.subr.bf16.mxu0 %v3095_v2 }
 0x4ba   : > { %1814 = vmatprep.mubr.bf16.mxu1 %v1683_v33 }
 0x4bb   : > { %1815 = vmatmul.mubr.bf16.vlgmr.msra.gmra.mxu1 %v1671_v35 }
 0x4bc   : > { %2863 = vmatpush3.bf16.msra.mxu1 %v3072_v31  ;;  %2141 = vmatprep.mubr.bf16.mxu1 %v2010_v36 }
 0x4bd   : > { %2864 = vmatprep.subr.bf16.mxu1 %v3073_v34  ;;  %2263 = vmatpush1.bf16.msra.mxu0 %v3093_v39 }
 0x4be   : > { %2264 = vmatprep.subr.bf16.mxu0 %v3098_v43 }
 0x4c0   : > { %2865 = vmatpush3.bf16.msra.mxu1 %v3074_v37 }
 0x4c1   : > { %2866 = vmatprep.subr.bf16.mxu1 %v3075_v40  ;;  %2265 = vmatpush1.bf16.msra.mxu0 %v3096_v44 }
 0x4c2   : > { %2266 = vmatprep.subr.bf16.mxu0 %v3101_v4 }
 0x4c4   : > { %2867 = vmatpush3.bf16.msra.mxu1 %v3076_v41 }
 0x4c5   : > { %2868 = vmatprep.subr.bf16.mxu1 %v3077_v42  ;;  %2267 = vmatpush1.bf16.msra.mxu0 %v3099_v5 }
 0x4c6   : > { %2268 = vmatprep.subr.bf16.mxu0 %v3104_v6 }
 0x4c8   : > { %2869 = vmatpush3.bf16.msra.mxu1 %v3078_v45 }
 0x4c9   : > { %2870 = vmatprep.subr.bf16.mxu1 %v3079_v46  ;;  %2269 = vmatpush1.bf16.msra.mxu0 %v3102_v7  ;;  %v3111_v46 = vld [vmem:[%s4025_s8] sm:$0xff]  }
 0x4ca   : > { %2270 = vmatprep.subr.bf16.mxu0 %v3107_v8 }
 0x4cc   : > { %2871 = vmatpush3.bf16.msra.mxu1 %v3080_v47  ;;  %v3112_v47 = vld [vmem:[%s4025_s8 + $0x8] sm:$0xff]  }
 0x4cd   : > { %2872 = vmatprep.subr.bf16.mxu1 %v3081_v48  ;;  %2271 = vmatpush1.bf16.msra.mxu0 %v3105_v9 }
 0x4ce   : > { %2272 = vmatprep.subr.bf16.mxu0 %v3110_v11 }
 0x4d0   : > { %2873 = vmatpush3.bf16.msra.mxu1 %v3082_v49 }
 0x4d1   : > { %2874 = vmatprep.subr.bf16.mxu1 %v3083_v50  ;;  %2273 = vmatpush1.bf16.msra.mxu0 %v3108_v10 }
 0x4d4   : > { %2875 = vmatpush3.bf16.msra.mxu1 %v3084_v54 }
 0x4d5   : > { %2876 = vmatprep.subr.bf16.mxu1 %v3085_v55 }
 0x4d8   : > { %2877 = vmatpush3.bf16.msra.mxu1 %v3086_v58 }
 0x4db   : > { %2142 = vmatmul.mubr.bf16.vlgmr.msra.gmra.mxu1 %v2007_v62 }
 0x4dc   : > { %2355 = vmatprep.mubr.bf16.mxu1 %v3127_v0 }
 0x573   : > { %v2856_v13 = vpop.f32.mrf.mxu0 }
 0x575   : > { %v2857_v15 = vpop.f32.mrf.mxu0 }
 0x576   : > { %v2858_v61 = vadd.f32 %v2857_v15, %v2856_v13 }
 0x577   : > { %v2859_v17 = vpop.f32.mrf.mxu0 }
 0x579   : > { %v2860_v21 = vpop.f32.mrf.mxu0 }
 0x57a   : > { %v2861_v3 = vadd.f32 %v2860_v21, %v2859_v17 }
 0x57b   : > { %v2834_v12 = vpop.f32.mrf.mxu1 }
 0x57d   : > { %v2835_v14 = vpop.f32.mrf.mxu1 }
 0x57e   : > { %v2836_v20 = vadd.f32 %v2835_v14, %v2834_v12 }
 0x57f   : > { %v2837_v16 = vpop.f32.mrf.mxu1 }
 0x580   : > { %v1954_v25 = vadd.f32 %v2858_v61, %v2836_v20 }
 0x581   : > { %v2838_v18 = vpop.f32.mrf.mxu1 }
 0x582   : > { %v2839_v53 = vadd.f32 %v2838_v18, %v2837_v16 }
 0x584   : > { %v1957_v27 = vadd.f32 %v2861_v3, %v2839_v53 }
 0x59b   : > { %v2878_v19 = vpop.f32.mrf.mxu1 }
 0x59d   : > { %v2879_v22 = vpop.f32.mrf.mxu1 }
 0x59e   : > { %v2880_v23 = vadd.f32 %v2879_v22, %v2878_v19 }
 0x59f   : > { %v2881_v24 = vpop.f32.mrf.mxu1 }
 0x5a0   : > { %v2150_v28 = vadd.f32 %v2880_v23, %v1954_v25 }
 0x5a1   : > { %v2882_v26 = vpop.f32.mrf.mxu1 }
 0x5a2   : > { %v2883_v29 = vadd.f32 %v2882_v26, %v2881_v24  ;;  %v2159_v33 = vadd.f32 %v2723_v30, %v2150_v28 }
 0x5a4   : > { %v2151_v31 = vadd.f32 %v2883_v29, %v1957_v27 }
 0x5a6   : > { %v2160_v34 = vadd.f32 %v2723_v30, %v2151_v31 }
 0x5a8   : > { %v2161_v35 = vpack.c.bf16 %v2160_v34, %v2159_v33 }
 0x5aa   : > { %2291 = vmatmul.mubr.bf16.vlgmr.msra.gmra.mxu0 %v2161_v35 }
 0x66a   : > { %v2292_v36 = vpop.f32.mrf.mxu0 }
 0x66c   : > { %v2294_v37 = vpop.f32.mrf.mxu0 }
 0x66e   : > { %v2296_v40 = vpop.f32.mrf.mxu0 }
 0x66f   : > { %v2305_v45 = vpack.c.bf16 %v2296_v40, %v2292_v36 }
 0x670   : > { %v2298_v41 = vpop.f32.mrf.mxu0 }
 0x671   : > { %v2306_v42 = vpack.c.bf16 %v2298_v41, %v2294_v37 }
 0x673   : > { %2337 = vmatprep.subr.bf16.mxu1 %v2306_v42 }
 0x674   : > { %2338 = vmatpush1.bf16.msra.mxu1 %v2305_v45 }
 0x677   : > { %2742 = vmatmul.mubr.msk.bf16.vlgmr.msra.gmra.mxu1 %vm1262_vm3, %v3111_v46 }
 0x678   : > { %2365 = vmatprep.mubr.bf16.mxu1 %v3127_v0 }
 0x67f   : > { %2743 = vmatmul.mubr.msk.bf16.gmra.mxu1 %vm1262_vm3, %v3112_v47 }
 0x737   : > { %v2357_v48 = vpop.f32.mrf.mxu1 }
 0x738   : > { %2376 = vst [vmem:[%s334_s17] sm:$0xff] %v2357_v48 }
 0x739   : > { %v2359_v49 = vpop.f32.mrf.mxu1 }
 0x73a   : > { %2377 = vst [vmem:[%s334_s17 + $0x8] sm:$0xff] %v2359_v49 }
 0x73b   : > { %v2361_v50 = vpop.f32.mrf.mxu1 }
 0x73c   : > { %2378 = vst [vmem:[%s334_s17 + $0x10] sm:$0xff] %v2361_v50 }
 0x73d   : > { %v2363_v51 = vpop.f32.mrf.mxu1 }
 0x73e   : > { %2379 = vst [vmem:[%s334_s17 + $0x18] sm:$0xff] %v2363_v51 }
 0x73f   : > { %v2367_v0 = vpop.f32.mrf.mxu1 }
 0x740   : > { %2380 = vst [vmem:[%s334_s17 + $0x20] sm:$0xff] %v2367_v0 }
 0x741   : > { %v2369_v52 = vpop.f32.mrf.mxu1 }
 0x742   : > { %2381 = vst [vmem:[%s334_s17 + $0x28] sm:$0xff] %v2369_v52 }
 0x743   : > { %v2371_v54 = vpop.f32.mrf.mxu1 }
 0x744   : > { %2382 = vst [vmem:[%s334_s17 + $0x30] sm:$0xff] %v2371_v54 }
 0x745   : > { %v2373_v55 = vpop.f32.mrf.mxu1 }
 0x746   : > { %2383 = vst [vmem:[%s334_s17 + $0x38] sm:$0xff] %v2373_v55 }
 0x747 PF: > { %s21_s11 = sadd.s32 1, %s3124_s11  }
 0x748   : > { %p18_p4 = scmp.ge.s32.totalorder %s21_s11, 4  }
 0x74a   :  { %20 = sbr.rel (!%p18_p4) target bundleno = 3 (0x3), region = 90 }

// kernel: fpn_forward.2
= control target key start
LH: loop header
LB: loop body
LE: loop exit
PB: predicated region body
PF: predicated region fallthrough
CT: control target
= control target key end

     0   :  { %s3335_s11 = smov 0   ;;  %s4211_s0 = inlined_call_operand.vmem [shape: f32[2,8,256], index: 0, kind: input, shape index: {}]   ;;  %s4212_s1 = inlined_call_operand.vmem [shape: bf16[3,256,256], index: 1, kind: input, shape index: {}]   ;;  %s4213_s2 = inlined_call_operand.<no memory space> [shape: f32[1,1], index: 2, kind: input, shape index: {}]   ;;  %s4214_s3 = inlined_call_operand.vmem [shape: bf16[3,256,128], index: 3, kind: input, shape index: {}]   ;;  %s4215_s4 = inlined_call_operand.vmem [shape: f32[1,128], index: 4, kind: input, shape index: {}]   ;;  %s4216_s5 = inlined_call_operand.vmem [shape: f32[256,32], index: 5, kind: input, shape index: {}]   ;;  %s4217_s6 = inlined_call_operand.vmem [shape: f32[32,256], index: 6, kind: input, shape index: {}]   ;;  %s4218_s7 = inlined_call_operand.vmem [shape: bf16[128,512], index: 7, kind: input, shape index: {}]   ;;  %s4219_s8 = inlined_call_operand.vmem [shape: bf16[32,8], index: 8, kind: input, shape index: {}]   ;;  %s4220_s9 = inlined_call_operand.vmem [shape: f32[2,32,512], index: 9, kind: output, shape index: {}]  }
   0x1   :  { %v14_v0 = vstv %s4213_s2 }
   0x2   :  { %15 = vst [vmem:[#allocation4] sm:$0x1] %v14_v0 }
   0x3 LB: > { %s2549_s12 = sadd.s32 4294967295, %s3278_s11   ;;  %p2553_p0 = scmp.ge.s32.totalorder %s3278_s11, 1  ;;  %s3278_s11 = sphi %s3335_s11, %s21_s11  }
   0x4   : > { %p289_p1 = scmp.lt.s32.totalorder %s3278_s11, 3 }
   0x6   : > { %p290_p2 = pnand %p2553_p0, %p289_p1 }
   0x7   : > { %p325_p3 = scmp.lt.s32.totalorder (!%p290_p2), %s2549_s12, 1 }
   0x8   : > { %293 = sbr.rel (%p290_p2) target bundleno = 1862 (0x746), region = 56 }
   0xd   : > { %v3025_v1 = vld [vmem:[%s4212_s1 + $0x174] ss:$8 sps:$4 sm:$0xff]   ;;  %v3280_v3 = vmov 0.0   ;;  %v3029_v4 = vld [vmem:[%s4212_s1 + $0x170] ss:$8 sps:$4 sm:$0xff]   ;;  %s4222_s12 = smov (!%p325_p3, %s2549_s12), 1 }
   0xe   : > { %v3027_v2 = vld [vmem:[%s4212_s1 + $0x74] ss:$8 sps:$4 sm:$0xff]   ;;  %337 = vst [vmem:[#allocation2] sm:$0xff] %v3280_v3  ;;  %339 = vst [vmem:[#allocation2 + $0x8] sm:$0x3] %v3280_v3  ;;  %603 = vmatprep.subr.bf16.mxu0 %v3025_v1  ;;  %s2876_s2 = sshll.u32 %s4222_s12, 4 }
   0xf   : > { %336 = vst [vmem:[#allocation2 + $0x10] sm:$0xff] %v3280_v3  ;;  %338 = vst [vmem:[#allocation2 + $0x18] sm:$0x3] %v3280_v3  ;;  %v3030_v5 = vld [vmem:[%s4212_s1 + $0x70] ss:$8 sps:$4 sm:$0xff]   ;;  %804 = vmatprep.subr.bf16.mxu1 %v3027_v2  ;;  %604 = vmatpush1.bf16.msra.mxu0 %v3029_v4  ;;  %s329_s23 = scalar_lea.vmem %s4211_s0, %s2876_s2  ;;  %vm1215_vm0 = vcmask 261120  }
  0x10   : > { %1492 = vst [vmem:[#allocation3] sm:$0xff] %v3280_v3  ;;  %1493 = vst [vmem:[#allocation3 + $0x18] sm:$0xff] %v3280_v3  ;;  %v3031_v6 = vld [vmem:[%s4212_s1 + $0x164] ss:$8 sps:$4 sm:$0xff]   ;;  %805 = vmatpush1.bf16.msra.mxu1 %v3030_v5  ;;  %v3035_v8 = vld [vmem:[%s4212_s1 + $0x160] ss:$8 sps:$4 sm:$0xff]  }
  0x11   : > { %1494 = vst [vmem:[#allocation3 + $0x8] sm:$0x3] %v3280_v3  ;;  %1495 = vst [vmem:[#allocation3 + $0x10] sm:$0x3] %v3280_v3  ;;  %v3033_v7 = vld [vmem:[%s4212_s1 + $0x64] ss:$8 sps:$4 sm:$0xff]   ;;  %605 = vmatprep.subr.bf16.mxu0 %v3031_v6 }
  0x12   : > { %v3036_v9 = vld [vmem:[%s4212_s1 + $0x60] ss:$8 sps:$4 sm:$0xff]   ;;  %806 = vmatprep.subr.bf16.mxu1 %v3033_v7  ;;  %v3037_v10 = vld [vmem:[%s4212_s1 + $0x154] ss:$8 sps:$4 sm:$0xff]   ;;  %v3041_v12 = vld [vmem:[%s4212_s1 + $0x150] ss:$8 sps:$4 sm:$0xff]  }
  0x13   : > { %v3039_v11 = vld [vmem:[%s4212_s1 + $0x54] ss:$8 sps:$4 sm:$0xff]   ;;  %v3042_v13 = vld [vmem:[%s4212_s1 + $0x50] ss:$8 sps:$4 sm:$0xff]   ;;  %606 = vmatpush1.bf16.msra.mxu0 %v3035_v8  ;;  %v3043_v14 = vld [vmem:[%s4212_s1 + $0x144] ss:$8 sps:$4 sm:$0xff]  }
  0x14   : > { %807 = vmatpush1.bf16.msra.mxu1 %v3036_v9  ;;  %607 = vmatprep.subr.bf16.mxu0 %v3037_v10  ;;  %v3045_v15 = vld [vmem:[%s4212_s1 + $0x44] ss:$8 sps:$4 sm:$0xff]   ;;  %v3047_v16 = vld [vmem:[%s4212_s1 + $0x140] ss:$8 sps:$4 sm:$0xff]   ;;  %v3049_v18 = vld [vmem:[%s4212_s1 + $0x134] ss:$8 sps:$4 sm:$0xff]  }
  0x15   : > { %808 = vmatprep.subr.bf16.mxu1 %v3039_v11  ;;  %v3048_v17 = vld [vmem:[%s4212_s1 + $0x40] ss:$8 sps:$4 sm:$0xff]   ;;  %v3051_v19 = vld [vmem:[%s4212_s1 + $0x34] ss:$8 sps:$4 sm:$0xff]   ;;  %v3053_v20 = vld [vmem:[%s4212_s1 + $0x130] ss:$8 sps:$4 sm:$0xff]  }
  0x16   : > { %v3054_v21 = vld [vmem:[%s4212_s1 + $0x30] ss:$8 sps:$4 sm:$0xff]   ;;  %v3055_v22 = vld [vmem:[%s4212_s1 + $0x124] ss:$8 sps:$4 sm:$0xff]   ;;  %v3059_v24 = vld [vmem:[%s4212_s1 + $0x120] ss:$8 sps:$4 sm:$0xff]  }
  0x17   : > { %608 = vmatpush1.bf16.msra.mxu0 %v3041_v12  ;;  %v3057_v23 = vld [vmem:[%s4212_s1 + $0x24] ss:$8 sps:$4 sm:$0xff]   ;;  %v3060_v25 = vld [vmem:[%s4212_s1 + $0x20] ss:$8 sps:$4 sm:$0xff]   ;;  %v3061_v26 = vld [vmem:[%s4212_s1 + $0x114] ss:$8 sps:$4 sm:$0xff]  }
  0x18   : > { %809 = vmatpush1.bf16.msra.mxu1 %v3042_v13  ;;  %609 = vmatprep.subr.bf16.mxu0 %v3043_v14  ;;  %v3063_v27 = vld [vmem:[%s4212_s1 + $0x14] ss:$8 sps:$4 sm:$0xff]   ;;  %v3065_v28 = vld [vmem:[%s4212_s1 + $0x110] ss:$8 sps:$4 sm:$0xff]   ;;  %v3067_v30 = vld [vmem:[%s4212_s1 + $0x104] ss:$8 sps:$4 sm:$0xff]  }
  0x19   : > { %810 = vmatprep.subr.bf16.mxu1 %v3045_v15  ;;  %v3066_v29 = vld [vmem:[%s4212_s1 + $0x10] ss:$8 sps:$4 sm:$0xff]   ;;  %v3069_v31 = vld [vmem:[%s4212_s1 + $0x4] ss:$8 sps:$4 sm:$0xff]   ;;  %v3071_v32 = vld [vmem:[%s4212_s1 + $0x100] ss:$8 sps:$4 sm:$0xff]  }
  0x1a   : > { %v3072_v33 = vld [vmem:[%s4212_s1] ss:$8 sps:$4 sm:$0xff]   ;;  %v3073_v34 = vld [vmem:[%s4212_s1 + $0x1f4] ss:$8 sps:$4 sm:$0xff]   ;;  %v3077_v36 = vld [vmem:[%s4212_s1 + $0x1f0] ss:$8 sps:$4 sm:$0xff]  }
  0x1b   : > { %610 = vmatpush1.bf16.msra.mxu0 %v3047_v16  ;;  %v3075_v35 = vld [vmem:[%s4212_s1 + $0xf4] ss:$8 sps:$4 sm:$0xff]   ;;  %v3078_v37 = vld [vmem:[%s4212_s1 + $0xf0] ss:$8 sps:$4 sm:$0xff]   ;;  %v3079_v38 = vld [vmem:[%s4212_s1 + $0x1e4] ss:$8 sps:$4 sm:$0xff]  }
  0x1c   : > { %811 = vmatpush1.bf16.msra.mxu1 %v3048_v17  ;;  %611 = vmatprep.subr.bf16.mxu0 %v3049_v18  ;;  %v3081_v39 = vld [vmem:[%s4212_s1 + $0xe4] ss:$8 sps:$4 sm:$0xff]   ;;  %v3083_v40 = vld [vmem:[%s4212_s1 + $0x1e0] ss:$8 sps:$4 sm:$0xff]   ;;  %v3085_v42 = vld [vmem:[%s4212_s1 + $0x1d4] ss:$8 sps:$4 sm:$0xff]  }
  0x1d   : > { %812 = vmatprep.subr.bf16.mxu1 %v3051_v19  ;;  %v3084_v41 = vld [vmem:[%s4212_s1 + $0xe0] ss:$8 sps:$4 sm:$0xff]   ;;  %v3087_v43 = vld [vmem:[%s4212_s1 + $0xd4] ss:$8 sps:$4 sm:$0xff]   ;;  %v3089_v44 = vld [vmem:[%s4212_s1 + $0x1d0] ss:$8 sps:$4 sm:$0xff]  }
  0x1e   : > { %v3090_v45 = vld [vmem:[%s4212_s1 + $0xd0] ss:$8 sps:$4 sm:$0xff]   ;;  %v3091_v46 = vld [vmem:[%s4212_s1 + $0x1c4] ss:$8 sps:$4 sm:$0xff]   ;;  %v3095_v51 = vld [vmem:[%s4212_s1 + $0x1c0] ss:$8 sps:$4 sm:$0xff]  }
  0x1f   : > { %612 = vmatpush1.bf16.msra.mxu0 %v3053_v20  ;;  %v3093_v47 = vld [vmem:[%s4212_s1 + $0xc4] ss:$8 sps:$4 sm:$0xff]   ;;  %v3096_v52 = vld [vmem:[%s4212_s1 + $0xc0] ss:$8 sps:$4 sm:$0xff]   ;;  %v3097_v54 = vld [vmem:[%s4212_s1 + $0x1b4] ss:$8 sps:$4 sm:$0xff]  }
  0x20   : > { %813 = vmatpush1.bf16.msra.mxu1 %v3054_v21  ;;  %613 = vmatprep.subr.bf16.mxu0 %v3055_v22  ;;  %v340_v48 = vld [vmem:[%s329_s23] sm:$0xff]  ;;  %v341_v49 = vld [vmem:[%s329_s23 + $0x8] sm:$0xff]  ;;  %v3099_v55 = vld [vmem:[%s4212_s1 + $0xb4] ss:$8 sps:$4 sm:$0xff]   ;;  %vm2359_vm3 = vcmask 1043456   ;;  %vm2352_vm4 = vcmask 64512  }
  0x21   : > { %814 = vmatprep.subr.bf16.mxu1 %v3057_v23  ;;  %v344_v50 = vrot.slane %v340_v48, 7  ;;  %v345_v53 = vrot.slane %v341_v49, 7  ;;  %v3101_v56 = vld [vmem:[%s4212_s1 + $0x1b0] ss:$8 sps:$4 sm:$0xff]   ;;  %v3103_v58 = vld [vmem:[%s4212_s1 + $0x1a4] ss:$8 sps:$4 sm:$0xff]  }
  0x22   : > { %v3102_v57 = vld [vmem:[%s4212_s1 + $0xb0] ss:$8 sps:$4 sm:$0xff]   ;;  %v3105_v59 = vld [vmem:[%s4212_s1 + $0xa4] ss:$8 sps:$4 sm:$0xff]   ;;  %v3107_v60 = vld [vmem:[%s4212_s1 + $0x1a0] ss:$8 sps:$4 sm:$0xff]  }
  0x23   : > { %614 = vmatpush1.bf16.msra.mxu0 %v3059_v24  ;;  %348 = vst [vmem:[#allocation2 + $0x10] sm:$0xfe] %v344_v50  ;;  %350 = vst [vmem:[#allocation2 + $0x18] sm:$0x1] %v344_v50  ;;  %v3108_v61 = vld [vmem:[%s4212_s1 + $0xa0] ss:$8 sps:$4 sm:$0xff]  }
  0x24   : > { %815 = vmatpush1.bf16.msra.mxu1 %v3060_v25  ;;  %615 = vmatprep.subr.bf16.mxu0 %v3061_v26  ;;  %349 = vst [vmem:[#allocation2] sm:$0xfe] %v345_v53  ;;  %351 = vst [vmem:[#allocation2 + $0x8] sm:$0x1] %v345_v53  ;;  %v3109_v62 = vld [vmem:[%s4212_s1 + $0x194] ss:$8 sps:$4 sm:$0xff]  }
  0x25   : > { %816 = vmatprep.subr.bf16.mxu1 %v3063_v27  ;;  %v3111_v63 = vld [vmem:[%s4212_s1 + $0x94] ss:$8 sps:$4 sm:$0xff]   ;;  %v3113_v9 = vld [vmem:[%s4212_s1 + $0x190] ss:$8 sps:$4 sm:$0xff]   ;;  %v3115_v14 = vld [vmem:[%s4212_s1 + $0x184] ss:$8 sps:$4 sm:$0xff]  }
  0x26   : > { %v3114_v11 = vld [vmem:[%s4212_s1 + $0x90] ss:$8 sps:$4 sm:$0xff]   ;;  %v3117_v15 = vld [vmem:[%s4212_s1 + $0x84] ss:$8 sps:$4 sm:$0xff]   ;;  %v3119_v16 = vld [vmem:[%s4212_s1 + $0x180] ss:$8 sps:$4 sm:$0xff]  }
  0x27   : > { %616 = vmatpush1.bf16.msra.mxu0 %v3065_v28  ;;  %v3120_v18 = vld [vmem:[%s4212_s1 + $0x80] ss:$8 sps:$4 sm:$0xff]   ;;  %v3123_v23 = vld [vmem:[%s4212_s1 + $0x274] ss:$8 sps:$4 sm:$0xff]   ;;  %v3121_v26 = vld [vmem:[%s4212_s1 + $0x270] ss:$8 sps:$4 sm:$0xff]  }
  0x28   : > { %817 = vmatpush1.bf16.msra.mxu1 %v3066_v29  ;;  %617 = vmatprep.subr.bf16.mxu0 %v3067_v30  ;;  %v3126_v27 = vld [vmem:[%s4212_s1 + $0x264] ss:$8 sps:$4 sm:$0xff]   ;;  %v3124_v29 = vld [vmem:[%s4212_s1 + $0x260] ss:$8 sps:$4 sm:$0xff]   ;;  %v3129_v30 = vld [vmem:[%s4212_s1 + $0x254] ss:$8 sps:$4 sm:$0xff]  }
  0x29   : > { %818 = vmatprep.subr.bf16.mxu1 %v3069_v31  ;;  %v3148_v48 = vld [vmem:[%s4212_s1 + $0x2e0] ss:$8 sps:$4 sm:$0xff]   ;;  %v3153_v49 = vld [vmem:[%s4212_s1 + $0x2d4] ss:$8 sps:$4 sm:$0xff]   ;;  %v3151_v50 = vld [vmem:[%s4212_s1 + $0x2d0] ss:$8 sps:$4 sm:$0xff]  }
  0x2a   : > { %v388_v0 = vld [vmem:[#allocation2 + $0x10] sm:$0xfe]  ;;  %v390_v1 = vld [vmem:[#allocation2 + $0x18] sm:$0x1]  ;;  %s2877_s2 = sshll.u32 %s4222_s12, 7 }
  0x2b   : > { %618 = vmatpush1.bf16.msra.mxu0 %v3071_v32  ;;  %v389_v2 = vld [vmem:[#allocation2] sm:$0xfe]  ;;  %v391_v4 = vld [vmem:[#allocation2 + $0x8] sm:$0x1]  ;;  %v392_v6 = vpack.c.bf16 %v390_v1, %v388_v0  ;;  %v352_v22 = vld [vmem:[#allocation2 + $0x10] sm:$0xff]  ;;  %s4190_s17 = scalar_lea.vmem %s4220_s9, %s2877_s2 }
  0x2c   : > { %819 = vmatpush1.bf16.msra.mxu1 %v3072_v33  ;;  %619 = vmatprep.subr.bf16.mxu0 %v3073_v34  ;;  %v353_v5 = vld [vmem:[#allocation2] sm:$0xff]  ;;  %v393_v7 = vpack.c.bf16 %v391_v4, %v389_v2  ;;  %v354_v25 = vpack.c.bf16 %v352_v22, %v352_v22  ;;  %v848_v31 = vld [vmem:[#allocation2 + $0x8] sm:$0x3]  ;;  %v3127_v33 = vld [vmem:[%s4212_s1 + $0x250] ss:$8 sps:$4 sm:$0xff]  }
  0x2d   : > { %820 = vmatprep.subr.bf16.mxu1 %v3075_v35  ;;  %v355_v8 = vpack.c.bf16 %v353_v5, %v353_v5  ;;  %v430_v10 = vshll.u32 %v392_v6, 16  ;;  %v428_v19 = vshrl.u32 %v392_v6, 16  ;;  %v846_v28 = vld [vmem:[#allocation2] sm:$0xfc]  ;;  %v3159_v53 = vld [vmem:[%s4212_s1 + $0x2b4] ss:$8 sps:$4 sm:$0xff]  }
  0x2e   : > { %v435_v12 = vshrl.u32 %v393_v7, 16  ;;  %v437_v13 = vshll.u32 %v393_v7, 16  ;;  %v850_v32 = vpack.c.bf16 %v848_v31, %v846_v28  ;;  %v3132_v35 = vld [vmem:[%s4212_s1 + $0x244] ss:$8 sps:$4 sm:$0xff]   ;;  %v3653_v1 = vld [vmem:[%s4216_s5 + $0xf8] sm:$0xff]  ;;  %v3663_v4 = vld [vmem:[%s4216_s5 + $0xf0] sm:$0xff] }
  0x2f   : > { %620 = vmatpush2.bf16.msra.mxu0 %v3077_v36  ;;  %836 = vmatprep.mubr.bf16.mxu1 %v355_v8  ;;  %v432_v20 = vrot.slane %v430_v10, 1  ;;  %v3130_v36 = vld [vmem:[%s4212_s1 + $0x240] ss:$8 sps:$4 sm:$0xff]   ;;  %v3658_v2 = vld [vmem:[%s4216_s5 + $0x78] sm:$0xff]  ;;  %v3814_v28 = vld [vmem:[%s4216_s5 + $0x10] sm:$0xff] }
  0x30   : > { %821 = vmatpush2.bf16.msra.mxu1 %v3078_v37  ;;  %621 = vmatprep.subr.bf16.mxu0 %v3079_v38  ;;  %v439_v17 = vrot.slane %v437_v13, 1  ;;  %v887_v34 = vrot.slane %v850_v32, 1  ;;  %v3135_v37 = vld [vmem:[%s4212_s1 + $0x234] ss:$8 sps:$4 sm:$0xff]   ;;  %v3133_v38 = vld [vmem:[%s4212_s1 + $0x230] ss:$8 sps:$4 sm:$0xff]  }
  0x31   : > { %822 = vmatprep.subr.bf16.mxu1 %v3081_v39  ;;  %v433_v24 = vor.u32 %v432_v20, %v428_v19  ;;  %v3138_v39 = vld [vmem:[%s4212_s1 + $0x224] ss:$8 sps:$4 sm:$0xff]   ;;  %v3705_v10 = vld [vmem:[%s4216_s5 + $0x58] sm:$0xff]  ;;  %v3761_v19 = vld [vmem:[%s4216_s5 + $0xb0] sm:$0xff] }
  0x32   : > { %v440_v21 = vor.u32 %v439_v17, %v435_v12  ;;  %v3675_v5 = vld [vmem:[%s4216_s5 + $0xe8] sm:$0xff]  ;;  %v3687_v7 = vld [vmem:[%s4216_s5 + $0xe0] sm:$0xff]  ;;  %v3717_v12 = vld [vmem:[%s4216_s5 + $0x50] sm:$0xff] }
  0x33   : > { %622 = vmatpush2.bf16.msra.mxu0 %v3083_v40  ;;  %v3136_v40 = vld [vmem:[%s4212_s1 + $0x220] ss:$8 sps:$4 sm:$0xff]   ;;  %v3749_v17 = vld [vmem:[%s4216_s5 + $0xb8] sm:$0xff]  ;;  %v3767_v20 = vld [vmem:[%s4216_s5 + $0x30] sm:$0xff] }
  0x34   : > { %823 = vmatpush2.bf16.msra.mxu1 %v3084_v41  ;;  %623 = vmatprep.subr.bf16.mxu0 %v3085_v42  ;;  %v3141_v41 = vld [vmem:[%s4212_s1 + $0x214] ss:$8 sps:$4 sm:$0xff]   ;;  %v3139_v42 = vld [vmem:[%s4212_s1 + $0x210] ss:$8 sps:$4 sm:$0xff]   ;;  %v3681_v6 = vld [vmem:[%s4216_s5 + $0x68] sm:$0xff] }
  0x35   : > { %824 = vmatprep.subr.bf16.mxu1 %v3087_v43  ;;  %635 = vmatprep.mubr.bf16.mxu0 %v440_v21  ;;  %v3144_v43 = vld [vmem:[%s4212_s1 + $0x204] ss:$8 sps:$4 sm:$0xff]  }
  0x36   : > { %v3693_v8 = vld [vmem:[%s4216_s5 + $0x60] sm:$0xff]  ;;  %v3723_v13 = vld [vmem:[%s4216_s5 + $0xc8] sm:$0xff] }
  0x37   : > { %624 = vmatpush2.bf16.msra.mxu0 %v3089_v44  ;;  %v3142_v44 = vld [vmem:[%s4212_s1 + $0x200] ss:$8 sps:$4 sm:$0xff]  }
  0x38   : > { %825 = vmatpush2.bf16.msra.mxu1 %v3090_v45  ;;  %625 = vmatprep.subr.bf16.mxu0 %v3091_v46  ;;  %v3147_v45 = vld [vmem:[%s4212_s1 + $0x2f4] ss:$8 sps:$4 sm:$0xff]   ;;  %v3145_v46 = vld [vmem:[%s4212_s1 + $0x2f0] ss:$8 sps:$4 sm:$0xff]   ;;  %v3773_v21 = vld [vmem:[%s4216_s5 + $0xa8] sm:$0xff] }
  0x39   : > { %826 = vmatprep.subr.bf16.mxu1 %v3093_v47  ;;  %v3150_v47 = vld [vmem:[%s4212_s1 + $0x2e4] ss:$8 sps:$4 sm:$0xff]  }
  0x3a   : > { %v3779_v22 = vld [vmem:[%s4216_s5 + $0x28] sm:$0xff]  ;;  %v3831_v31 = vld [vmem:[%s4216_s5 + $0x80] sm:$0xff] }
  0x3b   : > { %626 = vmatpush2.bf16.msra.mxu0 %v3095_v51  ;;  %v3156_v51 = vld [vmem:[%s4212_s1 + $0x2c4] ss:$8 sps:$4 sm:$0xff]  }
  0x3c   : > { %827 = vmatpush2.bf16.msra.mxu1 %v3096_v52  ;;  %627 = vmatprep.subr.bf16.mxu0 %v3097_v54  ;;  %v3154_v52 = vld [vmem:[%s4212_s1 + $0x2c0] ss:$8 sps:$4 sm:$0xff]   ;;  %v3157_v54 = vld [vmem:[%s4212_s1 + $0x2b0] ss:$8 sps:$4 sm:$0xff]  }
  0x3d   : > { %828 = vmatprep.subr.bf16.mxu1 %v3099_v55  ;;  %v3162_v55 = vld [vmem:[%s4212_s1 + $0x2a4] ss:$8 sps:$4 sm:$0xff]  }
  0x3e   : > { %v3837_v32 = vld [vmem:[%s4216_s5] sm:$0xff] }
  0x3f   : > { %628 = vmatpush2.bf16.msra.mxu0 %v3101_v56  ;;  %v3160_v56 = vld [vmem:[%s4212_s1 + $0x2a0] ss:$8 sps:$4 sm:$0xff]  }
  0x40   : > { %829 = vmatpush2.bf16.msra.mxu1 %v3102_v57  ;;  %629 = vmatprep.subr.bf16.mxu0 %v3103_v58  ;;  %v3165_v57 = vld [vmem:[%s4212_s1 + $0x294] ss:$8 sps:$4 sm:$0xff]   ;;  %v3163_v58 = vld [vmem:[%s4212_s1 + $0x290] ss:$8 sps:$4 sm:$0xff]  }
  0x41   : > { %830 = vmatprep.subr.bf16.mxu1 %v3105_v59  ;;  %v845_v59 = vld [vmem:[#allocation2 + $0x10] sm:$0xfc] }
  0x43   : > { %630 = vmatpush2.bf16.msra.mxu0 %v3107_v60  ;;  %v847_v60 = vld [vmem:[#allocation2 + $0x18] sm:$0x3] }
  0x44   : > { %831 = vmatpush2.bf16.msra.mxu1 %v3108_v61  ;;  %631 = vmatprep.subr.bf16.mxu0 %v3109_v62  ;;  %v3168_v61 = vld [vmem:[%s4212_s1 + $0x284] ss:$8 sps:$4 sm:$0xff]   ;;  %v849_v62 = vpack.c.bf16 %v847_v60, %v845_v59 }
  0x45   : > { %832 = vmatprep.subr.bf16.mxu1 %v3111_v63  ;;  %v3166_v63 = vld [vmem:[%s4212_s1 + $0x280] ss:$8 sps:$4 sm:$0xff]  }
  0x46   : > { %v886_v0 = vrot.slane %v849_v62, 1 }
  0x47   : > { %632 = vmatpush2.bf16.msra.mxu0 %v3113_v9  ;;  %v3699_v9 = vld [vmem:[%s4216_s5 + $0xd8] sm:$0xff] }
  0x48   : > { %833 = vmatpush2.bf16.msra.mxu1 %v3114_v11  ;;  %633 = vmatprep.subr.bf16.mxu0 %v3115_v14  ;;  %v3711_v11 = vld [vmem:[%s4216_s5 + $0xd0] sm:$0xff]  ;;  %v3729_v14 = vld [vmem:[%s4216_s5 + $0x48] sm:$0xff] }
  0x49   : > { %834 = vmatprep.subr.bf16.mxu1 %v3117_v15  ;;  %v3737_v15 = vld [vmem:[%s4216_s5 + $0xc0] sm:$0xff] }
  0x4b   : > { %634 = vmatpush2.bf16.msra.mxu0 %v3119_v16  ;;  %v3743_v16 = vld [vmem:[%s4216_s5 + $0x40] sm:$0xff] }
  0x4c   : > { %835 = vmatpush2.bf16.msra.mxu1 %v3120_v18  ;;  %1050 = vmatprep.subr.bf16.mxu0 %v3123_v23  ;;  %v3755_v18 = vld [vmem:[%s4216_s5 + $0x38] sm:$0xff]  ;;  %v3785_v23 = vld [vmem:[%s4216_s5 + $0xa0] sm:$0xff] }
  0x4d   : > { %2878 = vmatprep.subr.mxu1 %v3653_v1 }
  0x4e   : > { %636 = vmatmul.mubr.bf16.vlgmr.msra.gmra.mxu0 %v433_v24  ;;  %v3791_v24 = vld [vmem:[%s4216_s5 + $0x20] sm:$0xff] }
  0x4f   : > { %837 = vmatmul.mubr.bf16.vlgmr.msra.gmra.mxu1 %v354_v25  ;;  %1051 = vmatpush1.bf16.msra.mxu0 %v3121_v26  ;;  %v3797_v25 = vld [vmem:[%s4216_s5 + $0x98] sm:$0xff] }
  0x50   : > { %1052 = vmatprep.subr.bf16.mxu0 %v3126_v27  ;;  %1082 = vmatprep.mubr.bf16.mxu0 %v887_v34  ;;  %v3803_v26 = vld [vmem:[%s4216_s5 + $0x18] sm:$0xff]  ;;  %v3809_v27 = vld [vmem:[%s4216_s5 + $0x90] sm:$0xff] }
  0x51   : > { %2879 = vmatpush3.msra.mxu1 %v3658_v2  ;;  %v1213_v34 = vld [vmem:[%s4217_s6 + $0x30] sm:$0xff] }
  0x52   : > { %2880 = vmatprep.subr.mxu1 %v3663_v4 }
  0x53   : > { %1053 = vmatpush1.bf16.msra.mxu0 %v3124_v29  ;;  %v3819_v29 = vld [vmem:[%s4216_s5 + $0x88] sm:$0xff] }
  0x54   : > { %1054 = vmatprep.subr.bf16.mxu0 %v3129_v30  ;;  %v3825_v30 = vld [vmem:[%s4216_s5 + $0x8] sm:$0xff] }
  0x57   : > { %1055 = vmatpush1.bf16.msra.mxu0 %v3127_v33  ;;  %v1214_v33 = vld [vmem:[%s4217_s6 + $0x38] sm:$0xff] }
  0x58   : > { %1056 = vmatprep.subr.bf16.mxu0 %v3132_v35  ;;  %v1212_v35 = vld [vmem:[%s4217_s6 + $0x28] sm:$0xff] }
  0x5b   : > { %1057 = vmatpush1.bf16.msra.mxu0 %v3130_v36 }
  0x5c   : > { %1058 = vmatprep.subr.bf16.mxu0 %v3135_v37 }
  0x5f   : > { %1059 = vmatpush1.bf16.msra.mxu0 %v3133_v38 }
  0x60   : > { %1060 = vmatprep.subr.bf16.mxu0 %v3138_v39 }
  0x63   : > { %1061 = vmatpush1.bf16.msra.mxu0 %v3136_v40 }
  0x64   : > { %1062 = vmatprep.subr.bf16.mxu0 %v3141_v41 }
  0x67   : > { %1063 = vmatpush1.bf16.msra.mxu0 %v3139_v42 }
  0x68   : > { %1064 = vmatprep.subr.bf16.mxu0 %v3144_v43 }
  0x6b   : > { %1065 = vmatpush1.bf16.msra.mxu0 %v3142_v44 }
  0x6c   : > { %1066 = vmatprep.subr.bf16.mxu0 %v3147_v45 }
  0x6f   : > { %1067 = vmatpush2.bf16.msra.mxu0 %v3145_v46 }
  0x70   : > { %1068 = vmatprep.subr.bf16.mxu0 %v3150_v47 }
  0x73   : > { %1069 = vmatpush2.bf16.msra.mxu0 %v3148_v48 }
  0x74   : > { %1070 = vmatprep.subr.bf16.mxu0 %v3153_v49 }
  0x77   : > { %1071 = vmatpush2.bf16.msra.mxu0 %v3151_v50 }
  0x78   : > { %1072 = vmatprep.subr.bf16.mxu0 %v3156_v51 }
  0x7b   : > { %1073 = vmatpush2.bf16.msra.mxu0 %v3154_v52 }
  0x7c   : > { %1074 = vmatprep.subr.bf16.mxu0 %v3159_v53 }
  0x7f   : > { %1075 = vmatpush2.bf16.msra.mxu0 %v3157_v54 }
  0x80   : > { %1076 = vmatprep.subr.bf16.mxu0 %v3162_v55 }
  0x83   : > { %1077 = vmatpush2.bf16.msra.mxu0 %v3160_v56 }
  0x84   : > { %1078 = vmatprep.subr.bf16.mxu0 %v3165_v57 }
  0x87   : > { %1079 = vmatpush2.bf16.msra.mxu0 %v3163_v58 }
  0x88   : > { %1080 = vmatprep.subr.bf16.mxu0 %v3168_v61 }
  0x8b   : > { %1081 = vmatpush2.bf16.msra.mxu0 %v3166_v63 }
  0x8c   : > { %1413 = vmatprep.subr.mxu0 %v1214_v33 }
  0x8e   : > { %1083 = vmatmul.mubr.bf16.vlgmr.msra.gmra.mxu0 %v886_v0  ;;  %v3271_v0 = vld [vmem:[#allocation3] sm:$0xff] }
  0x8f   : > { %1453 = vmatprep.mubr.f32.mxu0 %v3280_v3  ;;  %v3669_v3 = vld [vmem:[%s4216_s5 + $0x70] sm:$0xff]  ;;  %1414 = vmatpush1.msra.mxu0 %v1213_v34 }
  0x90   : > { %2881 = vmatpush3.msra.mxu1 %v3669_v3  ;;  %1415 = vmatprep.subr.mxu0 %v1212_v35 }
  0x91   : > { %2882 = vmatprep.subr.mxu1 %v3675_v5 }
  0x92   : > { %2883 = vmatpush3.msra.mxu1 %v3681_v6 }
  0x93   : > { %2884 = vmatprep.subr.mxu1 %v3687_v7 }
  0x94   : > { %2885 = vmatpush3.msra.mxu1 %v3693_v8 }
  0x95   : > { %2886 = vmatprep.subr.mxu1 %v3699_v9 }
  0x96   : > { %2887 = vmatpush3.msra.mxu1 %v3705_v10 }
  0x97   : > { %2888 = vmatprep.subr.mxu1 %v3711_v11 }
  0x98   : > { %2889 = vmatpush3.msra.mxu1 %v3717_v12 }
  0x99   : > { %2890 = vmatprep.subr.mxu1 %v3723_v13 }
  0x9a   : > { %2891 = vmatpush3.msra.mxu1 %v3729_v14 }
  0x9b   : > { %2892 = vmatprep.subr.mxu1 %v3737_v15 }
  0x9c   : > { %2893 = vmatpush3.msra.mxu1 %v3743_v16 }
  0x9d   : > { %2894 = vmatprep.subr.mxu1 %v3749_v17 }
  0x9e   : > { %2895 = vmatpush3.msra.mxu1 %v3755_v18 }
  0x9f   : > { %2896 = vmatprep.subr.mxu1 %v3761_v19 }
  0xa0   : > { %2897 = vmatpush3.msra.mxu1 %v3767_v20 }
  0xa1   : > { %2898 = vmatprep.subr.mxu1 %v3773_v21 }
  0xa2   : > { %2899 = vmatpush3.msra.mxu1 %v3779_v22 }
  0xa3   : > { %2900 = vmatprep.subr.mxu1 %v3785_v23 }
  0xa4   : > { %2901 = vmatpush3.msra.mxu1 %v3791_v24 }
  0xa5   : > { %2902 = vmatprep.subr.mxu1 %v3797_v25 }
  0xa6   : > { %2903 = vmatpush3.msra.mxu1 %v3803_v26 }
  0xa7   : > { %2904 = vmatprep.subr.mxu1 %v3809_v27 }
  0xa8   : > { %2905 = vmatpush3.msra.mxu1 %v3814_v28 }
  0xa9   : > { %2906 = vmatprep.subr.mxu1 %v3819_v29 }
  0xaa   : > { %2907 = vmatpush3.msra.mxu1 %v3825_v30 }
  0xab   : > { %2908 = vmatprep.subr.mxu1 %v3831_v31 }
  0xac   : > { %2909 = vmatpush3.msra.mxu1 %v3837_v32 }
  0xad   : > { %1243 = vmatprep.subr.mxu1 %v1214_v33  ;;  %v1211_v33 = vld [vmem:[%s4217_s6 + $0x20] sm:$0xff] }
  0xae   : > { %1416 = vmatpush1.msra.mxu0 %v1211_v33 }
 0x10e   : > { %v637_v36 = vpop.f32.mrf.mxu0 }
 0x10f   : > { %v838_v37 = vpop.f32.mrf.mxu1 }
 0x110   : > { %v839_v38 = vadd.f32 %v838_v37, %v637_v36  ;;  %v639_v39 = vpop.f32.mrf.mxu0  ;;  %v1210_v36 = vld [vmem:[%s4217_s6 + $0x18] sm:$0xff]  ;;  %v1209_v37 = vld [vmem:[%s4217_s6 + $0x10] sm:$0xff] }
 0x111   : > { %v840_v40 = vpop.f32.mrf.mxu1  ;;  %1417 = vmatprep.subr.mxu0 %v1210_v36 }
 0x112   : > { %v641_v41 = vpop.f32.mrf.mxu0  ;;  %v841_v46 = vadd.f32 %v840_v40, %v639_v39  ;;  %1418 = vmatpush1.msra.mxu0 %v1209_v37 }
 0x113   : > { %v842_v42 = vpop.f32.mrf.mxu1  ;;  %v3171_v41 = vld [vmem:[%s4214_s3 + $0x70] sm:$0xff]  }
 0x114   : > { %v642_v43 = vpop.f32.mrf.mxu0  ;;  %v3172_v42 = vld [vmem:[%s4214_s3 + $0xf8] sm:$0xff]  }
 0x115   : > { %v843_v44 = vpop.f32.mrf.mxu1  ;;  %v3174_v43 = vld [vmem:[%s4214_s3 + $0xb8] sm:$0xff]  }
 0x116   : > { %v3176_v44 = vld [vmem:[%s4214_s3 + $0xf0] sm:$0xff]  }
 0x14e   : > { %v1084_v45 = vpop.f32.mrf.mxu0 }
 0x14f   : > { %v3851_v47 = vadd.f32 %v1084_v45, %v839_v38  ;;  %v3173_v45 = vld [vmem:[%s4214_s3 + $0x30] sm:$0xff]  }
 0x150   : > { %v1086_v48 = vpop.f32.mrf.mxu0 }
 0x151   : > { %v1093_v49 = vrot.slane %v3851_v47, 4  ;;  %v3854_v50 = vadd.f32 %v1086_v48, %v841_v46  ;;  %v3175_v46 = vld [vmem:[%s4214_s3 + $0x68] sm:$0xff]  }
 0x152   : > { %v1088_v51 = vpop.f32.mrf.mxu0  ;;  %v3177_v48 = vld [vmem:[%s4214_s3 + $0x28] sm:$0xff]  }
 0x153   : > { %v1094_v52 = vadd.f32 %v1093_v49, %v3851_v47  ;;  %v1099_v53 = vrot.slane %v3854_v50, 4  ;;  %v3179_v49 = vld [vmem:[%s4214_s3 + $0x60] sm:$0xff]  }
 0x154   : > { %v1089_v54 = vpop.f32.mrf.mxu0  ;;  %v3181_v51 = vld [vmem:[%s4214_s3 + $0x20] sm:$0xff]  }
 0x155   : > { %v1095_v55 = vrot.slane %v1094_v52, 2  ;;  %v1100_v56 = vadd.f32 %v1099_v53, %v3854_v50  ;;  %v3183_v53 = vld [vmem:[%s4214_s3 + $0x58] sm:$0xff]   ;;  %v3184_v54 = vld [vmem:[%s4214_s3 + $0xe0] sm:$0xff]  }
 0x157   : > { %v1096_v57 = vadd.f32 %v1095_v55, %v1094_v52  ;;  %v1101_v58 = vrot.slane %v1100_v56, 2  ;;  %v3182_v52 = vld [vmem:[%s4214_s3 + $0xa8] sm:$0xff]   ;;  %v3185_v55 = vld [vmem:[%s4214_s3 + $0x18] sm:$0xff]  }
 0x159   : > { %v1102_v59 = vadd.f32 %v1101_v58, %v1100_v56  ;;  %v1097_v60 = vrot.slane %v1096_v57, 1  ;;  %v3186_v56 = vld [vmem:[%s4214_s3 + $0xa0] sm:$0xff]   ;;  %v3188_v58 = vld [vmem:[%s4214_s3 + $0xd8] sm:$0xff]  }
 0x15b   : > { %v1103_v61 = vrot.slane %v1102_v59, 1  ;;  %v1098_v63 = vadd.f32 %v1097_v60, %v1096_v57  ;;  %v3187_v57 = vld [vmem:[%s4214_s3 + $0x50] sm:$0xff]   ;;  %v3190_v60 = vld [vmem:[%s4214_s3 + $0x98] sm:$0xff]  }
 0x15d   : > { %v1104_v62 = vadd.f32 %v1103_v61, %v1102_v59  ;;  %v3189_v59 = vld [vmem:[%s4214_s3 + $0x10] sm:$0xff]   ;;  %v3191_v61 = vld [vmem:[%s4214_s3 + $0x48] sm:$0xff]  }
 0x15f   : > { %1201 = vmatprep.mubr.f32.mxu1 %v1104_v62  ;;  %v3192_v62 = vld [vmem:[%s4214_s3 + $0xd0] sm:$0xff]  }
 0x160   : > { %1202 = vmatmul.mubr.f32.vlgmr.msra.gmra.mxu1 %v1098_v63  ;;  %v3193_v63 = vld [vmem:[%s4214_s3 + $0x8] sm:$0xff]  }
 0x161   : > { %1244 = vmatpush1.msra.mxu1 %v1213_v34  ;;  %1283 = vmatprep.mubr.f32.mxu1 %v3271_v0  ;;  %v1208_v34 = vld [vmem:[%s4217_s6 + $0x8] sm:$0xff]  ;;  %v3194_v0 = vld [vmem:[%s4214_s3 + $0x90] sm:$0xff]  }
 0x162   : > { %1245 = vmatprep.subr.mxu1 %v1212_v35  ;;  %v1207_v35 = vld [vmem:[%s4217_s6] sm:$0xff]  ;;  %1419 = vmatprep.subr.mxu0 %v1208_v34 }
 0x163   : > { %1246 = vmatpush1.msra.mxu1 %v1211_v33  ;;  %1420 = vmatpush1.msra.mxu0 %v1207_v35  ;;  %v3195_v33 = vld [vmem:[%s4214_s3 + $0x40] sm:$0xff]  }
 0x164   : > { %1247 = vmatprep.subr.mxu1 %v1210_v36  ;;  %2948 = vmatprep.subr.bf16.mxu0 %v3172_v42  ;;  %v3196_v36 = vld [vmem:[%s4214_s3 + $0xc8] sm:$0xff]  }
 0x165   : > { %1248 = vmatpush1.msra.mxu1 %v1209_v37  ;;  %v3197_v37 = vld [vmem:[%s4214_s3] sm:$0xff]  }
 0x166   : > { %1249 = vmatprep.subr.mxu1 %v1208_v34  ;;  %v3198_v34 = vld [vmem:[%s4214_s3 + $0x88] sm:$0xff]  }
 0x167   : > { %1250 = vmatpush1.msra.mxu1 %v1207_v35  ;;  %v3199_v35 = vld [vmem:[%s4214_s3 + $0xc0] sm:$0xff]  }
 0x168   : > { %2913 = vmatprep.subr.mxu1 %v3653_v1  ;;  %v1292_v1 = vlaneseq }
 0x220   : > { %v2910_v38 = vpop.f32.mrf.mxu1 }
 0x222   : > { %v2911_v39 = vpop.f32.mrf.mxu1 }
 0x223   : > { %v2912_v40 = vadd.f32 %v2911_v39, %v2910_v38  ;;  %v3200_v38 = vld [vmem:[%s4214_s3 + $0x80] sm:$0xff]   ;;  %v3201_v39 = vld [vmem:[%s4214_s3 + $0x178] sm:$0xff]  }
 0x225   : > { %2718 = vmatmul.mubr.msk.f32.vlgmr.msra.gmra.mxu1 %vm1215_vm0, %v2912_v40 }
 0x226   : > { %2914 = vmatpush3.msra.mxu1 %v3658_v2  ;;  %v1293_v2 = vshrl.u32 %v1292_v1, 7 }
 0x227   : > { %2915 = vmatprep.subr.mxu1 %v3663_v4 }
 0x228   : > { %2916 = vmatpush3.msra.mxu1 %v3669_v3  ;;  %v3907_v4 = vsub.s32 0, %v1293_v2 }
 0x229   : > { %2917 = vmatprep.subr.mxu1 %v3675_v5 }
 0x22a   : > { %2918 = vmatpush3.msra.mxu1 %v3681_v6 }
 0x22b   : > { %2919 = vmatprep.subr.mxu1 %v3687_v7 }
 0x22c   : > { %2920 = vmatpush3.msra.mxu1 %v3693_v8 }
 0x22d   : > { %2921 = vmatprep.subr.mxu1 %v3699_v9 }
 0x22e   : > { %2922 = vmatpush3.msra.mxu1 %v3705_v10 }
 0x22f   : > { %2923 = vmatprep.subr.mxu1 %v3711_v11 }
 0x230   : > { %2924 = vmatpush3.msra.mxu1 %v3717_v12 }
 0x231   : > { %2925 = vmatprep.subr.mxu1 %v3723_v13 }
 0x232   : > { %2926 = vmatpush3.msra.mxu1 %v3729_v14 }
 0x233   : > { %2927 = vmatprep.subr.mxu1 %v3737_v15 }
 0x234   : > { %2928 = vmatpush3.msra.mxu1 %v3743_v16 }
 0x235   : > { %2929 = vmatprep.subr.mxu1 %v3749_v17 }
 0x236   : > { %2930 = vmatpush3.msra.mxu1 %v3755_v18 }
 0x237   : > { %2931 = vmatprep.subr.mxu1 %v3761_v19 }
 0x238   : > { %2932 = vmatpush3.msra.mxu1 %v3767_v20 }
 0x239   : > { %2933 = vmatprep.subr.mxu1 %v3773_v21 }
 0x23a   : > { %2934 = vmatpush3.msra.mxu1 %v3779_v22 }
 0x23b   : > { %2935 = vmatprep.subr.mxu1 %v3785_v23 }
 0x23c   : > { %2936 = vmatpush3.msra.mxu1 %v3791_v24 }
 0x23d   : > { %2937 = vmatprep.subr.mxu1 %v3797_v25 }
 0x23e   : > { %2938 = vmatpush3.msra.mxu1 %v3803_v26  ;;  %v2720_v26 = vld [vmem:[#allocation4] ss:$0 sm:$0xff] }
 0x23f   : > { %2939 = vmatprep.subr.mxu1 %v3809_v27  ;;  %v3281_v27 = vmov 0  }
 0x240   : > { %2940 = vmatpush3.msra.mxu1 %v3814_v28  ;;  %3024 = vset.pattern.permute.xlu0 %v3281_v27 }
 0x241   : > { %2941 = vmatprep.subr.mxu1 %v3819_v29  ;;  %1485 = vperm.xlu0 %3024, %v2720_v26  }
 0x242   : > { %2942 = vmatpush3.msra.mxu1 %v3825_v30 }
 0x243   : > { %2943 = vmatprep.subr.mxu1 %v3831_v31  ;;  %v3169_v31 = vld [vmem:[%s4214_s3 + $0x78] sm:$0xff]  }
 0x244   : > { %2944 = vmatpush3.msra.mxu1 %v3837_v32  ;;  %v3170_v32 = vld [vmem:[%s4214_s3 + $0x38] sm:$0xff]  }
 0x245   : > { %2970 = vmatprep.subr.bf16.mxu1 %v3169_v31 }
 0x2e5   : > { %v1285_v3 = vpop.f32.mrf.mxu1 }
 0x2e6   : > { %v1290_v5 = vmul.f32 0.015625, %v1285_v3 }
 0x2e7   : > { %v1287_v6 = vpop.f32.mrf.mxu1 }
 0x2e8   : > { %v1295_v7 = vrot.slane %v1290_v5, %v3907_v4  ;;  %v1291_v8 = vmul.f32 0.015625, %v1287_v6 }
 0x2ea   : > { %v3911_v9 = vsub.f32 %v3851_v47, %v1295_v7  ;;  %v1299_v10 = vrot.slane %v1291_v8, %v3907_v4  ;;  %v3178_v47 = vld [vmem:[%s4214_s3 + $0xb0] sm:$0xff]  }
 0x2ec   : > { %v1302_v11 = vmul.f32 %v3911_v9, %v3911_v9  ;;  %v3917_v12 = vsub.f32 %v3854_v50, %v1299_v10  ;;  %v3180_v50 = vld [vmem:[%s4214_s3 + $0xe8] sm:$0xff]  }
 0x2ee   : > { %v1304_v13 = vrot.slane %v1302_v11, 4  ;;  %v1303_v14 = vmul.f32 %v3917_v12, %v3917_v12 }
 0x2f0   : > { %v1305_v15 = vadd.f32 %v1304_v13, %v1302_v11  ;;  %v1310_v16 = vrot.slane %v1303_v14, 4  ;;  %v1486_v11 = vpop.permute.xlu0 %1485 }
 0x2f2   : > { %v1306_v17 = vrot.slane %v1305_v15, 2  ;;  %v1311_v18 = vadd.f32 %v1310_v16, %v1303_v14 }
 0x2f4   : > { %v1312_v19 = vrot.slane %v1311_v18, 2  ;;  %v1307_v20 = vadd.f32 %v1306_v17, %v1305_v15 }
 0x2f6   : > { %v1313_v21 = vadd.f32 %v1312_v19, %v1311_v18  ;;  %v1308_v22 = vrot.slane %v1307_v20, 1 }
 0x2f8   : > { %v1314_v23 = vrot.slane %v1313_v21, 1  ;;  %v1309_v25 = vadd.f32 %v1308_v22, %v1307_v20 }
 0x2fa   : > { %v1315_v24 = vadd.f32 %v1314_v23, %v1313_v21 }
 0x2fc   : > { %1380 = vmatprep.mubr.f32.mxu1 %v1315_v24 }
 0x2fd   : > { %1381 = vmatmul.mubr.f32.vlgmr.msra.gmra.mxu1 %v1309_v25 }
 0x2fe   : > { %2971 = vmatpush3.bf16.msra.mxu1 %v3170_v32 }
 0x2ff   : > { %2972 = vmatprep.subr.bf16.mxu1 %v3171_v41 }
 0x302   : > { %2973 = vmatpush3.bf16.msra.mxu1 %v3173_v45 }
 0x303   : > { %2974 = vmatprep.subr.bf16.mxu1 %v3175_v46 }
 0x306   : > { %2975 = vmatpush3.bf16.msra.mxu1 %v3177_v48  ;;  %v3202_v48 = vld [vmem:[%s4214_s3 + $0x138] sm:$0xff]  }
 0x307   : > { %2976 = vmatprep.subr.bf16.mxu1 %v3179_v49 }
 0x30a   : > { %2977 = vmatpush3.bf16.msra.mxu1 %v3181_v51 }
 0x30b   : > { %2978 = vmatprep.subr.bf16.mxu1 %v3183_v53  ;;  %v3205_v53 = vld [vmem:[%s4214_s3 + $0x168] sm:$0xff]  }
 0x30e   : > { %2979 = vmatpush3.bf16.msra.mxu1 %v3185_v55  ;;  %v3207_v55 = vld [vmem:[%s4214_s3 + $0x160] sm:$0xff]  }
 0x30f   : > { %2980 = vmatprep.subr.bf16.mxu1 %v3187_v57  ;;  %v3209_v57 = vld [vmem:[%s4214_s3 + $0x158] sm:$0xff]  }
 0x312   : > { %2981 = vmatpush3.bf16.msra.mxu1 %v3189_v59  ;;  %v3211_v59 = vld [vmem:[%s4214_s3 + $0x150] sm:$0xff]  }
 0x313   : > { %2982 = vmatprep.subr.bf16.mxu1 %v3191_v61  ;;  %v3213_v61 = vld [vmem:[%s4214_s3 + $0x148] sm:$0xff]  }
 0x316   : > { %2983 = vmatpush3.bf16.msra.mxu1 %v3193_v63  ;;  %v3215_v63 = vld [vmem:[%s4214_s3 + $0x140] sm:$0xff]  }
 0x317   : > { %2984 = vmatprep.subr.bf16.mxu1 %v3195_v33 }
 0x31a   : > { %2985 = vmatpush3.bf16.msra.mxu1 %v3197_v37 }
 0x3bd   : > { %v2945_v28 = vpop.f32.mrf.mxu1 }
 0x3bf   : > { %v2946_v29 = vpop.f32.mrf.mxu1 }
 0x3c0   : > { %v2947_v30 = vadd.f32 %v2946_v29, %v2945_v28 }
 0x3c2   : > { %2719 = vmatmul.mubr.msk.f32.vlgmr.msra.gmra.mxu0 %vm1215_vm0, %v2947_v30 }
 0x3c3   : > { %2949 = vmatpush3.bf16.msra.mxu0 %v3174_v43 }
 0x3c4   : > { %2950 = vmatprep.subr.bf16.mxu0 %v3176_v44 }
 0x3c7   : > { %2951 = vmatpush3.bf16.msra.mxu0 %v3178_v47 }
 0x3c8   : > { %2952 = vmatprep.subr.bf16.mxu0 %v3180_v50  ;;  %v3203_v50 = vld [vmem:[%s4214_s3 + $0x170] sm:$0xff]  }
 0x3cb   : > { %2953 = vmatpush3.bf16.msra.mxu0 %v3182_v52  ;;  %v3204_v52 = vld [vmem:[%s4214_s3 + $0x130] sm:$0xff]  }
 0x3cc   : > { %2954 = vmatprep.subr.bf16.mxu0 %v3184_v54  ;;  %v3206_v54 = vld [vmem:[%s4214_s3 + $0x128] sm:$0xff]  }
 0x3cf   : > { %2955 = vmatpush3.bf16.msra.mxu0 %v3186_v56  ;;  %v3208_v56 = vld [vmem:[%s4214_s3 + $0x120] sm:$0xff]  }
 0x3d0   : > { %2956 = vmatprep.subr.bf16.mxu0 %v3188_v58  ;;  %v3210_v58 = vld [vmem:[%s4214_s3 + $0x118] sm:$0xff]  }
 0x3d3   : > { %2957 = vmatpush3.bf16.msra.mxu0 %v3190_v60  ;;  %v3212_v60 = vld [vmem:[%s4214_s3 + $0x110] sm:$0xff]  }
 0x3d4   : > { %2958 = vmatprep.subr.bf16.mxu0 %v3192_v62  ;;  %v3214_v62 = vld [vmem:[%s4214_s3 + $0x108] sm:$0xff]  }
 0x3d7   : > { %2959 = vmatpush3.bf16.msra.mxu0 %v3194_v0 }
 0x3d8   : > { %2960 = vmatprep.subr.bf16.mxu0 %v3196_v36  ;;  %v3216_v36 = vld [vmem:[%s4214_s3 + $0x100] sm:$0xff]  }
 0x3db   : > { %2961 = vmatpush3.bf16.msra.mxu0 %v3198_v34 }
 0x3dc   : > { %2962 = vmatprep.subr.bf16.mxu0 %v3199_v35  ;;  %v3217_v35 = vld [vmem:[%s4218_s7 + $0xe0] ss:$16 sps:$4 sm:$0xff]  }
 0x3df   : > { %2963 = vmatpush3.bf16.msra.mxu0 %v3200_v38  ;;  %v3219_v38 = vld [vmem:[%s4218_s7 + $0xe4] ss:$16 sps:$4 sm:$0xff]  }
 0x3e0   : > { %2992 = vmatprep.subr.bf16.mxu0 %v3201_v39  ;;  %v3220_v39 = vld [vmem:[%s4218_s7 + $0xe8] ss:$16 sps:$4 sm:$0xff]   ;;  %2252 = vmatprep.subr.bf16.mxu1 %v3219_v38 }
 0x482   : > { %v1455_v40 = vpop.f32.mrf.mxu0 }
 0x483   : > { %v1460_v1 = vmul.f32 0.015625, %v1455_v40  ;;  %v3222_v40 = vld [vmem:[%s4218_s7 + $0xec] ss:$16 sps:$4 sm:$0xff]  }
 0x484   : > { %v1457_v2 = vpop.f32.mrf.mxu0 }
 0x485   : > { %v1462_v3 = vadd.f32 1e-05, %v1460_v1  ;;  %v1461_v5 = vmul.f32 0.015625, %v1457_v2  ;;  %v3225_v1 = vld [vmem:[%s4218_s7 + $0xc4] ss:$16 sps:$4 sm:$0xff]  }
 0x486   : > { %v3228_v2 = vld [vmem:[%s4218_s7 + $0xcc] ss:$16 sps:$4 sm:$0xff]  }
 0x487   : > { %3267 = vrsqrt.f32 %v1462_v3  ;;  %v1463_v6 = vadd.f32 1e-05, %v1461_v5  ;;  %v3223_v3 = vld [vmem:[%s4218_s7 + $0xc0] ss:$16 sps:$4 sm:$0xff]   ;;  %v3226_v5 = vld [vmem:[%s4218_s7 + $0xc8] ss:$16 sps:$4 sm:$0xff]  }
 0x489   : > { %3269 = vrsqrt.f32 %v1463_v6  ;;  %v3231_v6 = vld [vmem:[%s4218_s7 + $0xa4] ss:$16 sps:$4 sm:$0xff]  }
 0x494   : > { %v3268_v7 = vpop.eup %3267 }
 0x495   : > { %v1469_v8 = vrot.slane %v3268_v7, %v3907_v4  ;;  %v3234_v7 = vld [vmem:[%s4218_s7 + $0xac] ss:$16 sps:$4 sm:$0xff]  }
 0x496   : > { %v3270_v10 = vpop.eup %3269 }
 0x497   : > { %v1473_v13 = vrot.slane %v3270_v10, %v3907_v4  ;;  %v1474_v14 = vmul.f32 %v1469_v8, %v3911_v9  ;;  %v3229_v8 = vld [vmem:[%s4218_s7 + $0xa0] ss:$16 sps:$4 sm:$0xff]   ;;  %v3232_v10 = vld [vmem:[%s4218_s7 + $0xa8] ss:$16 sps:$4 sm:$0xff]  }
 0x499   : > { %v1475_v15 = vmul.f32 %v1473_v13, %v3917_v12  ;;  %vm1476_vm1 = vcmp.ge.f32.partialorder %v1474_v14, 0.0  ;;  %v1488_v16 = vmul.f32 %v1486_v11, %v1474_v14  ;;  %v3240_v13 = vld [vmem:[%s4218_s7 + $0x8c] ss:$16 sps:$4 sm:$0xff]  }
 0x49b   : > { %vm1477_vm2 = vcmp.ge.f32.partialorder %v1475_v15, 0.0  ;;  %v1489_v17 = vmul.f32 %v1486_v11, %v1475_v15  ;;  %v1490_v18 = vsel %vm1476_vm1, %v1474_v14, %v1488_v16  ;;  %v3237_v11 = vld [vmem:[%s4218_s7 + $0x84] ss:$16 sps:$4 sm:$0xff]   ;;  %v3235_v14 = vld [vmem:[%s4218_s7 + $0x80] ss:$16 sps:$4 sm:$0xff]  }
 0x49c   : > { %v1498_v19 = vrot.slane %v1490_v18, 7  ;;  %v3243_v16 = vld [vmem:[%s4218_s7 + $0x64] ss:$16 sps:$4 sm:$0xff]   ;;  %v3241_v18 = vld [vmem:[%s4218_s7 + $0x60] ss:$16 sps:$4 sm:$0xff]  }
 0x49d   : > { %v1491_v20 = vsel %vm1477_vm2, %v1475_v15, %v1489_v17  ;;  %v3238_v15 = vld [vmem:[%s4218_s7 + $0x88] ss:$16 sps:$4 sm:$0xff]   ;;  %v3246_v17 = vld [vmem:[%s4218_s7 + $0x6c] ss:$16 sps:$4 sm:$0xff]  }
 0x49e   : > { %v1499_v21 = vrot.slane %v1491_v20, 7  ;;  %1502 = vst [vmem:[#allocation3] sm:$0xfe] %v1498_v19  ;;  %1504 = vst [vmem:[#allocation3 + $0x8] sm:$0x1] %v1498_v19 }
 0x49f   : > { %v3244_v19 = vld [vmem:[%s4218_s7 + $0x68] ss:$16 sps:$4 sm:$0xff]   ;;  %v3249_v20 = vld [vmem:[%s4218_s7 + $0x44] ss:$16 sps:$4 sm:$0xff]  }
 0x4a0   : > { %1503 = vst [vmem:[#allocation3 + $0x18] sm:$0xfe] %v1499_v21  ;;  %1505 = vst [vmem:[#allocation3 + $0x10] sm:$0x1] %v1499_v21  ;;  %v3252_v21 = vld [vmem:[%s4218_s7 + $0x4c] ss:$16 sps:$4 sm:$0xff]  }
 0x4a5   : > { %v1542_v22 = vld [vmem:[#allocation3] sm:$0xfe]  ;;  %v1544_v23 = vld [vmem:[#allocation3 + $0x8] sm:$0x1] }
 0x4a6   : > { %v1506_v24 = vld [vmem:[#allocation3] sm:$0xff]  ;;  %v1546_v4 = vpack.c.bf16 %v1544_v23, %v1542_v22  ;;  %v1871_v33 = vld [vmem:[#allocation3 + $0x8] sm:$0x3] }
 0x4a7   : > { %v1507_v25 = vld [vmem:[#allocation3 + $0x18] sm:$0xff]  ;;  %v1545_v26 = vld [vmem:[#allocation3 + $0x10] sm:$0x1]  ;;  %v1508_v30 = vpack.c.bf16 %v1506_v24, %v1506_v24  ;;  %v1869_v0 = vld [vmem:[#allocation3] sm:$0xfc] }
 0x4a8   : > { %v1543_v9 = vld [vmem:[#allocation3 + $0x18] sm:$0xfe]  ;;  %v1509_v12 = vpack.c.bf16 %v1507_v25, %v1507_v25  ;;  %v1584_v29 = vshll.u32 %v1546_v4, 16  ;;  %v1872_v32 = vld [vmem:[#allocation3 + $0x10] sm:$0x3]  ;;  %v1582_v46 = vshrl.u32 %v1546_v4, 16  ;;  %v1873_v37 = vpack.c.bf16 %v1871_v33, %v1869_v0 }
 0x4a9   : > { %v1547_v28 = vpack.c.bf16 %v1545_v26, %v1543_v9  ;;  %v1870_v31 = vld [vmem:[#allocation3 + $0x18] sm:$0xfc]  ;;  %v3247_v22 = vld [vmem:[%s4218_s7 + $0x40] ss:$16 sps:$4 sm:$0xff]   ;;  %v3255_v24 = vld [vmem:[%s4218_s7 + $0x24] ss:$16 sps:$4 sm:$0xff]  }
 0x4aa   : > { %1861 = vmatprep.mubr.bf16.mxu1 %v1509_v12  ;;  %v1586_v42 = vrot.slane %v1584_v29, 1  ;;  %v1874_v45 = vpack.c.bf16 %v1872_v32, %v1870_v31  ;;  %v1910_v34 = vrot.slane %v1873_v37, 1  ;;  %v3250_v23 = vld [vmem:[%s4218_s7 + $0x48] ss:$16 sps:$4 sm:$0xff]   ;;  %v3258_v4 = vld [vmem:[%s4218_s7 + $0x2c] ss:$16 sps:$4 sm:$0xff]  }
 0x4ab   : > { %v1591_v41 = vshll.u32 %v1547_v28, 16  ;;  %1862 = vmatmul.mubr.bf16.vlgmr.msra.gmra.mxu1 %v1508_v30  ;;  %v1589_v43 = vshrl.u32 %v1547_v28, 16  ;;  %v3253_v25 = vld [vmem:[%s4218_s7 + $0x20] ss:$16 sps:$4 sm:$0xff]   ;;  %v3256_v9 = vld [vmem:[%s4218_s7 + $0x28] ss:$16 sps:$4 sm:$0xff]  }
 0x4ac   : > { %2284 = vmatprep.mubr.bf16.mxu1 %v3281_v27  ;;  %v1587_v49 = vor.u32 %v1586_v42, %v1582_v46  ;;  %v1911_v51 = vrot.slane %v1874_v45, 1  ;;  %2253 = vmatpush1.bf16.msra.mxu1 %v3217_v35  ;;  %v3261_v26 = vld [vmem:[%s4218_s7 + $0x4] ss:$16 sps:$4 sm:$0xff]   ;;  %v3264_v12 = vld [vmem:[%s4218_s7 + $0xc] ss:$16 sps:$4 sm:$0xff]  }
 0x4ad   : > { %v1593_v44 = vrot.slane %v1591_v41, 1  ;;  %2254 = vmatprep.subr.bf16.mxu1 %v3225_v1  ;;  %v3259_v28 = vld [vmem:[%s4218_s7] ss:$16 sps:$4 sm:$0xff]   ;;  %v3262_v29 = vld [vmem:[%s4218_s7 + $0x8] ss:$16 sps:$4 sm:$0xff]  }
 0x4ae   : > { %v3265_v35 = vld [vmem:[%s4219_s8] sm:$0xff]   ;;  %v3266_v1 = vld [vmem:[%s4219_s8 + $0x8] sm:$0xff]  }
 0x4af   : > { %v1594_v47 = vor.u32 %v1593_v44, %v1589_v43 }
 0x4b0   : > { %2255 = vmatpush1.bf16.msra.mxu1 %v3223_v3 }
 0x4b1   : > { %1725 = vmatprep.mubr.bf16.mxu0 %v1594_v47  ;;  %2256 = vmatprep.subr.bf16.mxu1 %v3231_v6 }
 0x4b2   : > { %1726 = vmatmul.mubr.bf16.vlgmr.msra.gmra.mxu0 %v1587_v49 }
 0x4b3   : > { %2993 = vmatpush3.bf16.msra.mxu0 %v3202_v48  ;;  %2042 = vmatprep.mubr.bf16.mxu0 %v1911_v51 }
 0x4b4   : > { %2994 = vmatprep.subr.bf16.mxu0 %v3203_v50  ;;  %2257 = vmatpush1.bf16.msra.mxu1 %v3229_v8 }
 0x4b5   : > { %2258 = vmatprep.subr.bf16.mxu1 %v3237_v11 }
 0x4b7   : > { %2995 = vmatpush3.bf16.msra.mxu0 %v3204_v52  ;;  %v2833_v52 = vld [vmem:[%s4215_s4] ss:$0 sm:$0xff] }
 0x4b8   : > { %2996 = vmatprep.subr.bf16.mxu0 %v3205_v53  ;;  %2259 = vmatpush1.bf16.msra.mxu1 %v3235_v14 }
 0x4b9   : > { %2260 = vmatprep.subr.bf16.mxu1 %v3243_v16 }
 0x4bb   : > { %2997 = vmatpush3.bf16.msra.mxu0 %v3206_v54 }
 0x4bc   : > { %2998 = vmatprep.subr.bf16.mxu0 %v3207_v55  ;;  %2261 = vmatpush1.bf16.msra.mxu1 %v3241_v18 }
 0x4bd   : > { %2262 = vmatprep.subr.bf16.mxu1 %v3249_v20 }
 0x4bf   : > { %2999 = vmatpush3.bf16.msra.mxu0 %v3208_v56 }
 0x4c0   : > { %3000 = vmatprep.subr.bf16.mxu0 %v3209_v57  ;;  %2263 = vmatpush1.bf16.msra.mxu1 %v3247_v22 }
 0x4c1   : > { %2264 = vmatprep.subr.bf16.mxu1 %v3255_v24 }
 0x4c3   : > { %3001 = vmatpush3.bf16.msra.mxu0 %v3210_v58 }
 0x4c4   : > { %3002 = vmatprep.subr.bf16.mxu0 %v3211_v59  ;;  %2265 = vmatpush1.bf16.msra.mxu1 %v3253_v25 }
 0x4c5   : > { %2266 = vmatprep.subr.bf16.mxu1 %v3261_v26 }
 0x4c7   : > { %3003 = vmatpush3.bf16.msra.mxu0 %v3212_v60 }
 0x4c8   : > { %3004 = vmatprep.subr.bf16.mxu0 %v3213_v61  ;;  %2267 = vmatpush1.bf16.msra.mxu1 %v3259_v28 }
 0x4cb   : > { %3005 = vmatpush3.bf16.msra.mxu0 %v3214_v62 }
 0x4cc   : > { %3006 = vmatprep.subr.bf16.mxu0 %v3215_v63 }
 0x4cf   : > { %3007 = vmatpush3.bf16.msra.mxu0 %v3216_v36 }
 0x4d0   : > { %2293 = vmatprep.subr.bf16.mxu0 %v3222_v40 }
 0x4d2   : > { %2043 = vmatmul.mubr.bf16.vlgmr.msra.gmra.mxu0 %v1910_v34 }
 0x4d3   : > { %2325 = vmatprep.mubr.bf16.mxu0 %v3281_v27  ;;  %2294 = vmatpush1.bf16.msra.mxu0 %v3220_v39 }
 0x4d4   : > { %2295 = vmatprep.subr.bf16.mxu0 %v3228_v2 }
 0x4d7   : > { %2296 = vmatpush1.bf16.msra.mxu0 %v3226_v5 }
 0x4d8   : > { %2297 = vmatprep.subr.bf16.mxu0 %v3234_v7 }
 0x4db   : > { %2298 = vmatpush1.bf16.msra.mxu0 %v3232_v10 }
 0x4dc   : > { %2299 = vmatprep.subr.bf16.mxu0 %v3240_v13 }
 0x4df   : > { %2300 = vmatpush1.bf16.msra.mxu0 %v3238_v15 }
 0x4e0   : > { %2301 = vmatprep.subr.bf16.mxu0 %v3246_v17 }
 0x4e3   : > { %2302 = vmatpush1.bf16.msra.mxu0 %v3244_v19 }
 0x4e4   : > { %2303 = vmatprep.subr.bf16.mxu0 %v3252_v21 }
 0x4e7   : > { %2304 = vmatpush1.bf16.msra.mxu0 %v3250_v23 }
 0x4e8   : > { %2305 = vmatprep.subr.bf16.mxu0 %v3258_v4 }
 0x4eb   : > { %2306 = vmatpush1.bf16.msra.mxu0 %v3256_v9 }
 0x4ec   : > { %2307 = vmatprep.subr.bf16.mxu0 %v3264_v12 }
 0x4ef   : > { %2308 = vmatpush1.bf16.msra.mxu0 %v3262_v29 }
 0x56b   : > { %v2986_v30 = vpop.f32.mrf.mxu1 }
 0x56d   : > { %v2987_v31 = vpop.f32.mrf.mxu1 }
 0x56e   : > { %v2988_v48 = vadd.f32 %v2987_v31, %v2986_v30 }
 0x56f   : > { %v2989_v32 = vpop.f32.mrf.mxu1 }
 0x571   : > { %v2990_v42 = vpop.f32.mrf.mxu1 }
 0x572   : > { %v2964_v41 = vpop.f32.mrf.mxu0 }
 0x574   : > { %v2965_v43 = vpop.f32.mrf.mxu0 }
 0x575   : > { %v2966_v46 = vadd.f32 %v2965_v43, %v2964_v41 }
 0x576   : > { %v2967_v44 = vpop.f32.mrf.mxu0 }
 0x577   : > { %v1864_v50 = vadd.f32 %v2988_v48, %v2966_v46 }
 0x578   : > { %v2968_v45 = vpop.f32.mrf.mxu0 }
 0x592   : > { %v3008_v47 = vpop.f32.mrf.mxu0 }
 0x594   : > { %v3009_v49 = vpop.f32.mrf.mxu0 }
 0x595   : > { %v3010_v51 = vadd.f32 %v3009_v49, %v3008_v47 }
 0x596   : > { %v3011_v53 = vpop.f32.mrf.mxu0 }
 0x597   : > { %v2050_v54 = vadd.f32 %v3010_v51, %v1864_v50 }
 0x598   : > { %v3012_v55 = vpop.f32.mrf.mxu0 }
 0x599   : > { %v2058_v56 = vadd.f32 %v2833_v52, %v2050_v54 }
 0x59b   : > { %v2059_v57 = vpack.c.bf16 %v2058_v56, %v2058_v56 }
 0x59d   : > { %2285 = vmatmul.mubr.bf16.vlgmr.msra.gmra.mxu1 %v2059_v57  ;;  %2326 = vmatmul.mubr.bf16.vlgmr.msra.gmra.mxu0 %v2059_v57 }
 0x59e   : > { %2404 = vmatprep.mubr.bf16.mxu1 %v3281_v27 }
 0x65d   : > { %v2286_v58 = vpop.f32.mrf.mxu1  ;;  %v2327_v59 = vpop.f32.mrf.mxu0 }
 0x65e   : > { %v2338_v60 = vpack.c.bf16 %v2286_v58, %v2286_v58  ;;  %v2340_v37 = vpack.c.bf16 %v2327_v59, %v2327_v59 }
 0x65f   : > { %v2288_v61 = vpop.f32.mrf.mxu1  ;;  %v2329_v62 = vpop.f32.mrf.mxu0 }
 0x660   : > { %v2339_v63 = vpack.c.bf16 %v2288_v61, %v2288_v61  ;;  %v2361_v36 = vsel %vm2359_vm3, %v2338_v60, 0  ;;  %v2341_v34 = vpack.c.bf16 %v2329_v62, %v2329_v62  ;;  %v2367_v40 = vsel %vm2359_vm3, %v2340_v37, 0 }
 0x661   : > { %v2290_v0 = vpop.f32.mrf.mxu1  ;;  %v2331_v33 = vpop.f32.mrf.mxu0 }
 0x662   : > { %2868 = vmatprep.subr.msk.bf16.mxu1 %vm2359_vm3, %v2339_v63 }
 0x663   : > { %v2291_v38 = vpop.f32.mrf.mxu1  ;;  %v2332_v39 = vpop.f32.mrf.mxu0  ;;  %2387 = vmatpush1.bf16.msra.mxu1 %v2361_v36 }
 0x664   : > { %2871 = vmatprep.subr.msk.bf16.mxu1 %vm2359_vm3, %v2341_v34 }
 0x666   : > { %2869 = vmatmul.mubr.msk.bf16.vlgmr.msra.gmra.mxu1 %vm2352_vm4, %v3265_v35 }
 0x667   : > { %2440 = vmatpush1.bf16.msra.mxu1 %v2367_v40  ;;  %2414 = vmatprep.mubr.bf16.mxu1 %v3281_v27 }
 0x66e   : > { %2870 = vmatmul.mubr.msk.bf16.gmra.mxu1 %vm2352_vm4, %v3266_v1 }
 0x66f   : > { %2457 = vmatprep.mubr.bf16.mxu1 %v3281_v27 }
 0x676   : > { %2872 = vmatmul.mubr.msk.bf16.vlgmr.msra.gmra.mxu1 %vm2352_vm4, %v3265_v35 }
 0x677   : > { %2467 = vmatprep.mubr.bf16.mxu1 %v3281_v27 }
 0x67e   : > { %2873 = vmatmul.mubr.msk.bf16.gmra.mxu1 %vm2352_vm4, %v3266_v1 }
 0x726   : > { %v2406_v2 = vpop.f32.mrf.mxu1 }
 0x727   : > { %2478 = vst [vmem:[%s4190_s17] sm:$0xff] %v2406_v2 }
 0x728   : > { %v2408_v3 = vpop.f32.mrf.mxu1 }
 0x729   : > { %2479 = vst [vmem:[%s4190_s17 + $0x8] sm:$0xff] %v2408_v3 }
 0x72a   : > { %v2410_v27 = vpop.f32.mrf.mxu1 }
 0x72b   : > { %2482 = vst [vmem:[%s4190_s17 + $0x20] sm:$0xff] %v2410_v27 }
 0x72c   : > { %v2412_v5 = vpop.f32.mrf.mxu1 }
 0x72d   : > { %2483 = vst [vmem:[%s4190_s17 + $0x28] sm:$0xff] %v2412_v5 }
 0x72e   : > { %v2416_v6 = vpop.f32.mrf.mxu1 }
 0x72f   : > { %2486 = vst [vmem:[%s4190_s17 + $0x40] sm:$0xff] %v2416_v6 }
 0x730   : > { %v2418_v7 = vpop.f32.mrf.mxu1 }
 0x731   : > { %2487 = vst [vmem:[%s4190_s17 + $0x48] sm:$0xff] %v2418_v7 }
 0x732   : > { %v2420_v8 = vpop.f32.mrf.mxu1 }
 0x733   : > { %2490 = vst [vmem:[%s4190_s17 + $0x60] sm:$0xff] %v2420_v8 }
 0x734   : > { %v2422_v10 = vpop.f32.mrf.mxu1 }
 0x735   : > { %2491 = vst [vmem:[%s4190_s17 + $0x68] sm:$0xff] %v2422_v10 }
 0x736   : > { %v2459_v11 = vpop.f32.mrf.mxu1 }
 0x737   : > { %2480 = vst [vmem:[%s4190_s17 + $0x10] sm:$0xff] %v2459_v11 }
 0x738   : > { %v2461_v13 = vpop.f32.mrf.mxu1 }
 0x739   : > { %2481 = vst [vmem:[%s4190_s17 + $0x18] sm:$0xff] %v2461_v13 }
 0x73a   : > { %v2463_v14 = vpop.f32.mrf.mxu1 }
 0x73b   : > { %2484 = vst [vmem:[%s4190_s17 + $0x30] sm:$0xff] %v2463_v14 }
 0x73c   : > { %v2465_v15 = vpop.f32.mrf.mxu1 }
 0x73d   : > { %2485 = vst [vmem:[%s4190_s17 + $0x38] sm:$0xff] %v2465_v15 }
 0x73e   : > { %v2469_v16 = vpop.f32.mrf.mxu1 }
 0x73f   : > { %2488 = vst [vmem:[%s4190_s17 + $0x50] sm:$0xff] %v2469_v16 }
 0x740   : > { %v2471_v17 = vpop.f32.mrf.mxu1 }
 0x741   : > { %2489 = vst [vmem:[%s4190_s17 + $0x58] sm:$0xff] %v2471_v17 }
 0x742   : > { %v2473_v18 = vpop.f32.mrf.mxu1 }
 0x743   : > { %2492 = vst [vmem:[%s4190_s17 + $0x70] sm:$0xff] %v2473_v18 }
 0x744   : > { %v2475_v19 = vpop.f32.mrf.mxu1 }
 0x745   : > { %2493 = vst [vmem:[%s4190_s17 + $0x78] sm:$0xff] %v2475_v19 }
 0x746 PF: > { %s21_s11 = sadd.s32 1, %s3278_s11  }
 0x747   : > { %p18_p4 = scmp.ge.s32.totalorder %s21_s11, 4  }
 0x749   :  { %20 = sbr.rel (!%p18_p4) target bundleno = 3 (0x3), region = 90 }

</bundles_post_ra>
